<compile_context>
chip_gen: v6e
topology: v6e:2x2x1
jax: 0.10.0
libtpu: 0.0.40
codegen_flags: <defaults>
</compile_context>

<pallas_src>
import functools

import jax
import jax.numpy as jnp
from jax.experimental import pallas as pl
from jax.experimental.pallas import tpu as pltpu

_EPS = 1e-5  # nn.BatchNorm1d default


def _round_up(v, m):
    return (v + m - 1) // m * m


# ----------------------------- in-kernel helpers -----------------------------

def _conv3x3x3(slabs, w_ref):
    """3x3x3 conv for one depth-plane of output voxels.

    slabs: three [H+2, W+2, C] arrays (depth neighbours z-1, z, z+1), already
           zero-padded in H/W and zeroed where the depth neighbour is out of range.
    w_ref: [27*C, Co] packed weights, row index = (dz*9 + dy*3 + dx)*C + c.
    Returns [H*W, Co] float32 (3 MXU matmuls with contraction depth 9*C).
    """
    Hp, Wp, C = slabs[0].shape
    H, W = Hp - 2, Wp - 2
    Co = w_ref.shape[-1]
    acc = jnp.zeros((H * W, Co), jnp.float32)
    for dz in range(3):  # static unroll
        s = slabs[dz]
        cols = jnp.concatenate(
            [s[dy:dy + H, dx:dx + W, :] for dy in range(3) for dx in range(3)],
            axis=-1)                                    # [H, W, 9*C]
        cols = cols.reshape(H * W, 9 * C)               # layout-preserving (W % 8 == 0)
        acc = acc + jnp.dot(cols, w_ref[dz * 9 * C:(dz + 1) * 9 * C, :],
                            preferred_element_type=jnp.float32)
    return acc


def _sums(x):
    """Per-channel [sum; sum of squares] of a [M, C] tile -> [2, C]."""
    return jnp.concatenate([jnp.sum(x, axis=0, keepdims=True),
                            jnp.sum(x * x, axis=0, keepdims=True)], axis=0)


# --------------------------------- kernels -----------------------------------

def conv1_ds_stats_kernel(xm_ref, xc_ref, xp_ref, w1_ref, wd_ref,
                          y1_ref, res_ref, st_ref):
    """Downsample path: y1 = conv1(x) (raw); res = x @ wd (raw 1x1 downsample);
    st = per-tile [sum(y1); sum(y1^2); sum(res); sum(res^2)]."""
    z = pl.program_id(1)
    nz = pl.num_programs(1)
    xm = jnp.where(z > 0, xm_ref[0, 0], 0.0)        # depth halo is zero at z == 0
    xc = xc_ref[0, 0]
    xp = jnp.where(z < nz - 1, xp_ref[0, 0], 0.0)   # depth halo is zero at z == D-1
    pad_hw = lambda a: jnp.pad(a, ((1, 1), (1, 1), (0, 0)))
    y = _conv3x3x3([pad_hw(xm), pad_hw(xc), pad_hw(xp)], w1_ref)
    H, W, Cin = xc.shape
    r = jnp.dot(xc.reshape(H * W, Cin), wd_ref[...],
                preferred_element_type=jnp.float32)
    y1_ref[0, 0] = y
    res_ref[0, 0] = r
    st_ref[0, 0] = jnp.concatenate([_sums(y), _sums(r)], axis=0)


def conv1_stats_kernel(xm_ref, xc_ref, xp_ref, w1_ref, y1_ref, st_ref):
    """Identity path: y1 = conv1(x) (raw); st = [sum(y1); sum(y1^2)].
    No residual slab is materialised (x is re-read in the final kernel)."""
    z = pl.program_id(1)
    nz = pl.num_programs(1)
    xm = jnp.where(z > 0, xm_ref[0, 0], 0.0)
    xc = xc_ref[0, 0]
    xp = jnp.where(z < nz - 1, xp_ref[0, 0], 0.0)
    pad_hw = lambda a: jnp.pad(a, ((1, 1), (1, 1), (0, 0)))
    y = _conv3x3x3([pad_hw(xm), pad_hw(xc), pad_hw(xp)], w1_ref)
    y1_ref[0, 0] = y
    st_ref[0, 0] = _sums(y)


def bn1_relu_conv2_stats_kernel(ym_ref, yc_ref, yp_ref, s1_ref, t1_ref, w2_ref,
                                y2_ref, st_ref):
    """h = relu(scale1*y1 + shift1) fused in-kernel (never hits HBM);
    y2 = conv2(h) (raw); st = per-tile [sum(y2); sum(y2^2)]."""
    z = pl.program_id(1)
    nz = pl.num_programs(1)
    sc = s1_ref[...]
    sh = t1_ref[...]

    def prep(y_raw, valid):
        h = jnp.maximum(y_raw * sc + sh, 0.0)
        if valid is not None:
            h = jnp.where(valid, h, 0.0)  # out-of-range depth neighbour: h1 == 0
        return jnp.pad(h, ((1, 1), (1, 1), (0, 0)))

    y2 = _conv3x3x3([prep(ym_ref[0, 0], z > 0),
                     prep(yc_ref[0, 0], None),
                     prep(yp_ref[0, 0], z < nz - 1)], w2_ref)
    y2_ref[0, 0] = y2
    st_ref[0, 0] = _sums(y2)


def bn2_dsbn_add_relu_kernel(y2_ref, res_ref, s2_ref, sd_ref, t_ref, out_ref):
    """out = relu(s2*y2 + sd*res + (t2+td)) — downsample path, shifts pre-folded."""
    out_ref[0, 0] = jnp.maximum(
        y2_ref[0, 0] * s2_ref[...] + res_ref[0, 0] * sd_ref[...] + t_ref[...], 0.0)


def bn2_addx_relu_kernel(y2_ref, x_ref, s2_ref, t2_ref, out_ref):
    """out = relu(bn2(conv2) + x) — identity path (x read directly, no res slab)."""
    x = x_ref[0, 0]                                   # [H, W, Cin]
    Hh, Ww, Ci = x.shape
    cpad = out_ref.shape[-1]
    r = jnp.pad(x.reshape(Hh * Ww, Ci), ((0, 0), (0, cpad - Ci)))
    out_ref[0, 0] = jnp.maximum(y2_ref[0, 0] * s2_ref[...] + t2_ref[...] + r, 0.0)


# ------------------------------ JAX-side glue ---------------------------------

def _pad_vec(v, cpad):
    v = v.reshape(-1).astype(jnp.float32)
    return jnp.pad(v, (0, cpad - v.shape[0]))


def _bn_affine(s, q, n, gamma, beta):
    """Fold global batch stats into per-channel scale/shift (padded channels -> 0)."""
    mean = s / n
    var = q / n - mean * mean
    scale = gamma / jnp.sqrt(var + _EPS)
    shift = beta - mean * scale
    return scale.reshape(1, -1), shift.reshape(1, -1)


@functools.partial(jax.jit, static_argnames=("stride",))
def basic_block_forward(x, params, stride=1):
    """Pallas BasicBlock forward on a dense voxel grid [B, D, H, W, C] (channels last)."""
    if stride != 1:
        # TODO(synk): stride > 1 (MinkowskiEngine coordinate-managed downsampling).
        raise NotImplementedError("stride != 1 not supported")
    B, D, H, W, Cin = x.shape
    Cout = params["w1"].shape[2]
    Cpad = _round_up(Cout, 128)          # lane-dense stores
    HW = H * W
    N = B * D * HW
    f32 = jnp.float32
    x = x.astype(f32)
    downsample = Cin != Cout             # static under jit (shape-derived)

    # ---- pack parameters (k-major, channel-minor rows; columns padded to Cpad) ----
    w1p = jnp.pad(params["w1"].astype(f32).reshape(27 * Cin, Cout),
                  ((0, 0), (0, Cpad - Cout)))
    w2p = (jnp.zeros((27, Cpad, Cpad), f32)
           .at[:, :Cout, :Cout].set(params["w2"].astype(f32))
           .reshape(27 * Cpad, Cpad))

    cparams = pltpu.CompilerParams(
        dimension_semantics=("parallel", "parallel"),
        vmem_limit_bytes=48 * 1024 * 1024)
    grid = (B, D)

    def slab_specs(c):
        # three depth-neighbour slabs (z-1, z, z+1); boundary indices are clamped
        # and the corresponding slab is zeroed inside the kernel.
        return [
            pl.BlockSpec((1, 1, H, W, c),
                         lambda b, z: (b, jnp.maximum(z - 1, 0), 0, 0, 0)),
            pl.BlockSpec((1, 1, H, W, c), lambda b, z: (b, z, 0, 0, 0)),
            pl.BlockSpec((1, 1, H, W, c),
                         lambda b, z: (b, jnp.minimum(z + 1, D - 1), 0, 0, 0)),
        ]

    def const_spec(shape):
        nd = len(shape)
        return pl.BlockSpec(shape, lambda b, z: (0,) * nd)  # VMEM-resident constants

    row_spec = pl.BlockSpec((1, 1, HW, Cpad), lambda b, z: (b, z, 0, 0))
    row_shape = jax.ShapeDtypeStruct((B, D, HW, Cpad), f32)

    # ---- stage A: conv1 (halo gather) [+ 1x1 downsample conv] + partial BN stats ----
    if downsample:
        wdp = jnp.pad(params["wd"].astype(f32), ((0, 0), (0, Cpad - Cout)))
        y1, res, st1 = pl.pallas_call(
            conv1_ds_stats_kernel,
            grid=grid,
            in_specs=slab_specs(Cin) + [const_spec((27 * Cin, Cpad)),
                                        const_spec((Cin, Cpad))],
            out_specs=[row_spec, row_spec,
                       pl.BlockSpec((1, 1, 4, Cpad), lambda b, z: (b, z, 0, 0))],
            out_shape=[row_shape, row_shape,
                       jax.ShapeDtypeStruct((B, D, 4, Cpad), f32)],
            compiler_params=cparams,
        )(x, x, x, w1p, wdp)
    else:
        y1, st1 = pl.pallas_call(
            conv1_stats_kernel,
            grid=grid,
            in_specs=slab_specs(Cin) + [const_spec((27 * Cin, Cpad))],
            out_specs=[row_spec,
                       pl.BlockSpec((1, 1, 2, Cpad), lambda b, z: (b, z, 0, 0))],
            out_shape=[row_shape,
                       jax.ShapeDtypeStruct((B, D, 2, Cpad), f32)],
            compiler_params=cparams,
        )(x, x, x, w1p)

    # ---- fold global BN1 / BN_downsample stats into scale+shift (tiny, plain JAX) ----
    st1 = jnp.sum(st1, axis=(0, 1))                                  # [k, Cpad]
    s1, t1 = _bn_affine(st1[0], st1[1], N,
                        _pad_vec(params["g1"], Cpad), _pad_vec(params["b1"], Cpad))
    if downsample:
        sd, td = _bn_affine(st1[2], st1[3], N,
                            _pad_vec(params["gd"], Cpad), _pad_vec(params["bd"], Cpad))

    # ---- stage B: fused bn1+relu + conv2 + partial BN2 stats ----
    y1r = y1.reshape(B, D, H, W, Cpad)   # metadata-only reshape
    y2, st2 = pl.pallas_call(
        bn1_relu_conv2_stats_kernel,
        grid=grid,
        in_specs=slab_specs(Cpad) + [const_spec((1, Cpad)), const_spec((1, Cpad)),
                                     const_spec((27 * Cpad, Cpad))],
        out_specs=[row_spec,
                   pl.BlockSpec((1, 1, 2, Cpad), lambda b, z: (b, z, 0, 0))],
        out_shape=[row_shape, jax.ShapeDtypeStruct((B, D, 2, Cpad), f32)],
        compiler_params=cparams,
    )(y1r, y1r, y1r, s1, t1, w2p)

    st2 = jnp.sum(st2, axis=(0, 1))
    s2, t2 = _bn_affine(st2[0], st2[1], N,
                        _pad_vec(params["g2"], Cpad), _pad_vec(params["b2"], Cpad))

    # ---- stage C: bn2 + residual + add + relu (lane-dense elementwise tiles) ----
    if downsample:
        out = pl.pallas_call(
            bn2_dsbn_add_relu_kernel,
            grid=grid,
            in_specs=[row_spec, row_spec] + [const_spec((1, Cpad))] * 3,
            out_specs=row_spec,
            out_shape=row_shape,
            compiler_params=cparams,
        )(y2, res, s2, sd, t2 + td)      # shifts pre-folded on host
    else:
        x_spec = pl.BlockSpec((1, 1, H, W, Cin), lambda b, z: (b, z, 0, 0, 0))
        out = pl.pallas_call(
            bn2_addx_relu_kernel,
            grid=grid,
            in_specs=[row_spec, x_spec, const_spec((1, Cpad)), const_spec((1, Cpad))],
            out_specs=row_spec,
            out_shape=row_shape,
            compiler_params=cparams,
        )(y2, x, s2, t2)

    return out.reshape(B, D, H, W, Cpad)[..., :Cout]


# --------------------------- pure-JAX reference --------------------------------

def im2col_3x3x3(x):
    """x: [B, D, H, W, C] -> [27, B*D*H*W, C] of zero-padded neighbour features."""
    B, D, H, W, C = x.shape
    xp = jnp.pad(x, ((0, 0), (1, 1), (1, 1), (1, 1), (0, 0)))
    cols = []
    for dz in range(3):
        for dy in range(3):
            for dx in range(3):
                cols.append(
                    xp[:, dz:dz + D, dy:dy + H, dx:dx + W, :].reshape(B * D * H * W, C))
    return jnp.stack(cols, axis=0)


def _ref_bn(x, g, b):
    mean = jnp.mean(x, axis=0, keepdims=True)
    var = jnp.mean(jnp.square(x - mean), axis=0, keepdims=True)
    return (x - mean) / jnp.sqrt(var + _EPS) * g + b


def basic_block_reference(x, params):
    B, D, H, W, Cin = x.shape
    Cout = params["w1"].shape[2]
    N = B * D * H * W

    def conv3(xg, w):
        xcol = im2col_3x3x3(xg)                       # [27, N, Ci]
        return jnp.einsum("knc,kcd->nd", xcol, w)     # [N, Co]

    h = jnp.maximum(_ref_bn(conv3(x, params["w1"]), params["g1"], params["b1"]), 0.0)
    h2 = _ref_bn(conv3(h.reshape(B, D, H, W, Cout), params["w2"]),
                 params["g2"], params["b2"])
    if Cin != Cout:
        res = _ref_bn(x.reshape(N, Cin) @ params["wd"], params["gd"], params["bd"])
    else:
        res = x.reshape(N, Cin)
    return jnp.maximum(h2 + res, 0.0).reshape(B, D, H, W, Cout)


# ------------------------------------ main -------------------------------------

if __name__ == "__main__":
    B, D, H, W = 2, 8, 8, 8
    Cin, Cout = 4, 8   # Cin != Cout -> downsample branch is exercised

    key = jax.random.PRNGKey(0)
    ks = jax.random.split(key, 14)
    x = jax.random.normal(ks[0], (B, D, H, W, Cin), jnp.float32)

    # ME conv weights: [kernel_volume, Cin, Cout], no bias.
    params = {
        "w1": 0.1 * jax.random.normal(ks[1], (27, Cin, Cout), jnp.float32),
        "g1": 1.0 + 0.1 * jax.random.normal(ks[2], (1, Cout), jnp.float32),
        "b1": 0.1 * jax.random.normal(ks[3], (1, Cout), jnp.float32),
        "w2": 0.1 * jax.random.normal(ks[4], (27, Cout, Cout), jnp.float32),
        "g2": 1.0 + 0.1 * jax.random.normal(ks[5], (1, Cout), jnp.float32),
        "b2": 0.1 * jax.random.normal(ks[6], (1, Cout), jnp.float32),
        "wd": 0.1 * jax.random.normal(ks[7], (Cin, Cout), jnp.float32),
        "gd": 1.0 + 0.1 * jax.random.normal(ks[8], (1, Cout), jnp.float32),
        "bd": 0.1 * jax.random.normal(ks[9], (1, Cout), jnp.float32),
    }

    out = jax.block_until_ready(basic_block_forward(x, params, stride=1))
    ref = basic_block_reference(x, params)
    assert out.shape == (B, D, H, W, Cout)
    err = float(jnp.max(jnp.abs(out - ref)))
    assert jnp.allclose(out, ref, rtol=1e-4, atol=2e-4), f"max abs err {err}"

    # Identity-residual branch (Cin == Cout, downsample = None) — fast path.
    x2 = jax.random.normal(ks[10], (B, D, H, W, Cout), jnp.float32)
    params_id = {
        "w1": 0.1 * jax.random.normal(ks[11], (27, Cout, Cout), jnp.float32),
        "g1": params["g1"], "b1": params["b1"],
        "w2": params["w2"], "g2": params["g2"], "b2": params["b2"],
    }
    out2 = jax.block_until_ready(basic_block_forward(x2, params_id, stride=1))
    ref2 = basic_block_reference(x2, params_id)
    err2 = float(jnp.max(jnp.abs(out2 - ref2)))
    assert jnp.allclose(out2, ref2, rtol=1e-4, atol=2e-4), f"max abs err {err2}"

    print("KERNEL_OK")
</pallas_src>

<mosaic_0001>
module attributes {stable_mosaic.version = 11 : i64} {
  func.func @bn1_relu_conv2_stats_kernel(%arg0: i32, %arg1: i32, %arg2: memref<1x1x8x8x128xf32, #tpu.memory_space<vmem>>, %arg3: memref<1x1x8x8x128xf32, #tpu.memory_space<vmem>>, %arg4: memref<1x1x8x8x128xf32, #tpu.memory_space<vmem>>, %arg5: memref<1x128xf32, #tpu.memory_space<vmem>>, %arg6: memref<1x128xf32, #tpu.memory_space<vmem>>, %arg7: memref<3456x128xf32, #tpu.memory_space<vmem>>, %arg8: memref<1x1x64x128xf32, #tpu.memory_space<vmem>>, %arg9: memref<1x1x2x128xf32, #tpu.memory_space<vmem>>) attributes {dimension_semantics = [#tpu.dimension_semantics<parallel>, #tpu.dimension_semantics<parallel>], iteration_bounds = array<i64: 2, 8>, scalar_prefetch = 0 : i64, scratch_operands = 0 : i64, tpu.core_type = #tpu.core_type<tc>, window_params = [{transform_indices = @transform_0, window_bounds = array<i64: 1, 1, 8, 8, 128>}, {transform_indices = @transform_1, window_bounds = array<i64: 1, 1, 8, 8, 128>}, {transform_indices = @transform_2, window_bounds = array<i64: 1, 1, 8, 8, 128>}, {pipeline_mode = #tpu.pipeline_mode<synchronous>, transform_indices = @transform_3, window_bounds = array<i64: 1, 128>}, {pipeline_mode = #tpu.pipeline_mode<synchronous>, transform_indices = @transform_4, window_bounds = array<i64: 1, 128>}, {pipeline_mode = #tpu.pipeline_mode<synchronous>, transform_indices = @transform_5, window_bounds = array<i64: 3456, 128>}, {transform_indices = @transform_6, window_bounds = array<i64: 1, 1, 64, 128>}, {transform_indices = @transform_7, window_bounds = array<i64: 1, 1, 2, 128>}]} {
    %c0 = arith.constant 0 : index
    %c0_0 = arith.constant 0 : index
    %0 = vector.load %arg5[%c0, %c0_0] : memref<1x128xf32, #tpu.memory_space<vmem>>, vector<1x128xf32>
    %c0_1 = arith.constant 0 : index
    %c0_2 = arith.constant 0 : index
    %1 = vector.load %arg6[%c0_1, %c0_2] : memref<1x128xf32, #tpu.memory_space<vmem>>, vector<1x128xf32>
    %c0_3 = arith.constant 0 : index
    %c0_4 = arith.constant 0 : index
    %c0_5 = arith.constant 0 : index
    %c0_6 = arith.constant 0 : index
    %c0_7 = arith.constant 0 : index
    %2 = vector.load %arg2[%c0_3, %c0_4, %c0_5, %c0_6, %c0_7] : memref<1x1x8x8x128xf32, #tpu.memory_space<vmem>>, vector<1x1x8x8x128xf32>
    %3 = vector.shape_cast %2 : vector<1x1x8x8x128xf32> to vector<8x8x128xf32>
    %c0_i32 = arith.constant 0 : i32
    %4 = arith.cmpi sgt, %arg1, %c0_i32 : i32
    %5 = vector.shape_cast %0 : vector<1x128xf32> to vector<1x1x128xf32>
    %6 = vector.broadcast %5 : vector<1x1x128xf32> to vector<8x8x128xf32>
    %7 = arith.mulf %3, %6 : vector<8x8x128xf32>
    %8 = vector.shape_cast %1 : vector<1x128xf32> to vector<1x1x128xf32>
    %9 = vector.broadcast %8 : vector<1x1x128xf32> to vector<8x8x128xf32>
    %10 = arith.addf %7, %9 : vector<8x8x128xf32>
    %cst = arith.constant 0.000000e+00 : f32
    %11 = vector.broadcast %cst : f32 to vector<8x8x128xf32>
    %12 = arith.maximumf %10, %11 : vector<8x8x128xf32>
    %cst_8 = arith.constant 0.000000e+00 : f32
    %13 = vector.broadcast %cst_8 : f32 to vector<8x8x128xf32>
    %14 = arith.select %4, %12, %13 : vector<8x8x128xf32>
    %c0_i32_9 = arith.constant 0 : i32
    %15 = arith.sitofp %c0_i32_9 : i32 to f32
    %16 = vector.broadcast %15 : f32 to vector<1x8x128xf32>
    %17 = tpu.concatenate %16, %14 in 0 : vector<1x8x128xf32>, vector<8x8x128xf32> -> vector<9x8x128xf32>
    %18 = vector.broadcast %15 : f32 to vector<1x8x128xf32>
    %19 = tpu.concatenate %17, %18 in 0 : vector<9x8x128xf32>, vector<1x8x128xf32> -> vector<10x8x128xf32>
    %20 = vector.broadcast %15 : f32 to vector<10x1x128xf32>
    %21 = tpu.concatenate %20, %19 in 1 : vector<10x1x128xf32>, vector<10x8x128xf32> -> vector<10x9x128xf32>
    %22 = vector.broadcast %15 : f32 to vector<10x1x128xf32>
    %23 = tpu.concatenate %21, %22 in 1 : vector<10x9x128xf32>, vector<10x1x128xf32> -> vector<10x10x128xf32>
    %c0_10 = arith.constant 0 : index
    %c0_11 = arith.constant 0 : index
    %c0_12 = arith.constant 0 : index
    %c0_13 = arith.constant 0 : index
    %c0_14 = arith.constant 0 : index
    %24 = vector.load %arg3[%c0_10, %c0_11, %c0_12, %c0_13, %c0_14] : memref<1x1x8x8x128xf32, #tpu.memory_space<vmem>>, vector<1x1x8x8x128xf32>
    %25 = vector.shape_cast %24 : vector<1x1x8x8x128xf32> to vector<8x8x128xf32>
    %26 = vector.shape_cast %0 : vector<1x128xf32> to vector<1x1x128xf32>
    %27 = vector.broadcast %26 : vector<1x1x128xf32> to vector<8x8x128xf32>
    %28 = arith.mulf %25, %27 : vector<8x8x128xf32>
    %29 = vector.shape_cast %1 : vector<1x128xf32> to vector<1x1x128xf32>
    %30 = vector.broadcast %29 : vector<1x1x128xf32> to vector<8x8x128xf32>
    %31 = arith.addf %28, %30 : vector<8x8x128xf32>
    %cst_15 = arith.constant 0.000000e+00 : f32
    %32 = vector.broadcast %cst_15 : f32 to vector<8x8x128xf32>
    %33 = arith.maximumf %31, %32 : vector<8x8x128xf32>
    %c0_i32_16 = arith.constant 0 : i32
    %34 = arith.sitofp %c0_i32_16 : i32 to f32
    %35 = vector.broadcast %34 : f32 to vector<1x8x128xf32>
    %36 = tpu.concatenate %35, %33 in 0 : vector<1x8x128xf32>, vector<8x8x128xf32> -> vector<9x8x128xf32>
    %37 = vector.broadcast %34 : f32 to vector<1x8x128xf32>
    %38 = tpu.concatenate %36, %37 in 0 : vector<9x8x128xf32>, vector<1x8x128xf32> -> vector<10x8x128xf32>
    %39 = vector.broadcast %34 : f32 to vector<10x1x128xf32>
    %40 = tpu.concatenate %39, %38 in 1 : vector<10x1x128xf32>, vector<10x8x128xf32> -> vector<10x9x128xf32>
    %41 = vector.broadcast %34 : f32 to vector<10x1x128xf32>
    %42 = tpu.concatenate %40, %41 in 1 : vector<10x9x128xf32>, vector<10x1x128xf32> -> vector<10x10x128xf32>
    %c0_17 = arith.constant 0 : index
    %c0_18 = arith.constant 0 : index
    %c0_19 = arith.constant 0 : index
    %c0_20 = arith.constant 0 : index
    %c0_21 = arith.constant 0 : index
    %43 = vector.load %arg4[%c0_17, %c0_18, %c0_19, %c0_20, %c0_21] : memref<1x1x8x8x128xf32, #tpu.memory_space<vmem>>, vector<1x1x8x8x128xf32>
    %44 = vector.shape_cast %43 : vector<1x1x8x8x128xf32> to vector<8x8x128xf32>
    %c7_i32 = arith.constant 7 : i32
    %45 = arith.cmpi slt, %arg1, %c7_i32 : i32
    %46 = vector.shape_cast %0 : vector<1x128xf32> to vector<1x1x128xf32>
    %47 = vector.broadcast %46 : vector<1x1x128xf32> to vector<8x8x128xf32>
    %48 = arith.mulf %44, %47 : vector<8x8x128xf32>
    %49 = vector.shape_cast %1 : vector<1x128xf32> to vector<1x1x128xf32>
    %50 = vector.broadcast %49 : vector<1x1x128xf32> to vector<8x8x128xf32>
    %51 = arith.addf %48, %50 : vector<8x8x128xf32>
    %cst_22 = arith.constant 0.000000e+00 : f32
    %52 = vector.broadcast %cst_22 : f32 to vector<8x8x128xf32>
    %53 = arith.maximumf %51, %52 : vector<8x8x128xf32>
    %cst_23 = arith.constant 0.000000e+00 : f32
    %54 = vector.broadcast %cst_23 : f32 to vector<8x8x128xf32>
    %55 = arith.select %45, %53, %54 : vector<8x8x128xf32>
    %c0_i32_24 = arith.constant 0 : i32
    %56 = arith.sitofp %c0_i32_24 : i32 to f32
    %57 = vector.broadcast %56 : f32 to vector<1x8x128xf32>
    %58 = tpu.concatenate %57, %55 in 0 : vector<1x8x128xf32>, vector<8x8x128xf32> -> vector<9x8x128xf32>
    %59 = vector.broadcast %56 : f32 to vector<1x8x128xf32>
    %60 = tpu.concatenate %58, %59 in 0 : vector<9x8x128xf32>, vector<1x8x128xf32> -> vector<10x8x128xf32>
    %61 = vector.broadcast %56 : f32 to vector<10x1x128xf32>
    %62 = tpu.concatenate %61, %60 in 1 : vector<10x1x128xf32>, vector<10x8x128xf32> -> vector<10x9x128xf32>
    %63 = vector.broadcast %56 : f32 to vector<10x1x128xf32>
    %64 = tpu.concatenate %62, %63 in 1 : vector<10x9x128xf32>, vector<10x1x128xf32> -> vector<10x10x128xf32>
    %cst_25 = arith.constant 0.000000e+00 : f32
    %65 = vector.broadcast %cst_25 : f32 to vector<64x128xf32>
    %66 = vector.extract_strided_slice %23 {offsets = [0, 0, 0], sizes = [8, 8, 128], strides = [1, 1, 1]} : vector<10x10x128xf32> to vector<8x8x128xf32>
    %67 = vector.extract_strided_slice %23 {offsets = [0, 1, 0], sizes = [8, 8, 128], strides = [1, 1, 1]} : vector<10x10x128xf32> to vector<8x8x128xf32>
    %68 = vector.extract_strided_slice %23 {offsets = [0, 2, 0], sizes = [8, 8, 128], strides = [1, 1, 1]} : vector<10x10x128xf32> to vector<8x8x128xf32>
    %69 = vector.extract_strided_slice %23 {offsets = [1, 0, 0], sizes = [8, 8, 128], strides = [1, 1, 1]} : vector<10x10x128xf32> to vector<8x8x128xf32>
    %70 = vector.extract_strided_slice %23 {offsets = [1, 1, 0], sizes = [8, 8, 128], strides = [1, 1, 1]} : vector<10x10x128xf32> to vector<8x8x128xf32>
    %71 = vector.extract_strided_slice %23 {offsets = [1, 2, 0], sizes = [8, 8, 128], strides = [1, 1, 1]} : vector<10x10x128xf32> to vector<8x8x128xf32>
    %72 = vector.extract_strided_slice %23 {offsets = [2, 0, 0], sizes = [8, 8, 128], strides = [1, 1, 1]} : vector<10x10x128xf32> to vector<8x8x128xf32>
    %73 = vector.extract_strided_slice %23 {offsets = [2, 1, 0], sizes = [8, 8, 128], strides = [1, 1, 1]} : vector<10x10x128xf32> to vector<8x8x128xf32>
    %74 = vector.extract_strided_slice %23 {offsets = [2, 2, 0], sizes = [8, 8, 128], strides = [1, 1, 1]} : vector<10x10x128xf32> to vector<8x8x128xf32>
    %75 = tpu.concatenate %66, %67, %68, %69, %70, %71, %72, %73, %74 in 2 : vector<8x8x128xf32>, vector<8x8x128xf32>, vector<8x8x128xf32>, vector<8x8x128xf32>, vector<8x8x128xf32>, vector<8x8x128xf32>, vector<8x8x128xf32>, vector<8x8x128xf32>, vector<8x8x128xf32> -> vector<8x8x1152xf32>
    %76 = vector.shape_cast %75 : vector<8x8x1152xf32> to vector<64x1152xf32>
    %c0_26 = arith.constant 0 : index
    %c0_27 = arith.constant 0 : index
    %77 = vector.load %arg7[%c0_26, %c0_27] : memref<3456x128xf32, #tpu.memory_space<vmem>>, vector<1152x128xf32>
    %cst_28 = arith.constant dense<0.000000e+00> : vector<64x128xf32>
    %78 = tpu.matmul %76, %77, %cst_28 {dimension_numbers = #tpu.dot_dimension_numbers<[1], [0], [0], [1], [0, 0, 1, 1], [], []>} : vector<64x1152xf32>, vector<1152x128xf32>, vector<64x128xf32> -> vector<64x128xf32>
    %79 = arith.addf %65, %78 : vector<64x128xf32>
    %80 = vector.extract_strided_slice %42 {offsets = [0, 0, 0], sizes = [8, 8, 128], strides = [1, 1, 1]} : vector<10x10x128xf32> to vector<8x8x128xf32>
    %81 = vector.extract_strided_slice %42 {offsets = [0, 1, 0], sizes = [8, 8, 128], strides = [1, 1, 1]} : vector<10x10x128xf32> to vector<8x8x128xf32>
    %82 = vector.extract_strided_slice %42 {offsets = [0, 2, 0], sizes = [8, 8, 128], strides = [1, 1, 1]} : vector<10x10x128xf32> to vector<8x8x128xf32>
    %83 = vector.extract_strided_slice %42 {offsets = [1, 0, 0], sizes = [8, 8, 128], strides = [1, 1, 1]} : vector<10x10x128xf32> to vector<8x8x128xf32>
    %84 = vector.extract_strided_slice %42 {offsets = [1, 1, 0], sizes = [8, 8, 128], strides = [1, 1, 1]} : vector<10x10x128xf32> to vector<8x8x128xf32>
    %85 = vector.extract_strided_slice %42 {offsets = [1, 2, 0], sizes = [8, 8, 128], strides = [1, 1, 1]} : vector<10x10x128xf32> to vector<8x8x128xf32>
    %86 = vector.extract_strided_slice %42 {offsets = [2, 0, 0], sizes = [8, 8, 128], strides = [1, 1, 1]} : vector<10x10x128xf32> to vector<8x8x128xf32>
    %87 = vector.extract_strided_slice %42 {offsets = [2, 1, 0], sizes = [8, 8, 128], strides = [1, 1, 1]} : vector<10x10x128xf32> to vector<8x8x128xf32>
    %88 = vector.extract_strided_slice %42 {offsets = [2, 2, 0], sizes = [8, 8, 128], strides = [1, 1, 1]} : vector<10x10x128xf32> to vector<8x8x128xf32>
    %89 = tpu.concatenate %80, %81, %82, %83, %84, %85, %86, %87, %88 in 2 : vector<8x8x128xf32>, vector<8x8x128xf32>, vector<8x8x128xf32>, vector<8x8x128xf32>, vector<8x8x128xf32>, vector<8x8x128xf32>, vector<8x8x128xf32>, vector<8x8x128xf32>, vector<8x8x128xf32> -> vector<8x8x1152xf32>
    %90 = vector.shape_cast %89 : vector<8x8x1152xf32> to vector<64x1152xf32>
    %c1152 = arith.constant 1152 : index
    %c0_29 = arith.constant 0 : index
    %91 = vector.load %arg7[%c1152, %c0_29] : memref<3456x128xf32, #tpu.memory_space<vmem>>, vector<1152x128xf32>
    %cst_30 = arith.constant dense<0.000000e+00> : vector<64x128xf32>
    %92 = tpu.matmul %90, %91, %cst_30 {dimension_numbers = #tpu.dot_dimension_numbers<[1], [0], [0], [1], [0, 0, 1, 1], [], []>} : vector<64x1152xf32>, vector<1152x128xf32>, vector<64x128xf32> -> vector<64x128xf32>
    %93 = arith.addf %79, %92 : vector<64x128xf32>
    %94 = vector.extract_strided_slice %64 {offsets = [0, 0, 0], sizes = [8, 8, 128], strides = [1, 1, 1]} : vector<10x10x128xf32> to vector<8x8x128xf32>
    %95 = vector.extract_strided_slice %64 {offsets = [0, 1, 0], sizes = [8, 8, 128], strides = [1, 1, 1]} : vector<10x10x128xf32> to vector<8x8x128xf32>
    %96 = vector.extract_strided_slice %64 {offsets = [0, 2, 0], sizes = [8, 8, 128], strides = [1, 1, 1]} : vector<10x10x128xf32> to vector<8x8x128xf32>
    %97 = vector.extract_strided_slice %64 {offsets = [1, 0, 0], sizes = [8, 8, 128], strides = [1, 1, 1]} : vector<10x10x128xf32> to vector<8x8x128xf32>
    %98 = vector.extract_strided_slice %64 {offsets = [1, 1, 0], sizes = [8, 8, 128], strides = [1, 1, 1]} : vector<10x10x128xf32> to vector<8x8x128xf32>
    %99 = vector.extract_strided_slice %64 {offsets = [1, 2, 0], sizes = [8, 8, 128], strides = [1, 1, 1]} : vector<10x10x128xf32> to vector<8x8x128xf32>
    %100 = vector.extract_strided_slice %64 {offsets = [2, 0, 0], sizes = [8, 8, 128], strides = [1, 1, 1]} : vector<10x10x128xf32> to vector<8x8x128xf32>
    %101 = vector.extract_strided_slice %64 {offsets = [2, 1, 0], sizes = [8, 8, 128], strides = [1, 1, 1]} : vector<10x10x128xf32> to vector<8x8x128xf32>
    %102 = vector.extract_strided_slice %64 {offsets = [2, 2, 0], sizes = [8, 8, 128], strides = [1, 1, 1]} : vector<10x10x128xf32> to vector<8x8x128xf32>
    %103 = tpu.concatenate %94, %95, %96, %97, %98, %99, %100, %101, %102 in 2 : vector<8x8x128xf32>, vector<8x8x128xf32>, vector<8x8x128xf32>, vector<8x8x128xf32>, vector<8x8x128xf32>, vector<8x8x128xf32>, vector<8x8x128xf32>, vector<8x8x128xf32>, vector<8x8x128xf32> -> vector<8x8x1152xf32>
    %104 = vector.shape_cast %103 : vector<8x8x1152xf32> to vector<64x1152xf32>
    %c2304 = arith.constant 2304 : index
    %c0_31 = arith.constant 0 : index
    %105 = vector.load %arg7[%c2304, %c0_31] : memref<3456x128xf32, #tpu.memory_space<vmem>>, vector<1152x128xf32>
    %cst_32 = arith.constant dense<0.000000e+00> : vector<64x128xf32>
    %106 = tpu.matmul %104, %105, %cst_32 {dimension_numbers = #tpu.dot_dimension_numbers<[1], [0], [0], [1], [0, 0, 1, 1], [], []>} : vector<64x1152xf32>, vector<1152x128xf32>, vector<64x128xf32> -> vector<64x128xf32>
    %107 = arith.addf %93, %106 : vector<64x128xf32>
    %c0_33 = arith.constant 0 : index
    %c0_34 = arith.constant 0 : index
    %c0_35 = arith.constant 0 : index
    %c0_36 = arith.constant 0 : index
    %108 = vector.load %arg8[%c0_33, %c0_34, %c0_35, %c0_36] : memref<1x1x64x128xf32, #tpu.memory_space<vmem>>, vector<1x1x64x128xf32>
    %109 = vector.shape_cast %108 : vector<1x1x64x128xf32> to vector<64x128xf32>
    %110 = vector.shape_cast %107 : vector<64x128xf32> to vector<1x1x64x128xf32>
    tpu.vector_store %arg8[%c0_33, %c0_34, %c0_35, %c0_36], %110 {strides = array<i32>} : memref<1x1x64x128xf32, #tpu.memory_space<vmem>>, vector<1x1x64x128xf32>,
    %cst_37 = arith.constant dense<0.000000e+00> : vector<128xf32>
    %111 = vector.multi_reduction <add>, %107, %cst_37 [0] : vector<64x128xf32> to vector<128xf32>
    %112 = vector.shape_cast %111 : vector<128xf32> to vector<1x128xf32>
    %113 = arith.mulf %107, %107 : vector<64x128xf32>
    %cst_38 = arith.constant dense<0.000000e+00> : vector<128xf32>
    %114 = vector.multi_reduction <add>, %113, %cst_38 [0] : vector<64x128xf32> to vector<128xf32>
    %115 = vector.shape_cast %114 : vector<128xf32> to vector<1x128xf32>
    %116 = tpu.concatenate %112, %115 in 0 : vector<1x128xf32>, vector<1x128xf32> -> vector<2x128xf32>
    %c0_39 = arith.constant 0 : index
    %c0_40 = arith.constant 0 : index
    %c0_41 = arith.constant 0 : index
    %c0_42 = arith.constant 0 : index
    %117 = vector.load %arg9[%c0_39, %c0_40, %c0_41, %c0_42] : memref<1x1x2x128xf32, #tpu.memory_space<vmem>>, vector<1x1x2x128xf32>
    %118 = vector.shape_cast %117 : vector<1x1x2x128xf32> to vector<2x128xf32>
    %119 = vector.shape_cast %116 : vector<2x128xf32> to vector<1x1x2x128xf32>
    tpu.vector_store %arg9[%c0_39, %c0_40, %c0_41, %c0_42], %119 {strides = array<i32>} : memref<1x1x2x128xf32, #tpu.memory_space<vmem>>, vector<1x1x2x128xf32>,
    return
  }
  func.func @transform_0(%arg0: i32, %arg1: i32) -> (i32, i32, i32, i32, i32) {
    %c1_i32 = arith.constant 1 : i32
    %0 = arith.subi %arg1, %c1_i32 : i32
    %c0_i32 = arith.constant 0 : i32
    %1 = arith.maxsi %0, %c0_i32 : i32
    %c0_i32_0 = arith.constant 0 : i32
    %c0_i32_1 = arith.constant 0 : i32
    %c0_i32_2 = arith.constant 0 : i32
    %c0_i32_3 = arith.constant 0 : i32
    return %arg0, %1, %c0_i32_0, %c0_i32_1, %c0_i32_2 : i32, i32, i32, i32, i32
  }
  func.func @transform_1(%arg0: i32, %arg1: i32) -> (i32, i32, i32, i32, i32) {
    %c0_i32 = arith.constant 0 : i32
    %c0_i32_0 = arith.constant 0 : i32
    %c0_i32_1 = arith.constant 0 : i32
    %c0_i32_2 = arith.constant 0 : i32
    return %arg0, %arg1, %c0_i32, %c0_i32_0, %c0_i32_1 : i32, i32, i32, i32, i32
  }
  func.func @transform_2(%arg0: i32, %arg1: i32) -> (i32, i32, i32, i32, i32) {
    %c1_i32 = arith.constant 1 : i32
    %0 = arith.addi %arg1, %c1_i32 : i32
    %c7_i32 = arith.constant 7 : i32
    %1 = arith.minsi %0, %c7_i32 : i32
    %c0_i32 = arith.constant 0 : i32
    %c0_i32_0 = arith.constant 0 : i32
    %c0_i32_1 = arith.constant 0 : i32
    %c0_i32_2 = arith.constant 0 : i32
    return %arg0, %1, %c0_i32, %c0_i32_0, %c0_i32_1 : i32, i32, i32, i32, i32
  }
  func.func @transform_3(%arg0: i32, %arg1: i32) -> (i32, i32) {
    %c0_i32 = arith.constant 0 : i32
    %c0_i32_0 = arith.constant 0 : i32
    %c0_i32_1 = arith.constant 0 : i32
    return %c0_i32, %c0_i32_0 : i32, i32
  }
  func.func @transform_4(%arg0: i32, %arg1: i32) -> (i32, i32) {
    %c0_i32 = arith.constant 0 : i32
    %c0_i32_0 = arith.constant 0 : i32
    %c0_i32_1 = arith.constant 0 : i32
    return %c0_i32, %c0_i32_0 : i32, i32
  }
  func.func @transform_5(%arg0: i32, %arg1: i32) -> (i32, i32) {
    %c0_i32 = arith.constant 0 : i32
    %c0_i32_0 = arith.constant 0 : i32
    %c0_i32_1 = arith.constant 0 : i32
    return %c0_i32, %c0_i32_0 : i32, i32
  }
  func.func @transform_6(%arg0: i32, %arg1: i32) -> (i32, i32, i32, i32) {
    %c0_i32 = arith.constant 0 : i32
    %c0_i32_0 = arith.constant 0 : i32
    %c0_i32_1 = arith.constant 0 : i32
    return %arg0, %arg1, %c0_i32, %c0_i32_0 : i32, i32, i32, i32
  }
  func.func @transform_7(%arg0: i32, %arg1: i32) -> (i32, i32, i32, i32) {
    %c0_i32 = arith.constant 0 : i32
    %c0_i32_0 = arith.constant 0 : i32
    %c0_i32_1 = arith.constant 0 : i32
    return %arg0, %arg1, %c0_i32, %c0_i32_0 : i32, i32, i32, i32
  }
}

module attributes {stable_mosaic.version = 11 : i64} {
  func.func @conv1_ds_stats_kernel(%arg0: i32, %arg1: i32, %arg2: memref<1x1x8x8x4xf32, #tpu.memory_space<vmem>>, %arg3: memref<1x1x8x8x4xf32, #tpu.memory_space<vmem>>, %arg4: memref<1x1x8x8x4xf32, #tpu.memory_space<vmem>>, %arg5: memref<108x128xf32, #tpu.memory_space<vmem>>, %arg6: memref<4x128xf32, #tpu.memory_space<vmem>>, %arg7: memref<1x1x64x128xf32, #tpu.memory_space<vmem>>, %arg8: memref<1x1x64x128xf32, #tpu.memory_space<vmem>>, %arg9: memref<1x1x4x128xf32, #tpu.memory_space<vmem>>) attributes {dimension_semantics = [#tpu.dimension_semantics<parallel>, #tpu.dimension_semantics<parallel>], iteration_bounds = array<i64: 2, 8>, scalar_prefetch = 0 : i64, scratch_operands = 0 : i64, tpu.core_type = #tpu.core_type<tc>, window_params = [{transform_indices = @transform_0, window_bounds = array<i64: 1, 1, 8, 8, 4>}, {transform_indices = @transform_1, window_bounds = array<i64: 1, 1, 8, 8, 4>}, {transform_indices = @transform_2, window_bounds = array<i64: 1, 1, 8, 8, 4>}, {pipeline_mode = #tpu.pipeline_mode<synchronous>, transform_indices = @transform_3, window_bounds = array<i64: 108, 128>}, {pipeline_mode = #tpu.pipeline_mode<synchronous>, transform_indices = @transform_4, window_bounds = array<i64: 4, 128>}, {transform_indices = @transform_5, window_bounds = array<i64: 1, 1, 64, 128>}, {transform_indices = @transform_6, window_bounds = array<i64: 1, 1, 64, 128>}, {transform_indices = @transform_7, window_bounds = array<i64: 1, 1, 4, 128>}]} {
    %c0_i32 = arith.constant 0 : i32
    %0 = arith.cmpi sgt, %arg1, %c0_i32 : i32
    %c0 = arith.constant 0 : index
    %c0_0 = arith.constant 0 : index
    %c0_1 = arith.constant 0 : index
    %c0_2 = arith.constant 0 : index
    %c0_3 = arith.constant 0 : index
    %1 = vector.load %arg2[%c0, %c0_0, %c0_1, %c0_2, %c0_3] : memref<1x1x8x8x4xf32, #tpu.memory_space<vmem>>, vector<1x1x8x8x4xf32>
    %2 = vector.shape_cast %1 : vector<1x1x8x8x4xf32> to vector<8x8x4xf32>
    %cst = arith.constant 0.000000e+00 : f32
    %3 = vector.broadcast %cst : f32 to vector<8x8x4xf32>
    %4 = arith.select %0, %2, %3 : vector<8x8x4xf32>
    %c0_4 = arith.constant 0 : index
    %c0_5 = arith.constant 0 : index
    %c0_6 = arith.constant 0 : index
    %c0_7 = arith.constant 0 : index
    %c0_8 = arith.constant 0 : index
    %5 = vector.load %arg3[%c0_4, %c0_5, %c0_6, %c0_7, %c0_8] : memref<1x1x8x8x4xf32, #tpu.memory_space<vmem>>, vector<1x1x8x8x4xf32>
    %6 = vector.shape_cast %5 : vector<1x1x8x8x4xf32> to vector<8x8x4xf32>
    %c7_i32 = arith.constant 7 : i32
    %7 = arith.cmpi slt, %arg1, %c7_i32 : i32
    %c0_9 = arith.constant 0 : index
    %c0_10 = arith.constant 0 : index
    %c0_11 = arith.constant 0 : index
    %c0_12 = arith.constant 0 : index
    %c0_13 = arith.constant 0 : index
    %8 = vector.load %arg4[%c0_9, %c0_10, %c0_11, %c0_12, %c0_13] : memref<1x1x8x8x4xf32, #tpu.memory_space<vmem>>, vector<1x1x8x8x4xf32>
    %9 = vector.shape_cast %8 : vector<1x1x8x8x4xf32> to vector<8x8x4xf32>
    %cst_14 = arith.constant 0.000000e+00 : f32
    %10 = vector.broadcast %cst_14 : f32 to vector<8x8x4xf32>
    %11 = arith.select %7, %9, %10 : vector<8x8x4xf32>
    %c0_i32_15 = arith.constant 0 : i32
    %12 = arith.sitofp %c0_i32_15 : i32 to f32
    %13 = vector.broadcast %12 : f32 to vector<1x8x4xf32>
    %14 = tpu.concatenate %13, %4 in 0 : vector<1x8x4xf32>, vector<8x8x4xf32> -> vector<9x8x4xf32>
    %15 = vector.broadcast %12 : f32 to vector<1x8x4xf32>
    %16 = tpu.concatenate %14, %15 in 0 : vector<9x8x4xf32>, vector<1x8x4xf32> -> vector<10x8x4xf32>
    %17 = vector.broadcast %12 : f32 to vector<10x1x4xf32>
    %18 = tpu.concatenate %17, %16 in 1 : vector<10x1x4xf32>, vector<10x8x4xf32> -> vector<10x9x4xf32>
    %19 = vector.broadcast %12 : f32 to vector<10x1x4xf32>
    %20 = tpu.concatenate %18, %19 in 1 : vector<10x9x4xf32>, vector<10x1x4xf32> -> vector<10x10x4xf32>
    %c0_i32_16 = arith.constant 0 : i32
    %21 = arith.sitofp %c0_i32_16 : i32 to f32
    %22 = vector.broadcast %21 : f32 to vector<1x8x4xf32>
    %23 = tpu.concatenate %22, %6 in 0 : vector<1x8x4xf32>, vector<8x8x4xf32> -> vector<9x8x4xf32>
    %24 = vector.broadcast %21 : f32 to vector<1x8x4xf32>
    %25 = tpu.concatenate %23, %24 in 0 : vector<9x8x4xf32>, vector<1x8x4xf32> -> vector<10x8x4xf32>
    %26 = vector.broadcast %21 : f32 to vector<10x1x4xf32>
    %27 = tpu.concatenate %26, %25 in 1 : vector<10x1x4xf32>, vector<10x8x4xf32> -> vector<10x9x4xf32>
    %28 = vector.broadcast %21 : f32 to vector<10x1x4xf32>
    %29 = tpu.concatenate %27, %28 in 1 : vector<10x9x4xf32>, vector<10x1x4xf32> -> vector<10x10x4xf32>
    %c0_i32_17 = arith.constant 0 : i32
    %30 = arith.sitofp %c0_i32_17 : i32 to f32
    %31 = vector.broadcast %30 : f32 to vector<1x8x4xf32>
    %32 = tpu.concatenate %31, %11 in 0 : vector<1x8x4xf32>, vector<8x8x4xf32> -> vector<9x8x4xf32>
    %33 = vector.broadcast %30 : f32 to vector<1x8x4xf32>
    %34 = tpu.concatenate %32, %33 in 0 : vector<9x8x4xf32>, vector<1x8x4xf32> -> vector<10x8x4xf32>
    %35 = vector.broadcast %30 : f32 to vector<10x1x4xf32>
    %36 = tpu.concatenate %35, %34 in 1 : vector<10x1x4xf32>, vector<10x8x4xf32> -> vector<10x9x4xf32>
    %37 = vector.broadcast %30 : f32 to vector<10x1x4xf32>
    %38 = tpu.concatenate %36, %37 in 1 : vector<10x9x4xf32>, vector<10x1x4xf32> -> vector<10x10x4xf32>
    %cst_18 = arith.constant 0.000000e+00 : f32
    %39 = vector.broadcast %cst_18 : f32 to vector<64x128xf32>
    %40 = vector.extract_strided_slice %20 {offsets = [0, 0, 0], sizes = [8, 8, 4], strides = [1, 1, 1]} : vector<10x10x4xf32> to vector<8x8x4xf32>
    %41 = vector.extract_strided_slice %20 {offsets = [0, 1, 0], sizes = [8, 8, 4], strides = [1, 1, 1]} : vector<10x10x4xf32> to vector<8x8x4xf32>
    %42 = vector.extract_strided_slice %20 {offsets = [0, 2, 0], sizes = [8, 8, 4], strides = [1, 1, 1]} : vector<10x10x4xf32> to vector<8x8x4xf32>
    %43 = vector.extract_strided_slice %20 {offsets = [1, 0, 0], sizes = [8, 8, 4], strides = [1, 1, 1]} : vector<10x10x4xf32> to vector<8x8x4xf32>
    %44 = vector.extract_strided_slice %20 {offsets = [1, 1, 0], sizes = [8, 8, 4], strides = [1, 1, 1]} : vector<10x10x4xf32> to vector<8x8x4xf32>
    %45 = vector.extract_strided_slice %20 {offsets = [1, 2, 0], sizes = [8, 8, 4], strides = [1, 1, 1]} : vector<10x10x4xf32> to vector<8x8x4xf32>
    %46 = vector.extract_strided_slice %20 {offsets = [2, 0, 0], sizes = [8, 8, 4], strides = [1, 1, 1]} : vector<10x10x4xf32> to vector<8x8x4xf32>
    %47 = vector.extract_strided_slice %20 {offsets = [2, 1, 0], sizes = [8, 8, 4], strides = [1, 1, 1]} : vector<10x10x4xf32> to vector<8x8x4xf32>
    %48 = vector.extract_strided_slice %20 {offsets = [2, 2, 0], sizes = [8, 8, 4], strides = [1, 1, 1]} : vector<10x10x4xf32> to vector<8x8x4xf32>
    %49 = tpu.concatenate %40, %41, %42, %43, %44, %45, %46, %47, %48 in 2 : vector<8x8x4xf32>, vector<8x8x4xf32>, vector<8x8x4xf32>, vector<8x8x4xf32>, vector<8x8x4xf32>, vector<8x8x4xf32>, vector<8x8x4xf32>, vector<8x8x4xf32>, vector<8x8x4xf32> -> vector<8x8x36xf32>
    %50 = vector.shape_cast %49 : vector<8x8x36xf32> to vector<64x36xf32>
    %c0_19 = arith.constant 0 : index
    %c0_20 = arith.constant 0 : index
    %51 = vector.load %arg5[%c0_19, %c0_20] : memref<108x128xf32, #tpu.memory_space<vmem>>, vector<36x128xf32>
    %cst_21 = arith.constant dense<0.000000e+00> : vector<64x128xf32>
    %52 = tpu.matmul %50, %51, %cst_21 {dimension_numbers = #tpu.dot_dimension_numbers<[1], [0], [0], [1], [0, 0, 1, 1], [], []>} : vector<64x36xf32>, vector<36x128xf32>, vector<64x128xf32> -> vector<64x128xf32>
    %53 = arith.addf %39, %52 : vector<64x128xf32>
    %54 = vector.extract_strided_slice %29 {offsets = [0, 0, 0], sizes = [8, 8, 4], strides = [1, 1, 1]} : vector<10x10x4xf32> to vector<8x8x4xf32>
    %55 = vector.extract_strided_slice %29 {offsets = [0, 1, 0], sizes = [8, 8, 4], strides = [1, 1, 1]} : vector<10x10x4xf32> to vector<8x8x4xf32>
    %56 = vector.extract_strided_slice %29 {offsets = [0, 2, 0], sizes = [8, 8, 4], strides = [1, 1, 1]} : vector<10x10x4xf32> to vector<8x8x4xf32>
    %57 = vector.extract_strided_slice %29 {offsets = [1, 0, 0], sizes = [8, 8, 4], strides = [1, 1, 1]} : vector<10x10x4xf32> to vector<8x8x4xf32>
    %58 = vector.extract_strided_slice %29 {offsets = [1, 1, 0], sizes = [8, 8, 4], strides = [1, 1, 1]} : vector<10x10x4xf32> to vector<8x8x4xf32>
    %59 = vector.extract_strided_slice %29 {offsets = [1, 2, 0], sizes = [8, 8, 4], strides = [1, 1, 1]} : vector<10x10x4xf32> to vector<8x8x4xf32>
    %60 = vector.extract_strided_slice %29 {offsets = [2, 0, 0], sizes = [8, 8, 4], strides = [1, 1, 1]} : vector<10x10x4xf32> to vector<8x8x4xf32>
    %61 = vector.extract_strided_slice %29 {offsets = [2, 1, 0], sizes = [8, 8, 4], strides = [1, 1, 1]} : vector<10x10x4xf32> to vector<8x8x4xf32>
    %62 = vector.extract_strided_slice %29 {offsets = [2, 2, 0], sizes = [8, 8, 4], strides = [1, 1, 1]} : vector<10x10x4xf32> to vector<8x8x4xf32>
    %63 = tpu.concatenate %54, %55, %56, %57, %58, %59, %60, %61, %62 in 2 : vector<8x8x4xf32>, vector<8x8x4xf32>, vector<8x8x4xf32>, vector<8x8x4xf32>, vector<8x8x4xf32>, vector<8x8x4xf32>, vector<8x8x4xf32>, vector<8x8x4xf32>, vector<8x8x4xf32> -> vector<8x8x36xf32>
    %64 = vector.shape_cast %63 : vector<8x8x36xf32> to vector<64x36xf32>
    %c36 = arith.constant 36 : index
    %c0_22 = arith.constant 0 : index
    %65 = vector.load %arg5[%c36, %c0_22] : memref<108x128xf32, #tpu.memory_space<vmem>>, vector<36x128xf32>
    %cst_23 = arith.constant dense<0.000000e+00> : vector<64x128xf32>
    %66 = tpu.matmul %64, %65, %cst_23 {dimension_numbers = #tpu.dot_dimension_numbers<[1], [0], [0], [1], [0, 0, 1, 1], [], []>} : vector<64x36xf32>, vector<36x128xf32>, vector<64x128xf32> -> vector<64x128xf32>
    %67 = arith.addf %53, %66 : vector<64x128xf32>
    %68 = vector.extract_strided_slice %38 {offsets = [0, 0, 0], sizes = [8, 8, 4], strides = [1, 1, 1]} : vector<10x10x4xf32> to vector<8x8x4xf32>
    %69 = vector.extract_strided_slice %38 {offsets = [0, 1, 0], sizes = [8, 8, 4], strides = [1, 1, 1]} : vector<10x10x4xf32> to vector<8x8x4xf32>
    %70 = vector.extract_strided_slice %38 {offsets = [0, 2, 0], sizes = [8, 8, 4], strides = [1, 1, 1]} : vector<10x10x4xf32> to vector<8x8x4xf32>
    %71 = vector.extract_strided_slice %38 {offsets = [1, 0, 0], sizes = [8, 8, 4], strides = [1, 1, 1]} : vector<10x10x4xf32> to vector<8x8x4xf32>
    %72 = vector.extract_strided_slice %38 {offsets = [1, 1, 0], sizes = [8, 8, 4], strides = [1, 1, 1]} : vector<10x10x4xf32> to vector<8x8x4xf32>
    %73 = vector.extract_strided_slice %38 {offsets = [1, 2, 0], sizes = [8, 8, 4], strides = [1, 1, 1]} : vector<10x10x4xf32> to vector<8x8x4xf32>
    %74 = vector.extract_strided_slice %38 {offsets = [2, 0, 0], sizes = [8, 8, 4], strides = [1, 1, 1]} : vector<10x10x4xf32> to vector<8x8x4xf32>
    %75 = vector.extract_strided_slice %38 {offsets = [2, 1, 0], sizes = [8, 8, 4], strides = [1, 1, 1]} : vector<10x10x4xf32> to vector<8x8x4xf32>
    %76 = vector.extract_strided_slice %38 {offsets = [2, 2, 0], sizes = [8, 8, 4], strides = [1, 1, 1]} : vector<10x10x4xf32> to vector<8x8x4xf32>
    %77 = tpu.concatenate %68, %69, %70, %71, %72, %73, %74, %75, %76 in 2 : vector<8x8x4xf32>, vector<8x8x4xf32>, vector<8x8x4xf32>, vector<8x8x4xf32>, vector<8x8x4xf32>, vector<8x8x4xf32>, vector<8x8x4xf32>, vector<8x8x4xf32>, vector<8x8x4xf32> -> vector<8x8x36xf32>
    %78 = vector.shape_cast %77 : vector<8x8x36xf32> to vector<64x36xf32>
    %c72 = arith.constant 72 : index
    %c0_24 = arith.constant 0 : index
    %79 = vector.load %arg5[%c72, %c0_24] : memref<108x128xf32, #tpu.memory_space<vmem>>, vector<36x128xf32>
    %cst_25 = arith.constant dense<0.000000e+00> : vector<64x128xf32>
    %80 = tpu.matmul %78, %79, %cst_25 {dimension_numbers = #tpu.dot_dimension_numbers<[1], [0], [0], [1], [0, 0, 1, 1], [], []>} : vector<64x36xf32>, vector<36x128xf32>, vector<64x128xf32> -> vector<64x128xf32>
    %81 = arith.addf %67, %80 : vector<64x128xf32>
    %82 = vector.shape_cast %6 : vector<8x8x4xf32> to vector<64x4xf32>
    %c0_26 = arith.constant 0 : index
    %c0_27 = arith.constant 0 : index
    %83 = vector.load %arg6[%c0_26, %c0_27] : memref<4x128xf32, #tpu.memory_space<vmem>>, vector<4x128xf32>
    %cst_28 = arith.constant dense<0.000000e+00> : vector<64x128xf32>
    %84 = tpu.matmul %82, %83, %cst_28 {dimension_numbers = #tpu.dot_dimension_numbers<[1], [0], [0], [1], [0, 0, 1, 1], [], []>} : vector<64x4xf32>, vector<4x128xf32>, vector<64x128xf32> -> vector<64x128xf32>
    %c0_29 = arith.constant 0 : index
    %c0_30 = arith.constant 0 : index
    %c0_31 = arith.constant 0 : index
    %c0_32 = arith.constant 0 : index
    %85 = vector.load %arg7[%c0_29, %c0_30, %c0_31, %c0_32] : memref<1x1x64x128xf32, #tpu.memory_space<vmem>>, vector<1x1x64x128xf32>
    %86 = vector.shape_cast %85 : vector<1x1x64x128xf32> to vector<64x128xf32>
    %87 = vector.shape_cast %81 : vector<64x128xf32> to vector<1x1x64x128xf32>
    tpu.vector_store %arg7[%c0_29, %c0_30, %c0_31, %c0_32], %87 {strides = array<i32>} : memref<1x1x64x128xf32, #tpu.memory_space<vmem>>, vector<1x1x64x128xf32>,
    %c0_33 = arith.constant 0 : index
    %c0_34 = arith.constant 0 : index
    %c0_35 = arith.constant 0 : index
    %c0_36 = arith.constant 0 : index
    %88 = vector.load %arg8[%c0_33, %c0_34, %c0_35, %c0_36] : memref<1x1x64x128xf32, #tpu.memory_space<vmem>>, vector<1x1x64x128xf32>
    %89 = vector.shape_cast %88 : vector<1x1x64x128xf32> to vector<64x128xf32>
    %90 = vector.shape_cast %84 : vector<64x128xf32> to vector<1x1x64x128xf32>
    tpu.vector_store %arg8[%c0_33, %c0_34, %c0_35, %c0_36], %90 {strides = array<i32>} : memref<1x1x64x128xf32, #tpu.memory_space<vmem>>, vector<1x1x64x128xf32>,
    %cst_37 = arith.constant dense<0.000000e+00> : vector<128xf32>
    %91 = vector.multi_reduction <add>, %81, %cst_37 [0] : vector<64x128xf32> to vector<128xf32>
    %92 = vector.shape_cast %91 : vector<128xf32> to vector<1x128xf32>
    %93 = arith.mulf %81, %81 : vector<64x128xf32>
    %cst_38 = arith.constant dense<0.000000e+00> : vector<128xf32>
    %94 = vector.multi_reduction <add>, %93, %cst_38 [0] : vector<64x128xf32> to vector<128xf32>
    %95 = vector.shape_cast %94 : vector<128xf32> to vector<1x128xf32>
    %96 = tpu.concatenate %92, %95 in 0 : vector<1x128xf32>, vector<1x128xf32> -> vector<2x128xf32>
    %cst_39 = arith.constant dense<0.000000e+00> : vector<128xf32>
    %97 = vector.multi_reduction <add>, %84, %cst_39 [0] : vector<64x128xf32> to vector<128xf32>
    %98 = vector.shape_cast %97 : vector<128xf32> to vector<1x128xf32>
    %99 = arith.mulf %84, %84 : vector<64x128xf32>
    %cst_40 = arith.constant dense<0.000000e+00> : vector<128xf32>
    %100 = vector.multi_reduction <add>, %99, %cst_40 [0] : vector<64x128xf32> to vector<128xf32>
    %101 = vector.shape_cast %100 : vector<128xf32> to vector<1x128xf32>
    %102 = tpu.concatenate %98, %101 in 0 : vector<1x128xf32>, vector<1x128xf32> -> vector<2x128xf32>
    %103 = tpu.concatenate %96, %102 in 0 : vector<2x128xf32>, vector<2x128xf32> -> vector<4x128xf32>
    %c0_41 = arith.constant 0 : index
    %c0_42 = arith.constant 0 : index
    %c0_43 = arith.constant 0 : index
    %c0_44 = arith.constant 0 : index
    %104 = vector.load %arg9[%c0_41, %c0_42, %c0_43, %c0_44] : memref<1x1x4x128xf32, #tpu.memory_space<vmem>>, vector<1x1x4x128xf32>
    %105 = vector.shape_cast %104 : vector<1x1x4x128xf32> to vector<4x128xf32>
    %106 = vector.shape_cast %103 : vector<4x128xf32> to vector<1x1x4x128xf32>
    tpu.vector_store %arg9[%c0_41, %c0_42, %c0_43, %c0_44], %106 {strides = array<i32>} : memref<1x1x4x128xf32, #tpu.memory_space<vmem>>, vector<1x1x4x128xf32>,
    return
  }
  func.func @transform_0(%arg0: i32, %arg1: i32) -> (i32, i32, i32, i32, i32) {
    %c1_i32 = arith.constant 1 : i32
    %0 = arith.subi %arg1, %c1_i32 : i32
    %c0_i32 = arith.constant 0 : i32
    %1 = arith.maxsi %0, %c0_i32 : i32
    %c0_i32_0 = arith.constant 0 : i32
    %c0_i32_1 = arith.constant 0 : i32
    %c0_i32_2 = arith.constant 0 : i32
    %c0_i32_3 = arith.constant 0 : i32
    return %arg0, %1, %c0_i32_0, %c0_i32_1, %c0_i32_2 : i32, i32, i32, i32, i32
  }
  func.func @transform_1(%arg0: i32, %arg1: i32) -> (i32, i32, i32, i32, i32) {
    %c0_i32 = arith.constant 0 : i32
    %c0_i32_0 = arith.constant 0 : i32
    %c0_i32_1 = arith.constant 0 : i32
    %c0_i32_2 = arith.constant 0 : i32
    return %arg0, %arg1, %c0_i32, %c0_i32_0, %c0_i32_1 : i32, i32, i32, i32, i32
  }
  func.func @transform_2(%arg0: i32, %arg1: i32) -> (i32, i32, i32, i32, i32) {
    %c1_i32 = arith.constant 1 : i32
    %0 = arith.addi %arg1, %c1_i32 : i32
    %c7_i32 = arith.constant 7 : i32
    %1 = arith.minsi %0, %c7_i32 : i32
    %c0_i32 = arith.constant 0 : i32
    %c0_i32_0 = arith.constant 0 : i32
    %c0_i32_1 = arith.constant 0 : i32
    %c0_i32_2 = arith.constant 0 : i32
    return %arg0, %1, %c0_i32, %c0_i32_0, %c0_i32_1 : i32, i32, i32, i32, i32
  }
  func.func @transform_3(%arg0: i32, %arg1: i32) -> (i32, i32) {
    %c0_i32 = arith.constant 0 : i32
    %c0_i32_0 = arith.constant 0 : i32
    %c0_i32_1 = arith.constant 0 : i32
    return %c0_i32, %c0_i32_0 : i32, i32
  }
  func.func @transform_4(%arg0: i32, %arg1: i32) -> (i32, i32) {
    %c0_i32 = arith.constant 0 : i32
    %c0_i32_0 = arith.constant 0 : i32
    %c0_i32_1 = arith.constant 0 : i32
    return %c0_i32, %c0_i32_0 : i32, i32
  }
  func.func @transform_5(%arg0: i32, %arg1: i32) -> (i32, i32, i32, i32) {
    %c0_i32 = arith.constant 0 : i32
    %c0_i32_0 = arith.constant 0 : i32
    %c0_i32_1 = arith.constant 0 : i32
    return %arg0, %arg1, %c0_i32, %c0_i32_0 : i32, i32, i32, i32
  }
  func.func @transform_6(%arg0: i32, %arg1: i32) -> (i32, i32, i32, i32) {
    %c0_i32 = arith.constant 0 : i32
    %c0_i32_0 = arith.constant 0 : i32
    %c0_i32_1 = arith.constant 0 : i32
    return %arg0, %arg1, %c0_i32, %c0_i32_0 : i32, i32, i32, i32
  }
  func.func @transform_7(%arg0: i32, %arg1: i32) -> (i32, i32, i32, i32) {
    %c0_i32 = arith.constant 0 : i32
    %c0_i32_0 = arith.constant 0 : i32
    %c0_i32_1 = arith.constant 0 : i32
    return %arg0, %arg1, %c0_i32, %c0_i32_0 : i32, i32, i32, i32
  }
}

module attributes {stable_mosaic.version = 11 : i64} {
  func.func @bn2_dsbn_add_relu_kernel(%arg0: i32, %arg1: i32, %arg2: memref<1x1x64x128xf32, #tpu.memory_space<vmem>>, %arg3: memref<1x1x64x128xf32, #tpu.memory_space<vmem>>, %arg4: memref<1x128xf32, #tpu.memory_space<vmem>>, %arg5: memref<1x128xf32, #tpu.memory_space<vmem>>, %arg6: memref<1x128xf32, #tpu.memory_space<vmem>>, %arg7: memref<1x1x64x128xf32, #tpu.memory_space<vmem>>) attributes {dimension_semantics = [#tpu.dimension_semantics<parallel>, #tpu.dimension_semantics<parallel>], iteration_bounds = array<i64: 2, 8>, scalar_prefetch = 0 : i64, scratch_operands = 0 : i64, tpu.core_type = #tpu.core_type<tc>, window_params = [{transform_indices = @transform_0, window_bounds = array<i64: 1, 1, 64, 128>}, {transform_indices = @transform_1, window_bounds = array<i64: 1, 1, 64, 128>}, {pipeline_mode = #tpu.pipeline_mode<synchronous>, transform_indices = @transform_2, window_bounds = array<i64: 1, 128>}, {pipeline_mode = #tpu.pipeline_mode<synchronous>, transform_indices = @transform_3, window_bounds = array<i64: 1, 128>}, {pipeline_mode = #tpu.pipeline_mode<synchronous>, transform_indices = @transform_4, window_bounds = array<i64: 1, 128>}, {transform_indices = @transform_5, window_bounds = array<i64: 1, 1, 64, 128>}]} {
    %c0 = arith.constant 0 : index
    %c0_0 = arith.constant 0 : index
    %c0_1 = arith.constant 0 : index
    %c0_2 = arith.constant 0 : index
    %0 = vector.load %arg2[%c0, %c0_0, %c0_1, %c0_2] : memref<1x1x64x128xf32, #tpu.memory_space<vmem>>, vector<1x1x64x128xf32>
    %1 = vector.shape_cast %0 : vector<1x1x64x128xf32> to vector<64x128xf32>
    %c0_3 = arith.constant 0 : index
    %c0_4 = arith.constant 0 : index
    %2 = vector.load %arg4[%c0_3, %c0_4] : memref<1x128xf32, #tpu.memory_space<vmem>>, vector<1x128xf32>
    %3 = vector.broadcast %2 : vector<1x128xf32> to vector<64x128xf32>
    %4 = arith.mulf %1, %3 : vector<64x128xf32>
    %c0_5 = arith.constant 0 : index
    %c0_6 = arith.constant 0 : index
    %c0_7 = arith.constant 0 : index
    %c0_8 = arith.constant 0 : index
    %5 = vector.load %arg3[%c0_5, %c0_6, %c0_7, %c0_8] : memref<1x1x64x128xf32, #tpu.memory_space<vmem>>, vector<1x1x64x128xf32>
    %6 = vector.shape_cast %5 : vector<1x1x64x128xf32> to vector<64x128xf32>
    %c0_9 = arith.constant 0 : index
    %c0_10 = arith.constant 0 : index
    %7 = vector.load %arg5[%c0_9, %c0_10] : memref<1x128xf32, #tpu.memory_space<vmem>>, vector<1x128xf32>
    %8 = vector.broadcast %7 : vector<1x128xf32> to vector<64x128xf32>
    %9 = arith.mulf %6, %8 : vector<64x128xf32>
    %10 = arith.addf %4, %9 : vector<64x128xf32>
    %c0_11 = arith.constant 0 : index
    %c0_12 = arith.constant 0 : index
    %11 = vector.load %arg6[%c0_11, %c0_12] : memref<1x128xf32, #tpu.memory_space<vmem>>, vector<1x128xf32>
    %12 = vector.broadcast %11 : vector<1x128xf32> to vector<64x128xf32>
    %13 = arith.addf %10, %12 : vector<64x128xf32>
    %cst = arith.constant 0.000000e+00 : f32
    %14 = vector.broadcast %cst : f32 to vector<64x128xf32>
    %15 = arith.maximumf %13, %14 : vector<64x128xf32>
    %c0_13 = arith.constant 0 : index
    %c0_14 = arith.constant 0 : index
    %c0_15 = arith.constant 0 : index
    %c0_16 = arith.constant 0 : index
    %16 = vector.load %arg7[%c0_13, %c0_14, %c0_15, %c0_16] : memref<1x1x64x128xf32, #tpu.memory_space<vmem>>, vector<1x1x64x128xf32>
    %17 = vector.shape_cast %16 : vector<1x1x64x128xf32> to vector<64x128xf32>
    %18 = vector.shape_cast %15 : vector<64x128xf32> to vector<1x1x64x128xf32>
    tpu.vector_store %arg7[%c0_13, %c0_14, %c0_15, %c0_16], %18 {strides = array<i32>} : memref<1x1x64x128xf32, #tpu.memory_space<vmem>>, vector<1x1x64x128xf32>,
    return
  }
  func.func @transform_0(%arg0: i32, %arg1: i32) -> (i32, i32, i32, i32) {
    %c0_i32 = arith.constant 0 : i32
    %c0_i32_0 = arith.constant 0 : i32
    %c0_i32_1 = arith.constant 0 : i32
    return %arg0, %arg1, %c0_i32, %c0_i32_0 : i32, i32, i32, i32
  }
  func.func @transform_1(%arg0: i32, %arg1: i32) -> (i32, i32, i32, i32) {
    %c0_i32 = arith.constant 0 : i32
    %c0_i32_0 = arith.constant 0 : i32
    %c0_i32_1 = arith.constant 0 : i32
    return %arg0, %arg1, %c0_i32, %c0_i32_0 : i32, i32, i32, i32
  }
  func.func @transform_2(%arg0: i32, %arg1: i32) -> (i32, i32) {
    %c0_i32 = arith.constant 0 : i32
    %c0_i32_0 = arith.constant 0 : i32
    %c0_i32_1 = arith.constant 0 : i32
    return %c0_i32, %c0_i32_0 : i32, i32
  }
  func.func @transform_3(%arg0: i32, %arg1: i32) -> (i32, i32) {
    %c0_i32 = arith.constant 0 : i32
    %c0_i32_0 = arith.constant 0 : i32
    %c0_i32_1 = arith.constant 0 : i32
    return %c0_i32, %c0_i32_0 : i32, i32
  }
  func.func @transform_4(%arg0: i32, %arg1: i32) -> (i32, i32) {
    %c0_i32 = arith.constant 0 : i32
    %c0_i32_0 = arith.constant 0 : i32
    %c0_i32_1 = arith.constant 0 : i32
    return %c0_i32, %c0_i32_0 : i32, i32
  }
  func.func @transform_5(%arg0: i32, %arg1: i32) -> (i32, i32, i32, i32) {
    %c0_i32 = arith.constant 0 : i32
    %c0_i32_0 = arith.constant 0 : i32
    %c0_i32_1 = arith.constant 0 : i32
    return %arg0, %arg1, %c0_i32, %c0_i32_0 : i32, i32, i32, i32
  }
}

</mosaic_0001>

<bundles_post_ra>
// kernel: basic_block_forward.5
= control target key start
LH: loop header
LB: loop body
LE: loop exit
PB: predicated region body
PF: predicated region fallthrough
CT: control target
= control target key end

     0   :  { %10 = vsyncpa [#allocation3], 0  ;;  %s901_s0 = inlined_call_operand.vmem [shape: f32[2,8,64,128], index: 0, kind: input, shape index: {}]   ;;  %s902_s1 = inlined_call_operand.vmem [shape: f32[2,8,64,128], index: 1, kind: input, shape index: {}]   ;;  %s903_s2 = inlined_call_operand.vmem [shape: f32[1,128], index: 2, kind: input, shape index: {}]   ;;  %s904_s3 = inlined_call_operand.vmem [shape: f32[1,128], index: 3, kind: input, shape index: {}]   ;;  %s905_s4 = inlined_call_operand.vmem [shape: f32[1,128], index: 4, kind: input, shape index: {}]   ;;  %s906_s5 = inlined_call_operand.hbm [shape: f32[2,8,64,128], index: 5, kind: output, shape index: {}]  }
   0x1   :  { %12 = vsyncpa [#allocation3 + $0x1], 0  ;;  %s713_s18 = smov 0   ;;  %s715_s19 = smov 0  }
   0x2   :  { %s717_s20 = smov 0   ;;  %s719_s21 = smov 0  }
   0x3   :  { %s721_s22 = smov 0   ;;  %s723_s23 = smov 0  }
   0x4   :  { %s725_s24 = smov 0   ;;  %s727_s25 = smov 0  }
   0x5 LB: > { %910 = sst [smem:[#allocation5_spill]] %s674_s24  ;;  %s492_s26 = sadd.s32 4294967295, %s678_s25   ;;  %s678_s25 = sphi %s727_s25, %s18_s25   ;;  %s674_s24 = sphi %s725_s24, %s917_s24   ;;  %s670_s23 = sphi %s723_s23, %s922_s23   ;;  %s666_s22 = sphi %s721_s22, %s915_s22   ;;  %s662_s21 = sphi %s719_s21, %s921_s21   ;;  %s658_s20 = sphi %s717_s20, %s920_s20   ;;  %s654_s19 = sphi %s715_s19, %s919_s19   ;;  %s650_s18 = sphi %s713_s18, %s918_s18  }
   0x6   : > { %s493_s27 = sadd.s32 4294967294, %s678_s25   ;;  %s27_s28 = sadd.s32 1, %s670_s23 }
   0x7   : > { %p28_p0 = scmp.ge.s32.totalorder %s27_s28, 8  ;;  %s30_s29 = sadd.s32 1, %s674_s24 }
   0x8   : > { %p168_p1 = scmp.ne.s32.totalorder %s658_s20, %s654_s19  ;;  %p169_p2 = scmp.eq.s32.totalorder %s492_s26, 15 }
   0x9   : > { %s924_s28 = smov (%p28_p0, %s27_s28), 0  ;;  %s926_s29 = smov (!%p28_p0, %s30_s29), %s674_s24 }
   0xa   : > { %911 = sst [smem:[#allocation6_spill]] %s924_s28  ;;  %s154_s30 = ssub.s32 %s670_s23, %s924_s28 }
   0xb   : > { %p764_p3 = por %p169_p2, %p168_p1  ;;  %p32_p4 = scmp.ge.s32.totalorder %s926_s29, 2 }
   0xc   : > { %p174_p5 = scmp.ne.s32.totalorder %s654_s19, %s650_s18  ;;  %p175_p6 = scmp.eq.s32.totalorder %s493_s27, 15 }
   0xd   : > { %p496_p7 = scmp.ge.s32.totalorder %s678_s25, 1  ;;  %s928_s29 = smov (%p32_p4, %s926_s29), 0 }
   0xe   : > { %913 = sst [smem:[#allocation7_spill]] %s928_s29  ;;  %p773_p8 = por %p175_p6, %p174_p5 }
   0xf   : > { %p226_p9 = scmp.lt.s32.totalorder %s678_s25, 17  ;;  %s153_s8 = ssub.s32 %s674_s24, %s928_s29 }
  0x10   : > { %s158_s9 = sadd.s32 1, %s658_s20  ;;  %s155_s10 = sor.u32 %s154_s30, %s153_s8 }
  0x11   : > { %p227_p10 = pnand %p496_p7, %p226_p9  ;;  %p156_p11 = scmp.eq.s32.totalorder %s155_s10, 0 }
  0x12   : > { %p267_p12 = scmp.lt.s32.totalorder (!%p227_p10), %s666_s22, 1  ;;  %p269_p13 = scmp.lt.s32.totalorder (!%p227_p10), %s662_s21, 7 }
  0x13   : > { %s782_s11 = scalar_select %p156_p11, %s658_s20, %s158_s9  }
  0x14   : > { %230 = sbr.rel (%p227_p10) target bundleno = 61 (0x3d), region = 40  ;;  %s264_s17 = sand.u32 (!%p227_p10), 1, %s654_s19  }
  0x15   : > { %s818_s24 = sshll.u32 (!%p227_p10), %s264_s17, 6  ;;  %s850_s9 = scalar_lea.sflag (!%p227_p10), [#allocation3], %s264_s17 }
  0x19   : > { %s268_s12 = scalar_select %p267_p12, %s666_s22, 1  ;;  %v504_v0 = vld [vmem:[%s903_s2] ss:$0 sm:$0xff] }
  0x1a   : > { %s270_s13 = scalar_select %p269_p13, %s662_s21, 7  ;;  %v505_v1 = vld [vmem:[%s904_s3] ss:$0 sm:$0xff] }
  0x1b   : > { %s499_s14 = sshll.u32 %s268_s12, 6  ;;  %v810_v4 = vld [vmem:[%s905_s4] ss:$0 sm:$0xff]  ;;  %s680_s12 = smov [#allocation2]  }
  0x1c   : > { %s498_s15 = sshll.u32 %s270_s13, 3 }
  0x1d   : > { %s273_s16 = sadd.s32 %s499_s14, %s498_s15  ;;  %s508_s15 = sshll.u32 %s662_s21, 3 }
  0x1e   : > { %s500_s26 = sshll.u32 %s273_s16, 3  ;;  %s509_s16 = sshll.u32 %s666_s22, 6 }
  0x1f   : > { %s798_s28 = scalar_lea.vmem %s901_s0, %s500_s26  ;;  %s803_s13 = scalar_lea.vmem %s902_s1, %s500_s26 }
  0x20   : > { %v285_v2 = vld [vmem:[%s798_s28] sm:$0xff]  ;;  %v286_v5 = vld [vmem:[%s798_s28 + $0x8] sm:$0xff]  ;;  %v287_v10 = vld [vmem:[%s798_s28 + $0x10] sm:$0xff]  ;;  %s383_s26 = sadd.s32 %s509_s16, %s508_s15 }
  0x21   : > { %v308_v3 = vld [vmem:[%s803_s13] sm:$0xff]  ;;  %v300_v6 = vmul.f32 %v504_v0, %v285_v2  ;;  %v301_v8 = vmul.f32 %v504_v0, %v286_v5  ;;  %v309_v9 = vld [vmem:[%s803_s13 + $0x8] sm:$0xff]  ;;  %v310_v11 = vld [vmem:[%s803_s13 + $0x10] sm:$0xff]  ;;  %v302_v13 = vmul.f32 %v504_v0, %v287_v10  ;;  %s510_s22 = sshll.u32 %s383_s26, 7 }
  0x22   : > { %v323_v7 = vmul.f32 %v505_v1, %v308_v3  ;;  %v324_v12 = vmul.f32 %v505_v1, %v309_v9  ;;  %v325_v14 = vmul.f32 %v505_v1, %v310_v11  ;;  %v288_v15 = vld [vmem:[%s798_s28 + $0x18] sm:$0xff]  ;;  %v289_v17 = vld [vmem:[%s798_s28 + $0x20] sm:$0xff]  ;;  %v290_v23 = vld [vmem:[%s798_s28 + $0x28] sm:$0xff]  ;;  %s846_s8 = scalar_lea.hbm %s906_s5, %s510_s22 }
  0x23   : > { %v311_v16 = vld [vmem:[%s803_s13 + $0x18] sm:$0xff]  ;;  %v303_v19 = vmul.f32 %v504_v0, %v288_v15  ;;  %v304_v21 = vmul.f32 %v504_v0, %v289_v17  ;;  %v312_v22 = vld [vmem:[%s803_s13 + $0x20] sm:$0xff]  ;;  %v313_v24 = vld [vmem:[%s803_s13 + $0x28] sm:$0xff]  ;;  %v305_v28 = vmul.f32 %v504_v0, %v290_v23 }
  0x24   : > { %v331_v18 = vadd.f32 %v323_v7, %v300_v6  ;;  %v326_v20 = vmul.f32 %v505_v1, %v311_v16  ;;  %v332_v25 = vadd.f32 %v324_v12, %v301_v8  ;;  %v333_v26 = vadd.f32 %v325_v14, %v302_v13  ;;  %v291_v29 = vld [vmem:[%s798_s28 + $0x30] sm:$0xff]  ;;  %v292_v31 = vld [vmem:[%s798_s28 + $0x38] sm:$0xff]  ;;  %s266_s28 = scalar_lea.vmem [#allocation2], %s818_s24 }
  0x25   : > { %v327_v27 = vmul.f32 %v505_v1, %v312_v22  ;;  %v314_v30 = vld [vmem:[%s803_s13 + $0x30] sm:$0xff]  ;;  %v328_v34 = vmul.f32 %v505_v1, %v313_v24  ;;  %v306_v35 = vmul.f32 %v504_v0, %v291_v29  ;;  %v315_v40 = vld [vmem:[%s803_s13 + $0x38] sm:$0xff]  ;;  %v307_v44 = vmul.f32 %v504_v0, %v292_v31  ;;  %s386_s21 = sshll.u32 %s266_s28, 4  ;;  %s590_s13 = sshll.u32 %s680_s12, 4  ;;  %s841_s21 = int_to_ptr.vmem [resolvable:$true] %s386_s21  ;;  %s591_s13 = int_to_ptr.vmem [resolvable:$false] %s590_s13 }
  0x26   : > { %v346_v32 = vadd.f32 %v810_v4, %v331_v18  ;;  %v334_v33 = vadd.f32 %v326_v20, %v303_v19  ;;  %v347_v36 = vadd.f32 %v810_v4, %v332_v25  ;;  %v348_v37 = vadd.f32 %v810_v4, %v333_v26  ;;  %s586_s10 = scalar_lea.vmem %s841_s21, 1024  ;;  %s592_s14 = scalar_lea.vmem %s591_s13, 2048 }
  0x27   : > { %v335_v38 = vadd.f32 %v327_v27, %v304_v21  ;;  %v329_v39 = vmul.f32 %v505_v1, %v314_v30  ;;  %v336_v43 = vadd.f32 %v328_v34, %v305_v28  ;;  %v330_v51 = vmul.f32 %v505_v1, %v315_v40  ;;  %p587_p0 = scmp.ne.s32.totalorder %s841_s21, %s586_s10  ;;  %p593_p4 = scmp.lt.s32.totalorder %s841_s21, %s591_s13 }
  0x28   : > { %v354_v41 = vmax.f32 %v346_v32, 0.0  ;;  %v349_v42 = vadd.f32 %v810_v4, %v334_v33  ;;  %v355_v45 = vmax.f32 %v347_v36, 0.0  ;;  %v356_v46 = vmax.f32 %v348_v37, 0.0  ;;  %p594_p5 = scmp.lt.s32.totalorder %s592_s14, %s586_s10 }
  0x29   : > { %v350_v47 = vadd.f32 %v810_v4, %v335_v38  ;;  %v337_v48 = vadd.f32 %v329_v39, %v306_v35  ;;  %v351_v50 = vadd.f32 %v810_v4, %v336_v43  ;;  %v338_v55 = vadd.f32 %v330_v51, %v307_v44  ;;  %p588_p1 = pnand %p587_p0, %p764_p3 }
  0x2a   : > { %362 = vst [vmem:[%s266_s28] sm:$0xff] %v354_v41  ;;  %v357_v49 = vmax.f32 %v349_v42, 0.0  ;;  %363 = vst [vmem:[%s266_s28 + $0x8] sm:$0xff] %v355_v45  ;;  %p595_p6 = por %p594_p5, %p593_p4 }
  0x2b   : > { %364 = vst [vmem:[%s266_s28 + $0x10] sm:$0xff] %v356_v46  ;;  %v358_v52 = vmax.f32 %v350_v47, 0.0  ;;  %v352_v53 = vadd.f32 %v810_v4, %v337_v48  ;;  %v359_v54 = vmax.f32 %v351_v50, 0.0  ;;  %v353_v57 = vadd.f32 %v810_v4, %v338_v55  ;;  %p589_p2 = pneg %p588_p1 }
  0x2c   : > { %365 = vst [vmem:[%s266_s28 + $0x18] sm:$0xff] %v357_v49 }
  0x2d   : > { %366 = vst [vmem:[%s266_s28 + $0x20] sm:$0xff] %v358_v52  ;;  %v360_v56 = vmax.f32 %v352_v53, 0.0  ;;  %367 = vst [vmem:[%s266_s28 + $0x28] sm:$0xff] %v359_v54  ;;  %v361_v58 = vmax.f32 %v353_v57, 0.0  ;;  %p596_p7 = pnand %p595_p6, %p589_p2 }
  0x2f   : > { %368 = vst [vmem:[%s266_s28 + $0x30] sm:$0xff] %v360_v56  ;;  %369 = vst [vmem:[%s266_s28 + $0x38] sm:$0xff] %v361_v58 }
  0x30   : > { %599 = shalt.err (!%p596_p7)
}
  0x31   : > { %s600_s17 = scalar_lea.hbm %s846_s8, 1024  ;;  %s604_s15 = scalar_lea.hbm %s906_s5, 16384 }
  0x32   : > { %p601_p9 = scmp.ne.s32.totalorder %s846_s8, %s600_s17  ;;  %p605_p12 = scmp.lt.s32.totalorder %s846_s8, %s906_s5 }
  0x33   : > { %p606_p13 = scmp.lt.s32.totalorder %s604_s15, %s600_s17 }
  0x34   : > { %p602_p10 = pnand %p601_p9, %p764_p3 }
  0x35   : > { %p607_p0 = por %p606_p13, %p605_p12 }
  0x36   : > { %p603_p11 = pneg %p602_p10 }
  0x38   : > { %p608_p1 = pnand %p607_p0, %p603_p11 }
  0x3a   : > { %611 = shalt.err (!%p608_p1)
}
  0x3b   : > { %s681_s26 = smov 128   ;;  %s682_s22 = smov 8  }
  0x3c   : > { %513 = dma.vmem_to_hbm [thread:$0]  (%p764_p3), %s841_s21, 1024, %s846_s8, %s850_s9, %s681_s26, %s681_s26, %s682_s22  }
  0x3d PF: > { %p519_p2 = scmp.ge.s32.totalorder %s678_s25, 2  ;;  %s401_s27 = sand.u32 1, %s650_s18  }
  0x3e   : > { %s402_s30 = scalar_lea.sflag [#allocation3], %s401_s27 }
  0x3f   : > { %p516_p4 = pnand %p519_p2, %p773_p8 }
  0x41   : > { %p517_p5 = pneg %p516_p4 }
  0x43   : > { %645 = dma.done.wait (%p517_p5), %s402_s30, 1024  }
  0x44   : > { %647 = vsyncadd (%p517_p5), %s402_s30, 4294966272  ;;  %s18_s25 = sadd.s32 1, %s678_s25   ;;  %s915_s22 = sld [smem:[#allocation5_spill]] }
  0x45   : > { %p15_p6 = scmp.ge.s32.totalorder %s18_s25, 18   ;;  %s916_s6 = sld [smem:[#allocation6_spill]] }
  0x46   : > { %s917_s24 = sld [smem:[#allocation7_spill]]  ;;  %s918_s18 = smov %s654_s19 }
  0x47   : > { %s919_s19 = smov %s658_s20  ;;  %s920_s20 = smov %s782_s11 }
  0x48   : > { %s921_s21 = smov %s670_s23  ;;  %17 = sbr.rel (!%p15_p6) target bundleno = 5 (0x5), region = 78 }
  0x4b   : > { %s922_s23 = smov %s916_s6 }
  0x4d   :  { %407 = vsyncpa [#allocation3], 1 }
  0x4e   :  { %409 = vsyncpa [#allocation3 + $0x1], 1 }

// kernel: basic_block_forward.3
= control target key start
LH: loop header
LB: loop body
LE: loop exit
PB: predicated region body
PF: predicated region fallthrough
CT: control target
= control target key end

     0   :  { %s2855_s24 = smov 0   ;;  %s2857_s25 = smov 0   ;;  %s4216_s0 = inlined_call_operand.vmem [shape: f32[2,8,8,8,4], index: 0, kind: input, shape index: {}, may-alias: {0,1,2}]   ;;  %s4217_s1 = inlined_call_operand.vmem [shape: f32[2,8,8,8,4], index: 1, kind: input, shape index: {}, may-alias: {0,1,2}]   ;;  %s4218_s2 = inlined_call_operand.vmem [shape: f32[2,8,8,8,4], index: 2, kind: input, shape index: {}, may-alias: {0,1,2}]   ;;  %s4219_s3 = inlined_call_operand.vmem [shape: f32[108,128], index: 3, kind: input, shape index: {}]   ;;  %s4220_s4 = inlined_call_operand.vmem [shape: f32[4,128], index: 4, kind: input, shape index: {}]   ;;  %s4221_s5 = inlined_call_operand.vmem [shape: f32[2,8,64,128], index: 5, kind: output, shape index: {0}]   ;;  %s4222_s6 = inlined_call_operand.vmem [shape: f32[2,8,64,128], index: 6, kind: output, shape index: {1}]   ;;  %s4223_s7 = inlined_call_operand.vmem [shape: f32[2,8,4,128], index: 7, kind: output, shape index: {2}]  }
   0x1   :  { %s2859_s26 = smov 0   ;;  %s2861_s27 = smov 0  }
   0x2   :  { %s2863_s28 = smov 0  }
   0x3 LB: > { %s27_s29 = sadd.s32 1, %s2796_s26  ;;  %s30_s30 = sadd.s32 1, %s2800_s27  ;;  %s2804_s28 = sphi %s2863_s28, %s18_s28   ;;  %s2800_s27 = sphi %s2861_s27, %s4282_s27   ;;  %s2796_s26 = sphi %s2859_s26, %s4281_s26   ;;  %s2792_s25 = sphi %s2857_s25, %s4280_s25   ;;  %s2788_s24 = sphi %s2855_s24, %s4279_s24  }
   0x4   : > { %p28_p0 = scmp.ge.s32.totalorder %s27_s29, 8  ;;  %p2467_p1 = scmp.ge.s32.totalorder %s2804_s28, 1 }
   0x5   : > { %p322_p2 = scmp.lt.s32.totalorder %s2804_s28, 17 }
   0x6   : > { %s4284_s29 = smov (%p28_p0, %s27_s29), 0  ;;  %s4286_s30 = smov (!%p28_p0, %s30_s30), %s2800_s27 }
   0x7   : > { %p323_p3 = pnand %p2467_p1, %p322_p2  ;;  %p32_p4 = scmp.ge.s32.totalorder %s4286_s30, 2 }
   0x9   : > { %s4288_s30 = smov (%p32_p4, %s4286_s30), 0  ;;  %326 = sbr.rel (%p323_p3) target bundleno = 728 (0x2d8), region = 40 }
   0xe   : > { %vm543_vm0 = vcmask 1040384   ;;  %v2806_v0 = vmov 0.0   ;;  %s2468_s8 = sadd.s32 4294967295, %s2788_s24  ;;  %p406_p5 = scmp.lt.s32.totalorder %s2792_s25, 1  ;;  %vm658_vm1 = vcmask 1046528   ;;  %vm707_vm2 = vcmask 1045504  }
   0xf   : > { %v525_v1 = vrot.slane %v2806_v0, 7  ;;  %p404_p6 = scmp.gt.s32.totalorder %s2468_s8, 0  ;;  %p2469_p7 = scmp.lt.s32.totalorder %s2468_s8, 7  ;;  %vm1318_vm3 = vcmask 1043456   ;;  %vm908_vm4 = vcmask 31744   ;;  %vm917_vm5 = vcmask 64512  }
  0x10   : > { %s4290_s25 = smov (!%p406_p5, %s2792_s25), 1  ;;  %p468_p8 = scmp.gt.s32.totalorder %s2788_s24, 0  ;;  %vm926_vm6 = vcmask 97280   ;;  %vm935_vm7 = vcmask 130048   ;;  %vm944_vm8 = vcmask 162816   ;;  %vm953_vm9 = vcmask 195584  }
  0x11   : > { %v2889_v2 = vsel %vm543_vm0, 0.0, %v525_v1  ;;  %v553_v3 = vsel %vm543_vm0, %v525_v1, 0.0  ;;  %s405_s9 = scalar_select %p404_p6, %s2468_s8, 0  ;;  %vm962_vm10 = vcmask 228352   ;;  %vm971_vm11 = vcmask 261120  }
  0x12   : > { %v659_v4 = vrot.slane %v2889_v2, 1  ;;  %v660_v5 = vrot.slane %v553_v3, 1  ;;  %v708_v6 = vrot.slane %v2889_v2, 2  ;;  %v709_v7 = vrot.slane %v553_v3, 2  ;;  %s2897_s10 = sshll.u32 %s4290_s25, 6  ;;  %s2807_s11 = smov 4  }
  0x13   : > { %s4292_s9 = smov (!%p2469_p7, %s405_s9), 7  ;;  %s4224_s15 = smov 8   ;;  %vm1293_vm12 = vcmask 293888   ;;  %vm2221_vm13 = vcmask 1041408  }
  0x14   : > { %v2901_v8 = vsel %vm658_vm1, %v659_v4, %v660_v5  ;;  %v2907_v9 = vsel %vm707_vm2, %v708_v6, %v709_v7  ;;  %s2474_s12 = sshll.u32 %s4292_s9, 3  ;;  %p420_p9 = scmp.lt.s32.totalorder %s2788_s24, 7 }
  0x15   : > { %683 = vrot.lane.b32.xlu0 %v2901_v8, %s2807_s11  ;;  %s412_s13 = sadd.s32 %s2897_s10, %s2474_s12  ;;  %s2809_s23 = smov 12  }
  0x16   : > { %s2476_s14 = sshll.u32 %s412_s13, 3  ;;  %s2811_s16 = smov 20  }
  0x17   : > { %s2915_s18 = scalar_lea.vmem %s4216_s0, %s2476_s14  ;;  %s2810_s14 = smov 16  }
  0x18   : > { %s2917_s19 = scalar_select %p468_p8, 255, 0 }
  0x19   : > { %732 = vrot.lane.b32.xlu0 %v2907_v9, %s4224_s15  ;;  %s3025_s20 = scalar_select %p420_p9, %s2788_s24, 7 }
  0x1a   : > { %v2713_v10 = vld [vmem:[%s2915_s18 + $0x8] sm:%s2917_s19]  ;;  %v2716_v12 = vld [vmem:[%s2915_s18] sm:%s2917_s19]  ;;  %s4226_s17 = smov 24   ;;  %s2814_s12 = smov 32  }
  0x1b   : > { %v527_v11 = vrot.slane %v2713_v10, 7  ;;  %v526_v13 = vrot.slane %v2716_v12, 7  ;;  %v2719_v14 = vld [vmem:[%s2915_s18 + $0x10] sm:%s2917_s19]  ;;  %v2722_v26 = vld [vmem:[%s2915_s18 + $0x18] sm:%s2917_s19]  ;;  %s2477_s21 = sshll.u32 %s3025_s20, 3  ;;  %s427_s9 = sadd.s32 1, %s2788_s24 }
  0x1c   : > { %v528_v17 = vrot.slane %v2719_v14, 7  ;;  %v529_v30 = vrot.slane %v2722_v26, 7  ;;  %v2725_v31 = vld [vmem:[%s2915_s18 + $0x20] sm:%s2917_s19]  ;;  %v2728_v37 = vld [vmem:[%s2915_s18 + $0x28] sm:%s2917_s19]  ;;  %s424_s22 = sadd.s32 %s2477_s21, %s2897_s10  ;;  %s2813_s21 = smov 28  }
  0x1d   : > { %v2926_v15 = vsel %vm543_vm0, 0.0, %v527_v11  ;;  %v555_v16 = vsel %vm543_vm0, %v527_v11, 0.0  ;;  %v2931_v20 = vsel %vm543_vm0, 0.0, %v526_v13  ;;  %v554_v21 = vsel %vm543_vm0, %v526_v13, 0.0  ;;  %v2731_v42 = vld [vmem:[%s2915_s18 + $0x30] sm:%s2917_s19]  ;;  %s3053_s8 = sshll.u32 %s424_s22, 3 }
  0x1e   : > { %v665_v18 = vrot.slane %v2926_v15, 1  ;;  %v666_v19 = vrot.slane %v555_v16, 1  ;;  %v662_v22 = vrot.slane %v2931_v20, 1  ;;  %v663_v23 = vrot.slane %v554_v21, 1  ;;  %s3063_s13 = scalar_lea.vmem %s4217_s1, %s3053_s8  ;;  %s4243_s22 = smov 8  }
  0x1f   : > { %v2936_v24 = vsel %vm543_vm0, 0.0, %v528_v17  ;;  %v556_v25 = vsel %vm543_vm0, %v528_v17, 0.0  ;;  %v530_v33 = vrot.slane %v2725_v31, 7  ;;  %v2958_v35 = vsel %vm543_vm0, 0.0, %v529_v30  ;;  %p3378_p10 = scmp.lt.s32.totalorder %s427_s9, 7 }
  0x20   : > { %v2942_v27 = vsel %vm658_vm1, %v665_v18, %v666_v19  ;;  %v668_v28 = vrot.slane %v2936_v24, 1  ;;  %v669_v29 = vrot.slane %v556_v25, 1  ;;  %v2950_v32 = vsel %vm658_vm1, %v662_v22, %v663_v23  ;;  %v3072_v22 = vld [vmem:[%s2915_s18 + $0x38] sm:%s2917_s19] }
  0x21   : > { %687 = vrot.lane.b32.xlu1 %v2942_v27, %s2807_s11  ;;  %685 = vrot.lane.b32.xlu0 %v2950_v32, %s2807_s11  ;;  %v557_v36 = vsel %vm543_vm0, %v529_v30, 0.0  ;;  %v671_v38 = vrot.slane %v2958_v35, 1  ;;  %v2965_v40 = vsel %vm543_vm0, 0.0, %v530_v33  ;;  %v558_v41 = vsel %vm543_vm0, %v530_v33, 0.0  ;;  %v489_v33 = vld [vmem:[%s3063_s13 + $0x8] sm:$0xff]  ;;  %s4294_s9 = smov (!%p3378_p10, %s427_s9), 7 }
  0x22   : > { %v2955_v34 = vsel %vm658_vm1, %v668_v28, %v669_v29  ;;  %v672_v39 = vrot.slane %v557_v36, 1  ;;  %4237 = vst [vmem:[#allocation2_spill] sm:$0xff] %v2965_v40  ;;  %v674_v43 = vrot.slane %v2965_v40, 1  ;;  %v675_v44 = vrot.slane %v558_v41, 1  ;;  %s4296_s9 = smov (!%p3378_p10, %s4294_s9), 7 }
  0x23   : > { %v531_v45 = vrot.slane %v2728_v37, 7  ;;  %v532_v46 = vrot.slane %v2731_v42, 7  ;;  %v714_v48 = vrot.slane %v2926_v15, 2  ;;  %v715_v49 = vrot.slane %v555_v16, 2 }
  0x24   : > { %v2974_v47 = vsel %vm658_vm1, %v671_v38, %v672_v39  ;;  %v2980_v50 = vsel %vm658_vm1, %v674_v43, %v675_v44  ;;  %v711_v61 = vrot.slane %v2931_v20, 2  ;;  %v712_v62 = vrot.slane %v554_v21, 2  ;;  %v488_v21 = vld [vmem:[%s3063_s13] sm:$0xff]  ;;  %v490_v43 = vld [vmem:[%s3063_s13 + $0x10] sm:$0xff] }
  0x25   : > { %689 = vrot.lane.b32.xlu1 %v2955_v34, %s2807_s11  ;;  %691 = vrot.lane.b32.xlu0 %v2974_v47, %s2807_s11  ;;  %v2983_v51 = vsel %vm543_vm0, 0.0, %v531_v45  ;;  %v559_v52 = vsel %vm543_vm0, %v531_v45, 0.0  ;;  %v2987_v53 = vsel %vm543_vm0, 0.0, %v532_v46  ;;  %v560_v56 = vsel %vm543_vm0, %v532_v46, 0.0 }
  0x26   : > { %4238 = vst [vmem:[#allocation3_spill] sm:$0xff] %v2983_v51  ;;  %4239 = vst [vmem:[#allocation4_spill] sm:$0xff] %v2987_v53  ;;  %v677_v54 = vrot.slane %v2983_v51, 1  ;;  %v678_v55 = vrot.slane %v559_v52, 1  ;;  %v680_v57 = vrot.slane %v2987_v53, 1  ;;  %v681_v58 = vrot.slane %v560_v56, 1 }
  0x27   : > { %v3004_v63 = vsel %vm707_vm2, %v714_v48, %v715_v49  ;;  %v720_v0 = vrot.slane %v2958_v35, 2  ;;  %v721_v1 = vrot.slane %v557_v36, 2  ;;  %v3013_v3 = vsel %vm707_vm2, %v711_v61, %v712_v62 }
  0x28   : > { %v2995_v59 = vsel %vm658_vm1, %v677_v54, %v678_v55  ;;  %v3000_v60 = vsel %vm658_vm1, %v680_v57, %v681_v58  ;;  %v717_v4 = vrot.slane %v2936_v24, 2  ;;  %v718_v5 = vrot.slane %v556_v25, 2 }
  0x29   : > { %693 = vrot.lane.b32.xlu1 %v2980_v50, %s2807_s11  ;;  %695 = vrot.lane.b32.xlu0 %v2995_v59, %s2807_s11  ;;  %v3017_v6 = vsel %vm707_vm2, %v720_v0, %v721_v1  ;;  %v726_v7 = vrot.slane %v2983_v51, 2  ;;  %v727_v10 = vrot.slane %v559_v52, 2  ;;  %v723_v12 = vrot.slane %v2965_v40, 2 }
  0x2a   : > { %v3030_v11 = vsel %vm707_vm2, %v717_v4, %v718_v5  ;;  %v724_v13 = vrot.slane %v558_v41, 2  ;;  %v729_v17 = vrot.slane %v2987_v53, 2  ;;  %v730_v18 = vrot.slane %v560_v56, 2  ;;  %v491_v4 = vld [vmem:[%s3063_s13 + $0x18] sm:$0xff] }
  0x2b   : > { %v3034_v14 = vsel %vm707_vm2, %v726_v7, %v727_v10  ;;  %v570_v23 = vrot.slane %v488_v21, 7  ;;  %v4228_v25 = vrot.slane %v3072_v22, 7  ;;  %v571_v38 = vrot.slane %v489_v33, 7  ;;  %v983_v5 = vld [vmem:[%s4219_s3 + $0x18] sm:$0xff]  ;;  %v982_v7 = vld [vmem:[%s4219_s3 + $0x10] sm:$0xff] }
  0x2c   : > { %v3042_v16 = vsel %vm707_vm2, %v723_v12, %v724_v13  ;;  %v3051_v19 = vsel %vm707_vm2, %v729_v17, %v730_v18  ;;  %v572_v46 = vrot.slane %v490_v43, 7  ;;  %v573_v10 = vrot.slane %v491_v4, 7  ;;  %v1292_v12 = vld [vmem:[%s4219_s3 + $0x44] sm:$0xf]  ;;  %v1290_v18 = vld [vmem:[%s4219_s3 + $0x34] sm:$0xff]  ;;  %v1289_v21 = vld [vmem:[%s4219_s3 + $0x2c] sm:$0xff] }
  0x2d   : > { %697 = vrot.lane.b32.xlu1 %v3000_v60, %s2807_s11  ;;  %736 = vrot.lane.b32.xlu0 %v3004_v63, %s4224_s15  ;;  %v3080_v26 = vsel %vm543_vm0, 0.0, %v570_v23  ;;  %v594_v28 = vsel %vm543_vm0, %v570_v23, 0.0  ;;  %v3090_v29 = vsel %vm543_vm0, 0.0, %v4228_v25  ;;  %v3105_v41 = vsel %vm543_vm0, 0.0, %v571_v38  ;;  %v980_v13 = vld [vmem:[%s4219_s3] sm:$0xff] }
  0x2e   : > { %v1041_v30 = vrot.slane %v3080_v26, 2  ;;  %v1042_v31 = vrot.slane %v594_v28, 2  ;;  %v999_v36 = vrot.slane %v3080_v26, 1  ;;  %v1000_v37 = vrot.slane %v594_v28, 1  ;;  %2582 = vmatprep.subr.msk.mxu0 %vm1318_vm3, %v1292_v12  ;;  %v1288_v23 = vld [vmem:[%s4219_s3 + $0x24] sm:$0xff] }
  0x2f   : > { %v595_v42 = vsel %vm543_vm0, %v571_v38, 0.0  ;;  %v1002_v44 = vrot.slane %v3105_v41, 1  ;;  %v3119_v49 = vsel %vm543_vm0, 0.0, %v572_v46  ;;  %v596_v52 = vsel %vm543_vm0, %v572_v46, 0.0  ;;  %2583 = vmatpush3.msk.msra.mxu0 %vm1318_vm3, %v1292_v12 }
  0x30   : > { %v1001_v39 = vsel %vm658_vm1, %v999_v36, %v1000_v37  ;;  %v1003_v45 = vrot.slane %v595_v42, 1  ;;  %v1005_v54 = vrot.slane %v3119_v49, 1  ;;  %v1006_v55 = vrot.slane %v596_v52, 1  ;;  %v492_v36 = vld [vmem:[%s3063_s13 + $0x20] sm:$0xff] }
  0x31   : > { %734 = vrot.lane.b32.xlu1 %v3013_v3, %s4224_s15  ;;  %740 = vrot.lane.b32.xlu0 %v3017_v6, %s4224_s15  ;;  %v1044_v57 = vrot.slane %v3105_v41, 2  ;;  %v1045_v58 = vrot.slane %v595_v42, 2  ;;  %v1047_v62 = vrot.slane %v3119_v49, 2  ;;  %v1048_v0 = vrot.slane %v596_v52, 2 }
  0x32   : > { %v1004_v48 = vsel %vm658_vm1, %v1002_v44, %v1003_v45  ;;  %v1007_v56 = vsel %vm658_vm1, %v1005_v54, %v1006_v55  ;;  %v3177_v17 = vsel %vm543_vm0, 0.0, %v573_v10  ;;  %v597_v28 = vsel %vm543_vm0, %v573_v10, 0.0 }
  0x33   : > { %v1046_v61 = vsel %vm707_vm2, %v1044_v57, %v1045_v58  ;;  %v3141_v1 = vsel %vm707_vm2, %v1047_v62, %v1048_v0  ;;  %4240 = vst [vmem:[#allocation5_spill] sm:$0xff] %v3177_v17  ;;  %v1051_v42 = vrot.slane %v597_v28, 2 }
  0x35   : > { %738 = vrot.lane.b32.xlu1 %v3030_v11, %s4224_s15  ;;  %744 = vrot.lane.b32.xlu0 %v3034_v14, %s4224_s15 }
  0x39   : > { %742 = vrot.lane.b32.xlu1 %v3042_v16, %s4224_s15  ;;  %757 = vrot.lane.b32.xlu0 %v2931_v20, %s2809_s23 }
  0x3d   : > { %746 = vrot.lane.b32.xlu1 %v3051_v19, %s4224_s15  ;;  %761 = vrot.lane.b32.xlu0 %v2936_v24, %s2809_s23 }
  0x41   : > { %759 = vrot.lane.b32.xlu1 %v2926_v15, %s2809_s23  ;;  %765 = vrot.lane.b32.xlu0 %v2965_v40, %s2809_s23 }
  0x45   : > { %763 = vrot.lane.b32.xlu1 %v2958_v35, %s2809_s23  ;;  %769 = vrot.lane.b32.xlu0 %v2987_v53, %s2809_s23 }
  0x49   : > { %767 = vrot.lane.b32.xlu1 %v2983_v51, %s2809_s23  ;;  %785 = vrot.lane.b32.xlu0 %v2950_v32, %s2810_s14  ;;  %v1043_v32 = vsel %vm707_vm2, %v1041_v30, %v1042_v31  ;;  %v1009_v30 = vrot.slane %v597_v28, 1 }
  0x4d   : > { %771 = vrot.lane.b32.xlu1 %v3090_v29, %s2809_s23  ;;  %789 = vrot.lane.b32.xlu0 %v2955_v34, %s2810_s14 }
  0x51   : > { %787 = vrot.lane.b32.xlu1 %v2942_v27, %s2810_s14  ;;  %1062 = vrot.lane.b32.xlu0 %v1043_v32, %s4224_s15 }
  0x55   : > { %1020 = vrot.lane.b32.xlu1 %v1001_v39, %s2807_s11  ;;  %1086 = vrot.lane.b32.xlu0 %v3105_v41, %s2809_s23 }
  0x59   : > { %1084 = vrot.lane.b32.xlu1 %v3080_v26, %s2809_s23  ;;  %812 = vrot.lane.b32.xlu0 %v3013_v3, %s2811_s16  ;;  %v984_v3 = vld [vmem:[%s4219_s3 + $0x20] sm:$0xf] }
  0x5a   : > { %2604 = vmatprep.subr.msk.mxu1 %vm1318_vm3, %v984_v3 }
  0x5b   : > { %2605 = vmatpush3.msk.msra.mxu1 %vm1318_vm3, %v984_v3 }
  0x5c   : > { %2606 = vmatprep.subr.mxu1 %v983_v5 }
  0x5d   : > { %1112 = vrot.lane.b32.xlu1 %v1001_v39, %s2810_s14  ;;  %1114 = vrot.lane.b32.xlu0 %v1004_v48, %s2810_s14  ;;  %v1050_v39 = vrot.slane %v3177_v17, 2 }
  0x5e   : > { %2607 = vmatpush3.msra.mxu1 %v983_v5 }
  0x5f   : > { %2608 = vmatprep.subr.mxu1 %v982_v7  ;;  %v1052_v52 = vsel %vm707_vm2, %v1050_v39, %v1051_v42 }
  0x60   : > { %2609 = vmatpush3.msra.mxu1 %v982_v7 }
  0x61   : > { %1022 = vrot.lane.b32.xlu1 %v1004_v48, %s2807_s11  ;;  %814 = vrot.lane.b32.xlu0 %v3004_v63, %s2811_s16 }
  0x65   : > { %1139 = vrot.lane.b32.xlu1 %v1043_v32, %s2811_s16  ;;  %1024 = vrot.lane.b32.xlu0 %v1007_v56, %s2807_s11  ;;  %v574_v32 = vrot.slane %v492_v36, 7 }
  0x67   : > { %v3223_v43 = vsel %vm543_vm0, 0.0, %v574_v32 }
  0x68   : > { %4241 = vst [vmem:[#allocation6_spill] sm:$0xff] %v3223_v43  ;;  %v1011_v45 = vrot.slane %v3223_v43, 1  ;;  %v1053_v62 = vrot.slane %v3223_v43, 2 }
  0x69   : > { %836 = vrot.lane.b32.xlu1 %v2926_v15, %s4226_s17  ;;  %1141 = vrot.lane.b32.xlu0 %v1046_v61, %s2811_s16 }
  0x6d   : > { %1064 = vrot.lane.b32.xlu1 %v1046_v61, %s4224_s15  ;;  %838 = vrot.lane.b32.xlu0 %v2936_v24, %s4226_s17 }
  0x71   : > { %1163 = vrot.lane.b32.xlu1 %v3105_v41, %s4226_s17  ;;  %1066 = vrot.lane.b32.xlu0 %v3141_v1, %s4224_s15  ;;  %s2483_s15 = sshll.u32 %s4296_s9, 3 }
  0x72   : > { %s436_s19 = sadd.s32 %s2483_s15, %s2897_s10 }
  0x73   : > { %s2485_s9 = sshll.u32 %s436_s19, 3 }
  0x74   : > { %s3440_s10 = scalar_select %p420_p9, 255, 0 }
  0x75   : > { %860 = vrot.lane.b32.xlu1 %v2942_v27, %s2813_s21  ;;  %1165 = vrot.lane.b32.xlu0 %v3119_v49, %s4226_s17  ;;  %v981_v27 = vld [vmem:[%s4219_s3 + $0x8] sm:$0xff]  ;;  %s4242_s17 = smov 24   ;;  %s3451_s19 = scalar_lea.vmem %s4218_s2, %s2485_s9 }
  0x76   : > { %2610 = vmatprep.subr.mxu1 %v981_v27 }
  0x77   : > { %2611 = vmatpush3.msra.mxu1 %v981_v27 }
  0x78   : > { %2612 = vmatprep.subr.mxu1 %v980_v13 }
  0x79   : > { %1088 = vrot.lane.b32.xlu1 %v3119_v49, %s2809_s23  ;;  %862 = vrot.lane.b32.xlu0 %v2955_v34, %s2813_s21  ;;  %v1291_v34 = vld [vmem:[%s4219_s3 + $0x3c] sm:$0xff] }
  0x7a   : > { %2613 = vmatpush3.msra.mxu1 %v980_v13  ;;  %2584 = vmatprep.subr.mxu0 %v1291_v34 }
  0x7b   : > { %2585 = vmatpush3.msra.mxu0 %v1291_v34 }
  0x7c   : > { %2586 = vmatprep.subr.mxu0 %v1290_v18 }
  0x7d   : > { %1184 = vrot.lane.b32.xlu1 %v1004_v48, %s2813_s21  ;;  %1090 = vrot.lane.b32.xlu0 %v3177_v17, %s2809_s23 }
  0x7e   : > { %2587 = vmatpush3.msra.mxu0 %v1290_v18 }
  0x7f   : > { %2588 = vmatprep.subr.mxu0 %v1289_v21 }
  0x80   : > { %2589 = vmatpush3.msra.mxu0 %v1289_v21 }
  0x81   : > { %884 = vrot.lane.b32.xlu1 %v3004_v63, %s2814_s12  ;;  %1186 = vrot.lane.b32.xlu0 %v1007_v56, %s2813_s21  ;;  %v1008_v63 = vrot.slane %v3177_v17, 1 }
  0x82   : > { %2590 = vmatprep.subr.mxu0 %v1288_v23 }
  0x83   : > { %2591 = vmatpush3.msra.mxu0 %v1288_v23  ;;  %v1010_v33 = vsel %vm658_vm1, %v1008_v63, %v1009_v30 }
  0x85   : > { %1116 = vrot.lane.b32.xlu1 %v1007_v56, %s2810_s14  ;;  %791 = vrot.lane.b32.xlu0 %v2974_v47, %s2810_s14 }
  0x87   : > { %v3204_v31 = vpop.permute.xlu0 %683 }
  0x89   : > { %1205 = vrot.lane.b32.xlu1 %v1046_v61, %s2814_s12  ;;  %886 = vrot.lane.b32.xlu0 %v3030_v11, %s2814_s12 }
  0x8b   : > { %v3214_v37 = vpop.permute.xlu0 %732 }
  0x8d   : > { %816 = vrot.lane.b32.xlu1 %v3030_v11, %s2811_s16  ;;  %1118 = vrot.lane.b32.xlu0 %v1010_v33, %s2810_s14  ;;  %v598_v11 = vsel %vm543_vm0, %v574_v32, 0.0 }
  0x8e   : > { %v1012_v46 = vrot.slane %v598_v11, 1  ;;  %v1054_v0 = vrot.slane %v598_v11, 2  ;;  %v494_v11 = vld [vmem:[%s3063_s13 + $0x30] sm:$0xff] }
  0x90   : > { %v1013_v55 = vsel %vm658_vm1, %v1011_v45, %v1012_v46  ;;  %v1055_v4 = vsel %vm707_vm2, %v1053_v62, %v1054_v0  ;;  %v576_v46 = vrot.slane %v494_v11, 7 }
  0x91   : > { %1026 = vrot.lane.b32.xlu1 %v1010_v33, %s2807_s11  ;;  %1207 = vrot.lane.b32.xlu0 %v3141_v1, %s2814_s12 }
  0x93   : > { %v3219_v38 = vpop.permute.xlu1 %687  ;;  %v3226_v44 = vpop.permute.xlu0 %685 }
  0x95   : > { %1143 = vrot.lane.b32.xlu1 %v3141_v1, %s2811_s16  ;;  %840 = vrot.lane.b32.xlu0 %v2958_v35, %s4242_s17 }
  0x97   : > { %v3233_v48 = vpop.permute.xlu1 %689  ;;  %v3236_v54 = vpop.permute.xlu0 %691 }
  0x99   : > { %818 = vrot.lane.b32.xlu1 %v3017_v6, %s2811_s16  ;;  %1068 = vrot.lane.b32.xlu0 %v1052_v52, %s4243_s22 }
  0x9b   : > { %v3242_v56 = vpop.permute.xlu1 %693  ;;  %v3244_v57 = vpop.permute.xlu0 %695 }
  0x9c   : > { %4244 = vst [vmem:[#allocation7_spill] sm:$0xff] %v3242_v56  ;;  %4245 = vst [vmem:[#allocation8_spill] sm:$0xff] %v3244_v57  ;;  %v2737_v56 = vld [vmem:[%s3451_s19] sm:%s3440_s10] }
  0x9d   : > { %1028 = vrot.lane.b32.xlu1 %v1013_v55, %s2807_s11  ;;  %1167 = vrot.lane.b32.xlu0 %v3177_v17, %s4242_s17 }
  0x9f   : > { %v3249_v58 = vpop.permute.xlu1 %697  ;;  %v3251_v61 = vpop.permute.xlu0 %736 }
  0xa0   : > { %4246 = vst [vmem:[#allocation9_spill] sm:$0xff] %v3249_v58 }
  0xa1   : > { %1145 = vrot.lane.b32.xlu1 %v1052_v52, %s2811_s16  ;;  %864 = vrot.lane.b32.xlu0 %v2974_v47, %s2813_s21  ;;  %v493_v47 = vld [vmem:[%s3063_s13 + $0x28] sm:$0xff] }
  0xa2   : > { %v575_v27 = vrot.slane %v493_v47, 7  ;;  %v3334_v47 = vsel %vm543_vm0, 0.0, %v576_v46 }
  0xa3   : > { %v3257_v1 = vpop.permute.xlu1 %734  ;;  %v3259_v3 = vpop.permute.xlu0 %740  ;;  %4256 = vst [vmem:[#allocation19_spill] sm:$0xff] %v3334_v47 }
  0xa4   : > { %4247 = vst [vmem:[#allocation10_spill] sm:$0xff] %v3259_v3  ;;  %v3284_v34 = vsel %vm543_vm0, 0.0, %v575_v27  ;;  %v599_v30 = vsel %vm543_vm0, %v575_v27, 0.0  ;;  %v610_v3 = vrot.slane %v2737_v56, 7 }
  0xa5   : > { %842 = vrot.lane.b32.xlu1 %v2965_v40, %s4242_s17  ;;  %1092 = vrot.lane.b32.xlu0 %v3223_v43, %s2809_s23  ;;  %4251 = vst [vmem:[#allocation14_spill] sm:$0xff] %v3284_v34  ;;  %v1015_v36 = vrot.slane %v599_v30, 1  ;;  %v1056_v62 = vrot.slane %v3284_v34, 2  ;;  %v1057_v0 = vrot.slane %v599_v30, 2 }
  0xa7   : > { %v3266_v5 = vpop.permute.xlu1 %738  ;;  %v3268_v7 = vpop.permute.xlu0 %744  ;;  %v3346_v30 = vsel %vm707_vm2, %v1056_v62, %v1057_v0 }
  0xa8   : > { %4248 = vst [vmem:[#allocation11_spill] sm:$0xff] %v3268_v7  ;;  %v3390_v7 = vld [vmem:[%s3063_s13 + $0x38] sm:$0xff] }
  0xa9   : > { %1070 = vrot.lane.b32.xlu1 %v1055_v4, %s4243_s22  ;;  %1188 = vrot.lane.b32.xlu0 %v1010_v33, %s2813_s21  ;;  %v1014_v33 = vrot.slane %v3284_v34, 1  ;;  %4258 = vst [vmem:[#allocation20_spill] sm:$0xff] %v3390_v7 }
  0xab   : > { %v3273_v10 = vpop.permute.xlu1 %742  ;;  %v3275_v12 = vpop.permute.xlu0 %757  ;;  %v1016_v39 = vsel %vm658_vm1, %v1014_v33, %v1015_v36  ;;  %v1017_v33 = vrot.slane %v3334_v47, 1 }
  0xac   : > { %4249 = vst [vmem:[#allocation12_spill] sm:$0xff] %v3273_v10 }
  0xad   : > { %1169 = vrot.lane.b32.xlu1 %v3223_v43, %s4242_s17  ;;  %866 = vrot.lane.b32.xlu0 %v2980_v50, %s2813_s21 }
  0xaf   : > { %v3281_v13 = vpop.permute.xlu1 %746  ;;  %v3286_v18 = vpop.permute.xlu0 %761 }
  0xb0   : > { %4250 = vst [vmem:[#allocation13_spill] sm:$0xff] %v3281_v13 }
  0xb1   : > { %793 = vrot.lane.b32.xlu1 %v2980_v50, %s2810_s14  ;;  %1094 = vrot.lane.b32.xlu0 %v3284_v34, %s2809_s23 }
  0xb3   : > { %v3292_v21 = vpop.permute.xlu1 %759  ;;  %v3294_v23 = vpop.permute.xlu0 %765 }
  0xb4   : > { %4252 = vst [vmem:[#allocation15_spill] sm:$0xff] %v3294_v23 }
  0xb5   : > { %888 = vrot.lane.b32.xlu1 %v3017_v6, %s2814_s12  ;;  %1190 = vrot.lane.b32.xlu0 %v1013_v55, %s2813_s21 }
  0xb7   : > { %v3299_v28 = vpop.permute.xlu1 %763  ;;  %v3301_v63 = vpop.permute.xlu0 %769 }
  0xb8   : > { %4253 = vst [vmem:[#allocation16_spill] sm:$0xff] %v3301_v63 }
  0xb9   : > { %1120 = vrot.lane.b32.xlu1 %v1013_v55, %s2810_s14  ;;  %795 = vrot.lane.b32.xlu0 %v2995_v59, %s2810_s14 }
  0xbb   : > { %v3307_v50 = vpop.permute.xlu1 %767  ;;  %v3310_v6 = vpop.permute.xlu0 %785 }
  0xbc   : > { %4254 = vst [vmem:[#allocation17_spill] sm:$0xff] %v3307_v50 }
  0xbd   : > { %1209 = vrot.lane.b32.xlu1 %v1052_v52, %s2814_s12  ;;  %890 = vrot.lane.b32.xlu0 %v3042_v16, %s2814_s12 }
  0xbf   : > { %v3315_v32 = vpop.permute.xlu1 %771  ;;  %v3318_v42 = vpop.permute.xlu0 %789 }
  0xc0   : > { %4255 = vst [vmem:[#allocation18_spill] sm:$0xff] %v3315_v32 }
  0xc1   : > { %820 = vrot.lane.b32.xlu1 %v3042_v16, %s2811_s16  ;;  %1122 = vrot.lane.b32.xlu0 %v1016_v39, %s2810_s14  ;;  %v600_v16 = vsel %vm543_vm0, %v576_v46, 0.0 }
  0xc2   : > { %v1018_v36 = vrot.slane %v600_v16, 1 }
  0xc3   : > { %v3324_v45 = vpop.permute.xlu1 %787  ;;  %v3326_v55 = vpop.permute.xlu0 %1062 }
  0xc5   : > { %1030 = vrot.lane.b32.xlu1 %v1016_v39, %s2807_s11  ;;  %1211 = vrot.lane.b32.xlu0 %v1055_v4, %s2814_s12 }
  0xc7   : > { %v3330_v52 = vpop.permute.xlu1 %1020  ;;  %v3337_v27 = vpop.permute.xlu0 %1086 }
  0xc9   : > { %1147 = vrot.lane.b32.xlu1 %v1055_v4, %s2811_s16  ;;  %844 = vrot.lane.b32.xlu0 %v2983_v51, %s4242_s17  ;;  %v1019_v4 = vsel %vm658_vm1, %v1017_v33, %v1018_v36  ;;  %v1059_v33 = vrot.slane %v3334_v47, 2  ;;  %v1060_v36 = vrot.slane %v600_v16, 2  ;;  %v577_v51 = vrot.slane %v3390_v7, 7 }
  0xcb   : > { %v3343_v11 = vpop.permute.xlu1 %1084  ;;  %v3348_v25 = vpop.permute.xlu0 %812 }
  0xcd   : > { %822 = vrot.lane.b32.xlu1 %v3034_v14, %s2811_s16  ;;  %1072 = vrot.lane.b32.xlu0 %v3346_v30, %s4243_s22 }
  0xcf   : > { %v3355_v46 = vpop.permute.xlu1 %1112  ;;  %v3357_v32 = vpop.permute.xlu0 %1114 }
  0xd1   : > { %1032 = vrot.lane.b32.xlu1 %v1019_v4, %s2807_s11  ;;  %1171 = vrot.lane.b32.xlu0 %v3284_v34, %s4242_s17 }
  0xd3   : > { %v3362_v62 = vpop.permute.xlu1 %1022  ;;  %v3364_v0 = vpop.permute.xlu0 %814 }
  0xd5   : > { %1149 = vrot.lane.b32.xlu1 %v3346_v30, %s2811_s16  ;;  %868 = vrot.lane.b32.xlu0 %v2995_v59, %s2813_s21  ;;  %v3385_v59 = vsel %vm707_vm2, %v1059_v33, %v1060_v36  ;;  %v3411_v36 = vsel %vm543_vm0, 0.0, %v577_v51 }
  0xd6   : > { %v1109_v17 = vrot.slane %v3411_v36, 1 }
  0xd7   : > { %v3372_v13 = vpop.permute.xlu1 %1139  ;;  %v3374_v58 = vpop.permute.xlu0 %1024 }
  0xd9   : > { %846 = vrot.lane.b32.xlu1 %v2987_v53, %s4242_s17  ;;  %1096 = vrot.lane.b32.xlu0 %v3334_v47, %s2809_s23 }
  0xdb   : > { %v837_v16 = vpop.permute.xlu1 %836  ;;  %v3387_v63 = vpop.permute.xlu0 %1141 }
  0xdd   : > { %1074 = vrot.lane.b32.xlu1 %v3385_v59, %s4243_s22  ;;  %1192 = vrot.lane.b32.xlu0 %v1016_v39, %s2813_s21  ;;  %v4259_v39 = vrot.slane %v3072_v22, 7 }
  0xdf   : > { %v3397_v53 = vpop.permute.xlu1 %1064  ;;  %v3400_v57 = vpop.permute.xlu0 %838  ;;  %v561_v7 = vsel %vm543_vm0, %v4259_v39, 0.0 }
  0xe0   : > { %v783_v50 = vrot.slane %v561_v7, 1 }
  0xe1   : > { %1173 = vrot.lane.b32.xlu1 %v3334_v47, %s4242_s17  ;;  %870 = vrot.lane.b32.xlu0 %v3000_v60, %s2813_s21  ;;  %v782_v47 = vrot.slane %v3090_v29, 1 }
  0xe3   : > { %v3408_v33 = vpop.permute.xlu1 %1163  ;;  %v3416_v34 = vpop.permute.xlu0 %1066  ;;  %v3435_v39 = vsel %vm658_vm1, %v782_v47, %v783_v50  ;;  %v601_v50 = vsel %vm543_vm0, %v577_v51, 0.0 }
  0xe4   : > { %v1110_v51 = vrot.slane %v601_v50, 1 }
  0xe5   : > { %797 = vrot.lane.b32.xlu1 %v3000_v60, %s2810_s14  ;;  %1098 = vrot.lane.b32.xlu0 %v3411_v36, %s2809_s23  ;;  %v909_v60 = vsel %vm908_vm4, %v2889_v2, %v3204_v31 }
  0xe7   : > { %v861_v43 = vpop.permute.xlu1 %860  ;;  %v3423_v10 = vpop.permute.xlu0 %1165 }
  0xe9   : > { %892 = vrot.lane.b32.xlu1 %v3034_v14, %s2814_s12  ;;  %1194 = vrot.lane.b32.xlu0 %v1019_v4, %s2813_s21  ;;  %v3444_v14 = vsel %vm917_vm5, %v909_v60, %v3214_v37 }
  0xea   : > { %v927_v31 = vsel %vm926_vm6, %v3444_v14, %v3275_v12 }
  0xeb   : > { %v3432_v22 = vpop.permute.xlu1 %1088  ;;  %v863_v40 = vpop.permute.xlu0 %862  ;;  %v936_v37 = vsel %vm935_vm7, %v927_v31, %v3310_v6  ;;  %v809_v6 = vrot.slane %v3090_v29, 2 }
  0xec   : > { %v945_v60 = vsel %vm944_vm8, %v936_v37, %v3348_v25  ;;  %v810_v25 = vrot.slane %v561_v7, 2  ;;  %v1137_v7 = vrot.slane %v601_v50, 2  ;;  %v3501_v50 = vsel %vm543_vm0, 0.0, %v610_v3 }
  0xed   : > { %1124 = vrot.lane.b32.xlu1 %v1019_v4, %s2810_s14  ;;  %799 = vrot.lane.b32.xlu0 %v3435_v39, %s2810_s14  ;;  %v954_v12 = vsel %vm953_vm9, %v945_v60, %v837_v16  ;;  %v910_v16 = vsel %vm908_vm4, %v2931_v20, %v3226_v44  ;;  %v1136_v60 = vrot.slane %v3411_v36, 2 }
  0xee   : > { %v963_v31 = vsel %vm962_vm10, %v954_v12, %v861_v43  ;;  %v1111_v43 = vsel %vm658_vm1, %v1109_v17, %v1110_v51  ;;  %v919_v56 = vsel %vm917_vm5, %v910_v16, %v3257_v1  ;;  %v3492_v12 = vsel %vm707_vm2, %v809_v6, %v810_v25 }
  0xef   : > { %v1185_v47 = vpop.permute.xlu1 %1184  ;;  %v3459_v4 = vpop.permute.xlu0 %1090  ;;  %v928_v20 = vsel %vm926_vm6, %v919_v56, %v3292_v21  ;;  %v634_v1 = vsel %vm543_vm0, %v610_v3, 0.0  ;;  %v1226_v21 = vsel %vm908_vm4, %v3080_v26, %v3330_v52  ;;  %v1138_v3 = vsel %vm707_vm2, %v1136_v60, %v1137_v7 }
  0xf0   : > { %v1573_v25 = vrot.slane %v3501_v50, 1  ;;  %v1574_v26 = vrot.slane %v634_v1, 1 }
  0xf1   : > { %1213 = vrot.lane.b32.xlu1 %v3346_v30, %s2814_s12  ;;  %894 = vrot.lane.b32.xlu0 %v3051_v19, %s2814_s12 }
  0xf3   : > { %v885_v23 = vpop.permute.xlu1 %884  ;;  %v1187_v37 = vpop.permute.xlu0 %1186 }
  0xf4   : > { %v972_v30 = vsel %vm971_vm11, %v963_v31, %v885_v23 }
  0xf5   : > { %824 = vrot.lane.b32.xlu1 %v3051_v19, %s2811_s16  ;;  %2614 = vmatprep.mubr.msk.f32.mxu1 %vm1293_vm12, %v972_v30  ;;  %v1240_v19 = vsel %vm926_vm6, %v3444_v14, %v3343_v11  ;;  %v937_v11 = vsel %vm935_vm7, %v928_v20, %v3324_v45 }
  0xf6   : > { %1151 = vrot.lane.b32.xlu0 %v3385_v59, %s2811_s16  ;;  %v1248_v44 = vsel %vm935_vm7, %v1240_v19, %v3355_v46  ;;  %v946_v46 = vsel %vm944_vm8, %v937_v11, %v3364_v0  ;;  %v1616_v19 = vrot.slane %v634_v1, 2 }
  0xf7   : > { %v3489_v23 = vpop.permute.xlu1 %1116  ;;  %v3498_v17 = vpop.permute.xlu0 %791  ;;  %v1256_v51 = vsel %vm944_vm8, %v1248_v44, %v3372_v13  ;;  %v955_v13 = vsel %vm953_vm9, %v946_v46, %v3400_v57 }
  0xf8   : > { %v1264_v6 = vsel %vm953_vm9, %v1256_v51, %v3408_v33  ;;  %v964_v52 = vsel %vm962_vm10, %v955_v13, %v863_v40  ;;  %v1233_v33 = vsel %vm917_vm5, %v1226_v21, %v3326_v55  ;;  %v1575_v40 = vsel %vm658_vm1, %v1573_v25, %v1574_v26  ;;  %v2743_v13 = vld [vmem:[%s3451_s19 + $0x10] sm:%s3440_s10] }
  0xf9   : > { %1126 = vrot.lane.b32.xlu1 %v1111_v43, %s2810_s14  ;;  %v1272_v45 = vsel %vm962_vm10, %v1264_v6, %v1185_v47  ;;  %v1241_v47 = vsel %vm926_vm6, %v1233_v33, %v3337_v27  ;;  %v1615_v27 = vrot.slane %v3501_v50, 2  ;;  %v612_v25 = vrot.slane %v2743_v13, 7 }
  0xfa   : > { %826 = vrot.lane.b32.xlu0 %v3492_v12, %s2811_s16  ;;  %v1249_v55 = vsel %vm935_vm7, %v1241_v47, %v3357_v32 }
  0xfb   : > { %v1206_v31 = vpop.permute.xlu1 %1205  ;;  %v887_v0 = vpop.permute.xlu0 %886 }
  0xfc   : > { %v1280_v30 = vsel %vm971_vm11, %v1272_v45, %v1206_v31  ;;  %v973_v16 = vsel %vm971_vm11, %v964_v52, %v887_v0  ;;  %v3608_v0 = vsel %vm543_vm0, 0.0, %v612_v25 }
  0xfd   : > { %1215 = vrot.lane.b32.xlu1 %v3385_v59, %s2814_s12  ;;  %2592 = vmatprep.mubr.msk.f32.mxu0 %vm1293_vm12, %v1280_v30  ;;  %v1257_v59 = vsel %vm944_vm8, %v1249_v55, %v3387_v63  ;;  %v636_v30 = vsel %vm543_vm0, %v612_v25, 0.0 }
  0xfe   : > { %1153 = vrot.lane.b32.xlu0 %v1138_v3, %s2811_s16  ;;  %2615 = vmatmul.mubr.msk.f32.vlgmr.msra.gmra.mxu1 %vm1293_vm12, %v973_v16  ;;  %v1265_v7 = vsel %vm953_vm9, %v1257_v59, %v3423_v10  ;;  %v1617_v10 = vsel %vm707_vm2, %v1615_v27, %v1616_v19  ;;  %v1579_v16 = vrot.slane %v3608_v0, 1 }
  0xff   : > { %v3533_v57 = vpop.permute.xlu1 %816  ;;  %v3538_v60 = vpop.permute.xlu0 %1118  ;;  %v1273_v32 = vsel %vm962_vm10, %v1265_v7, %v1187_v37  ;;  %v2740_v37 = vld [vmem:[%s3451_s19 + $0x8] sm:%s3440_s10]  ;;  %v911_v7 = vsel %vm908_vm4, %v2926_v15, %v3219_v38 }
 0x101   : > { %848 = vrot.lane.b32.xlu1 %v3090_v29, %s4242_s17 }
 0x102   : > { %1594 = vrot.lane.b32.xlu0 %v1575_v40, %s2807_s11 }
 0x103   : > { %v3549_v56 = vpop.permute.xlu1 %1026  ;;  %v1208_v20 = vpop.permute.xlu0 %1207 }
 0x104   : > { %v1281_v29 = vsel %vm971_vm11, %v1273_v32, %v1208_v20 }
 0x105   : > { %1175 = vrot.lane.b32.xlu1 %v3411_v36, %s4242_s17  ;;  %2593 = vmatmul.mubr.msk.f32.vlgmr.msra.gmra.mxu0 %vm1293_vm12, %v1281_v29  ;;  %v1622_v29 = vrot.slane %v636_v30, 2 }
 0x106   : > { %872 = vrot.lane.b32.xlu0 %v3435_v39, %s2813_s21  ;;  %v611_v39 = vrot.slane %v2740_v37, 7 }
 0x107   : > { %v3559_v63 = vpop.permute.xlu1 %1143  ;;  %v841_v44 = vpop.permute.xlu0 %840 }
 0x108   : > { %v635_v21 = vsel %vm543_vm0, %v611_v39, 0.0 }
 0x109   : > { %850 = vrot.lane.b32.xlu1 %v2889_v2, %s4242_s17  ;;  %v3579_v2 = vsel %vm543_vm0, 0.0, %v611_v39  ;;  %v1577_v6 = vrot.slane %v635_v21, 1  ;;  %v1619_v52 = vrot.slane %v635_v21, 2  ;;  %v2746_v21 = vld [vmem:[%s3451_s19 + $0x18] sm:%s3440_s10] }
 0x10a   : > { %1636 = vrot.lane.b32.xlu0 %v1617_v10, %s4243_s22 }
 0x10b   : > { %v3567_v1 = vpop.permute.xlu1 %818  ;;  %v3569_v36 = vpop.permute.xlu0 %1068 }
 0x10d   : > { %1196 = vrot.lane.b32.xlu1 %v1111_v43, %s2813_s21  ;;  %v1576_v43 = vrot.slane %v3579_v2, 1 }
 0x10e   : > { %874 = vrot.lane.b32.xlu0 %v2901_v8, %s2813_s21 }
 0x10f   : > { %v3574_v11 = vpop.permute.xlu1 %1028  ;;  %v3576_v51 = vpop.permute.xlu0 %1167  ;;  %v3596_v31 = vsel %vm658_vm1, %v1576_v43, %v1577_v6  ;;  %v1865_v43 = vld [vmem:[%s4219_s3 + $0x60] sm:$0xff]  ;;  %v912_v6 = vsel %vm908_vm4, %v2936_v24, %v3233_v48  ;;  %v1864_v24 = vld [vmem:[%s4219_s3 + $0x58] sm:$0xff] }
 0x111   : > { %1658 = vrot.lane.b32.xlu1 %v3501_v50, %s2809_s23 }
 0x112   : > { %1217 = vrot.lane.b32.xlu0 %v1138_v3, %s2814_s12 }
 0x113   : > { %v3585_v46 = vpop.permute.xlu1 %1145  ;;  %v865_v8 = vpop.permute.xlu0 %864 }
 0x115   : > { %896 = vrot.lane.b32.xlu1 %v3492_v12, %s2814_s12  ;;  %v1618_v12 = vrot.slane %v3579_v2, 2 }
 0x116   : > { %1686 = vrot.lane.b32.xlu0 %v1575_v40, %s2810_s14  ;;  %v1580_v40 = vrot.slane %v636_v30, 1 }
 0x117   : > { %v3593_v45 = vpop.permute.xlu1 %842  ;;  %v3598_v26 = vpop.permute.xlu0 %1092  ;;  %v3618_v55 = vsel %vm707_vm2, %v1618_v12, %v1619_v52  ;;  %v613_v52 = vrot.slane %v2746_v21, 7 }
 0x118   : > { %v3630_v27 = vsel %vm658_vm1, %v1579_v16, %v1580_v40  ;;  %v1862_v40 = vld [vmem:[%s4219_s3 + $0x48] sm:$0xff] }
 0x119   : > { %1660 = vrot.lane.b32.xlu1 %v3579_v2, %s2809_s23 }
 0x11a   : > { %1596 = vrot.lane.b32.xlu0 %v3596_v31, %s2807_s11 }
 0x11b   : > { %v3604_v3 = vpop.permute.xlu1 %1070  ;;  %v1189_v33 = vpop.permute.xlu0 %1188 }
 0x11d   : > { %898 = vrot.lane.b32.xlu1 %v2907_v9, %s2814_s12  ;;  %v920_v9 = vsel %vm917_vm5, %v911_v7, %v3251_v61  ;;  %v1866_v61 = vld [vmem:[%s4219_s3 + $0x68] sm:$0xf] }
 0x11e   : > { %1713 = vrot.lane.b32.xlu0 %v1617_v10, %s2811_s16  ;;  %v929_v19 = vsel %vm926_vm6, %v920_v9, %v3286_v18  ;;  %2626 = vmatprep.subr.msk.mxu0 %vm1318_vm3, %v1866_v61  ;;  %v3717_v9 = vsel %vm543_vm0, 0.0, %v613_v52 }
 0x11f   : > { %v3615_v47 = vpop.permute.xlu1 %1169  ;;  %v867_v59 = vpop.permute.xlu0 %866  ;;  %v938_v15 = vsel %vm935_vm7, %v929_v19, %v3318_v42  ;;  %v1621_v42 = vrot.slane %v3608_v0, 2  ;;  %2627 = vmatpush3.msk.msra.mxu0 %vm1318_vm3, %v1866_v61 }
 0x120   : > { %v947_v20 = vsel %vm944_vm8, %v938_v15, %v3533_v57  ;;  %2628 = vmatprep.subr.mxu0 %v1865_v43  ;;  %v1582_v15 = vrot.slane %v3717_v9, 1 }
 0x121   : > { %1688 = vrot.lane.b32.xlu1 %v3596_v31, %s2810_s14  ;;  %v956_v18 = vsel %vm953_vm9, %v947_v20, %v841_v44  ;;  %v1227_v44 = vsel %vm908_vm4, %v3105_v41, %v3362_v62  ;;  %v3676_v41 = vsel %vm707_vm2, %v1621_v42, %v1622_v29  ;;  %v921_v62 = vsel %vm917_vm5, %v912_v6, %v3266_v5 }
 0x122   : > { %1638 = vrot.lane.b32.xlu0 %v3618_v55, %s4243_s22  ;;  %v965_v57 = vsel %vm962_vm10, %v956_v18, %v865_v8  ;;  %v1234_v8 = vsel %vm917_vm5, %v1227_v44, %v3397_v53  ;;  %2629 = vmatpush3.msra.mxu0 %v1865_v43  ;;  %v930_v53 = vsel %vm926_vm6, %v921_v62, %v3299_v28  ;;  %v1863_v28 = vld [vmem:[%s4219_s3 + $0x50] sm:$0xff] }
 0x123   : > { %v3634_v32 = vpop.permute.xlu1 %793  ;;  %v3638_v38 = vpop.permute.xlu0 %1094  ;;  %v1242_v13 = vsel %vm926_vm6, %v1234_v8, %v3432_v22  ;;  %2630 = vmatprep.subr.mxu0 %v1864_v24  ;;  %v939_v5 = vsel %vm935_vm7, %v930_v53, %v3498_v17 }
 0x124   : > { %v1250_v48 = vsel %vm935_vm7, %v1242_v13, %v3489_v23  ;;  %2631 = vmatpush3.msra.mxu0 %v1864_v24  ;;  %v948_v23 = vsel %vm944_vm8, %v939_v5, %v3567_v1 }
 0x125   : > { %1598 = vrot.lane.b32.xlu1 %v3630_v27, %s2807_s11  ;;  %v1258_v22 = vsel %vm944_vm8, %v1250_v48, %v3559_v63  ;;  %2632 = vmatprep.subr.mxu0 %v1863_v28  ;;  %v957_v17 = vsel %vm953_vm9, %v948_v23, %v3593_v45  ;;  %v637_v45 = vsel %vm543_vm0, %v613_v52, 0.0 }
 0x126   : > { %1737 = vrot.lane.b32.xlu0 %v3579_v2, %s4242_s17  ;;  %v1266_v30 = vsel %vm953_vm9, %v1258_v22, %v3576_v51  ;;  %2633 = vmatpush3.msra.mxu0 %v1863_v28  ;;  %v966_v1 = vsel %vm962_vm10, %v957_v17, %v867_v59  ;;  %v1583_v20 = vrot.slane %v637_v45, 1 }
 0x127   : > { %v889_v10 = vpop.permute.xlu1 %888  ;;  %v3655_v39 = vpop.permute.xlu0 %1190  ;;  %v1274_v63 = vsel %vm962_vm10, %v1266_v30, %v1189_v33  ;;  %2634 = vmatprep.subr.mxu0 %v1862_v40  ;;  %v1228_v33 = vsel %vm908_vm4, %v3119_v49, %v3374_v58  ;;  %v2749_v49 = vld [vmem:[%s3451_s19 + $0x20] sm:%s3440_s10] }
 0x128   : > { %v974_v37 = vsel %vm971_vm11, %v965_v57, %v889_v10  ;;  %v1235_v59 = vsel %vm917_vm5, %v1228_v33, %v3416_v34  ;;  %2635 = vmatpush3.msra.mxu0 %v1862_v40  ;;  %v614_v57 = vrot.slane %v2749_v49, 7  ;;  %v2755_v33 = vld [vmem:[%s3451_s19 + $0x30] sm:%s3440_s10] }
 0x129   : > { %1715 = vrot.lane.b32.xlu1 %v3618_v55, %s2811_s16  ;;  %2617 = vmatprep.mubr.msk.f32.mxu1 %vm1293_vm12, %v974_v37  ;;  %v1243_v61 = vsel %vm926_vm6, %v1235_v59, %v3459_v4  ;;  %v1584_v4 = vsel %vm658_vm1, %v1582_v15, %v1583_v20  ;;  %v913_v59 = vsel %vm908_vm4, %v2958_v35, %v3236_v54  ;;  %v4260_v15 = vld [vmem:[#allocation10_spill] sm:$0xff] }
 0x12a   : > { %1662 = vrot.lane.b32.xlu0 %v3608_v0, %s2809_s23  ;;  %v1251_v58 = vsel %vm935_vm7, %v1243_v61, %v3538_v60  ;;  %v3765_v44 = vsel %vm543_vm0, 0.0, %v614_v57  ;;  %v922_v20 = vsel %vm917_vm5, %v913_v59, %v4260_v15  ;;  %v4261_v61 = vld [vmem:[#allocation15_spill] sm:$0xff] }
 0x12b   : > { %v3682_v25 = vpop.permute.xlu1 %1120  ;;  %v3691_v12 = vpop.permute.xlu0 %795  ;;  %v1259_v34 = vsel %vm944_vm8, %v1251_v58, %v3585_v46  ;;  %v1627_v48 = vrot.slane %v3765_v44, 2  ;;  %v931_v49 = vsel %vm926_vm6, %v922_v20, %v4261_v61 }
 0x12c   : > { %v1267_v42 = vsel %vm953_vm9, %v1259_v34, %v3615_v47  ;;  %v1624_v47 = vrot.slane %v3717_v9, 2  ;;  %v940_v35 = vsel %vm935_vm7, %v931_v49, %v3634_v32 }
 0x12d   : > { %1640 = vrot.lane.b32.xlu1 %v3676_v41, %s4243_s22  ;;  %v1275_v60 = vsel %vm962_vm10, %v1267_v42, %v3655_v39  ;;  %v638_v39 = vsel %vm543_vm0, %v614_v57, 0.0  ;;  %v616_v42 = vrot.slane %v2755_v33, 7 }
 0x12e   : > { %1758 = vrot.lane.b32.xlu0 %v3596_v31, %s2813_s21  ;;  %v1586_v43 = vrot.slane %v638_v39, 1  ;;  %v1628_v52 = vrot.slane %v638_v39, 2 }
 0x12f   : > { %v1210_v16 = vpop.permute.xlu1 %1209  ;;  %v891_v51 = vpop.permute.xlu0 %890  ;;  %v3845_v32 = vsel %vm543_vm0, 0.0, %v616_v42 }
 0x130   : > { %v1282_v7 = vsel %vm971_vm11, %v1274_v63, %v1210_v16  ;;  %v975_v31 = vsel %vm971_vm11, %v966_v1, %v891_v51  ;;  %v1629_v28 = vsel %vm707_vm2, %v1627_v48, %v1628_v52  ;;  %v1591_v52 = vrot.slane %v3845_v32, 1 }
 0x131   : > { %1739 = vrot.lane.b32.xlu1 %v3608_v0, %s4242_s17  ;;  %2595 = vmatprep.mubr.msk.f32.mxu0 %vm1293_vm12, %v1282_v7 }
 0x132   : > { %1690 = vrot.lane.b32.xlu0 %v3630_v27, %s2810_s14  ;;  %2618 = vmatmul.mubr.msk.f32.gmra.mxu1 %vm1293_vm12, %v975_v31 }
 0x133   : > { %v3732_v19 = vpop.permute.xlu1 %820  ;;  %v3737_v18 = vpop.permute.xlu0 %1122 }
 0x135   : > { %1664 = vrot.lane.b32.xlu1 %v3717_v9, %s2809_s23 }
 0x136   : > { %1779 = vrot.lane.b32.xlu0 %v3618_v55, %s2814_s12  ;;  %v1625_v55 = vrot.slane %v637_v45, 2 }
 0x137   : > { %v3751_v29 = vpop.permute.xlu1 %1030  ;;  %v1212_v10 = vpop.permute.xlu0 %1211 }
 0x138   : > { %v1283_v37 = vsel %vm971_vm11, %v1275_v60, %v1212_v10  ;;  %v1626_v8 = vsel %vm707_vm2, %v1624_v47, %v1625_v55  ;;  %v640_v55 = vsel %vm543_vm0, %v616_v42, 0.0 }
 0x139   : > { %1760 = vrot.lane.b32.xlu1 %v3630_v27, %s2813_s21  ;;  %2596 = vmatmul.mubr.msk.f32.gmra.mxu0 %vm1293_vm12, %v1283_v37  ;;  %v1585_v27 = vrot.slane %v3765_v44, 1 }
 0x13a   : > { %1692 = vrot.lane.b32.xlu0 %v1584_v4, %s2810_s14 }
 0x13b   : > { %v3761_v46 = vpop.permute.xlu1 %1147  ;;  %v845_v21 = vpop.permute.xlu0 %844  ;;  %v1587_v13 = vsel %vm658_vm1, %v1585_v27, %v1586_v43  ;;  %v4262_v27 = vld [vmem:[#allocation5_spill] sm:$0xff]  ;;  %v4263_v43 = vld [vmem:[#allocation7_spill] sm:$0xff] }
 0x13d   : > { %1600 = vrot.lane.b32.xlu1 %v1584_v4, %s2807_s11 }
 0x13e   : > { %1781 = vrot.lane.b32.xlu0 %v3676_v41, %s2814_s12 }
 0x13f   : > { %v3772_v6 = vpop.permute.xlu1 %822  ;;  %v3775_v62 = vpop.permute.xlu0 %1072 }
 0x141   : > { %1717 = vrot.lane.b32.xlu1 %v3676_v41, %s2811_s16  ;;  %v2752_v41 = vld [vmem:[%s3451_s19 + $0x28] sm:%s3440_s10] }
 0x142   : > { %1642 = vrot.lane.b32.xlu0 %v1626_v8, %s4243_s22  ;;  %v615_v17 = vrot.slane %v2752_v41, 7  ;;  %v4265_v41 = vld [vmem:[#allocation12_spill] sm:$0xff] }
 0x143   : > { %v3781_v24 = vpop.permute.xlu1 %1032  ;;  %v3783_v53 = vpop.permute.xlu0 %1171 }
 0x144   : > { %v3806_v40 = vsel %vm543_vm0, 0.0, %v615_v17  ;;  %v639_v1 = vsel %vm543_vm0, %v615_v17, 0.0 }
 0x145   : > { %1602 = vrot.lane.b32.xlu1 %v1587_v13, %s2807_s11  ;;  %v1588_v51 = vrot.slane %v3806_v40, 1  ;;  %v1589_v45 = vrot.slane %v639_v1, 1  ;;  %v1630_v60 = vrot.slane %v3806_v40, 2  ;;  %v1631_v47 = vrot.slane %v639_v1, 2 }
 0x146   : > { %1741 = vrot.lane.b32.xlu0 %v3717_v9, %s4242_s17 }
 0x147   : > { %v3789_v5 = vpop.permute.xlu1 %1149  ;;  %v869_v22 = vpop.permute.xlu0 %868  ;;  %v3830_v34 = vsel %vm658_vm1, %v1588_v51, %v1589_v45  ;;  %v1632_v51 = vsel %vm707_vm2, %v1630_v60, %v1631_v47  ;;  %v4266_v45 = vld [vmem:[#allocation17_spill] sm:$0xff] }
 0x149   : > { %1719 = vrot.lane.b32.xlu1 %v1626_v8, %s2811_s16 }
 0x14a   : > { %1666 = vrot.lane.b32.xlu0 %v3765_v44, %s2809_s23 }
 0x14b   : > { %v3797_v23 = vpop.permute.xlu1 %846  ;;  %v3799_v30 = vpop.permute.xlu0 %1096 }
 0x14d   : > { %1644 = vrot.lane.b32.xlu1 %v1629_v28, %s4243_s22 }
 0x14e   : > { %1762 = vrot.lane.b32.xlu0 %v1584_v4, %s2813_s21  ;;  %v949_v4 = vsel %vm944_vm8, %v940_v35, %v3732_v19 }
 0x14f   : > { %v3803_v63 = vpop.permute.xlu1 %1074  ;;  %v1193_v16 = vpop.permute.xlu0 %1192  ;;  %v958_v57 = vsel %vm953_vm9, %v949_v4, %v845_v21  ;;  %v1229_v21 = vsel %vm908_vm4, %v4262_v27, %v3549_v56 }
 0x150   : > { %v967_v10 = vsel %vm962_vm10, %v958_v57, %v869_v22  ;;  %v1236_v48 = vsel %vm917_vm5, %v1229_v21, %v3569_v36  ;;  %v1592_v22 = vrot.slane %v640_v55, 1  ;;  %v4267_v57 = vld [vmem:[#allocation6_spill] sm:$0xff] }
 0x151   : > { %1743 = vrot.lane.b32.xlu1 %v3765_v44, %s4242_s17  ;;  %v1244_v17 = vsel %vm926_vm6, %v1236_v48, %v3598_v26  ;;  %v2007_v26 = vld [vmem:[%s4220_s4] sm:$0xf]  ;;  %v1230_v60 = vsel %vm908_vm4, %v4267_v57, %v3574_v11 }
 0x152   : > { %1694 = vrot.lane.b32.xlu0 %v1587_v13, %s2810_s14  ;;  %v1252_v36 = vsel %vm935_vm7, %v1244_v17, %v3682_v25  ;;  %v1593_v49 = vsel %vm658_vm1, %v1591_v52, %v1592_v22  ;;  %2648 = vmatprep.subr.msk.mxu1 %vm1318_vm3, %v2007_v26 }
 0x153   : > { %v3812_v7 = vpop.permute.xlu1 %1173  ;;  %v871_v31 = vpop.permute.xlu0 %870  ;;  %v1260_v20 = vsel %vm944_vm8, %v1252_v36, %v3761_v46  ;;  %2649 = vmatpush3.msk.msra.mxu1 %vm1318_vm3, %v2007_v26 }
 0x154   : > { %v1268_v25 = vsel %vm953_vm9, %v1260_v20, %v3783_v53 }
 0x155   : > { %1668 = vrot.lane.b32.xlu1 %v3806_v40, %s2809_s23  ;;  %v1276_v46 = vsel %vm962_vm10, %v1268_v25, %v1193_v16  ;;  %v1634_v16 = vrot.slane %v640_v55, 2 }
 0x156   : > { %1783 = vrot.lane.b32.xlu0 %v1626_v8, %s2814_s12  ;;  %v4264_v8 = vld [vmem:[#allocation2_spill] sm:$0xff] }
 0x157   : > { %v3827_v58 = vpop.permute.xlu1 %797  ;;  %v3834_v54 = vpop.permute.xlu0 %1098 }
 0x159   : > { %1764 = vrot.lane.b32.xlu1 %v1587_v13, %s2813_s21  ;;  %v914_v13 = vsel %vm908_vm4, %v4264_v8, %v4263_v43 }
 0x15a   : > { %1696 = vrot.lane.b32.xlu0 %v3830_v34, %s2810_s14  ;;  %v923_v56 = vsel %vm917_vm5, %v914_v13, %v4265_v41 }
 0x15b   : > { %v893_v37 = vpop.permute.xlu1 %892  ;;  %v1195_v39 = vpop.permute.xlu0 %1194  ;;  %v932_v33 = vsel %vm926_vm6, %v923_v56, %v4266_v45 }
 0x15c   : > { %v976_v19 = vsel %vm971_vm11, %v967_v10, %v893_v37  ;;  %v941_v15 = vsel %vm935_vm7, %v932_v33, %v3691_v12  ;;  %v1237_v10 = vsel %vm917_vm5, %v1230_v60, %v3604_v3 }
 0x15d   : > { %1604 = vrot.lane.b32.xlu1 %v3830_v34, %s2807_s11  ;;  %2620 = vmatprep.mubr.msk.f32.mxu1 %vm1293_vm12, %v976_v19  ;;  %v950_v61 = vsel %vm944_vm8, %v941_v15, %v3772_v6  ;;  %v1245_v47 = vsel %vm926_vm6, %v1237_v10, %v3638_v38  ;;  %v2758_v19 = vld [vmem:[%s3451_s19 + $0x38] sm:%s3440_s10] }
 0x15e   : > { %1785 = vrot.lane.b32.xlu0 %v1629_v28, %s2814_s12  ;;  %v959_v12 = vsel %vm953_vm9, %v950_v61, %v3797_v23  ;;  %v1633_v23 = vrot.slane %v3845_v32, 2  ;;  %v1253_v27 = vsel %vm935_vm7, %v1245_v47, %v3737_v18  ;;  %v617_v38 = vrot.slane %v2758_v19, 7 }
 0x15f   : > { %v3866_v1 = vpop.permute.xlu1 %1124  ;;  %v3873_v59 = vpop.permute.xlu0 %799  ;;  %v968_v42 = vsel %vm962_vm10, %v959_v12, %v871_v31  ;;  %v1261_v21 = vsel %vm944_vm8, %v1253_v27, %v3789_v5  ;;  %v4269_v12 = vld [vmem:[#allocation8_spill] sm:$0xff] }
 0x160   : > { %v1635_v37 = vsel %vm707_vm2, %v1633_v23, %v1634_v16  ;;  %v1269_v3 = vsel %vm953_vm9, %v1261_v21, %v3812_v7  ;;  %v633_v5 = vsel %vm543_vm0, 0.0, %v617_v38  ;;  %v4274_v21 = vld [vmem:[#allocation4_spill] sm:$0xff] }
 0x161   : > { %1721 = vrot.lane.b32.xlu1 %v1629_v28, %s2811_s16  ;;  %v1277_v43 = vsel %vm962_vm10, %v1269_v3, %v1195_v39  ;;  %v1683_v39 = vrot.slane %v633_v5, 1  ;;  %v1710_v22 = vrot.slane %v633_v5, 2 }
 0x162   : > { %1646 = vrot.lane.b32.xlu0 %v1632_v51, %s4243_s22 }
 0x163   : > { %v1214_v28 = vpop.permute.xlu1 %1213  ;;  %v895_v35 = vpop.permute.xlu0 %894 }
 0x164   : > { %v1284_v6 = vsel %vm971_vm11, %v1276_v46, %v1214_v28  ;;  %v977_v53 = vsel %vm971_vm11, %v968_v42, %v895_v35  ;;  %v4270_v46 = vld [vmem:[#allocation3_spill] sm:$0xff]  ;;  %v4272_v35 = vld [vmem:[#allocation16_spill] sm:$0xff] }
 0x165   : > { %1606 = vrot.lane.b32.xlu1 %v1593_v49, %s2807_s11  ;;  %2598 = vmatprep.mubr.msk.f32.mxu0 %vm1293_vm12, %v1284_v6  ;;  %v915_v28 = vsel %vm908_vm4, %v4270_v46, %v4269_v12  ;;  %v2762_v46 = vld [vmem:[%s3063_s13 + $0x18] sm:$0xff] }
 0x166   : > { %1745 = vrot.lane.b32.xlu0 %v3806_v40, %s4242_s17  ;;  %2621 = vmatmul.mubr.msk.f32.gmra.mxu1 %vm1293_vm12, %v977_v53 }
 0x167   : > { %v825_v31 = vpop.permute.xlu1 %824 }
 0x168   : > { %v1152_v4 = vpop.permute.xlu0 %1151 }
 0x169   : > { %1723 = vrot.lane.b32.xlu1 %v1632_v51, %s2811_s16 }
 0x16a   : > { %1670 = vrot.lane.b32.xlu0 %v3845_v32, %s2809_s23 }
 0x16b   : > { %v3914_v55 = vpop.permute.xlu1 %1126 }
 0x16c   : > { %v3920_v11 = vpop.permute.xlu0 %826 }
 0x16d   : > { %1648 = vrot.lane.b32.xlu1 %v1635_v37, %s4243_s22 }
 0x16e   : > { %1766 = vrot.lane.b32.xlu0 %v3830_v34, %s2813_s21  ;;  %v641_v34 = vsel %vm543_vm0, %v617_v38, 0.0 }
 0x16f   : > { %v1216_v8 = vpop.permute.xlu1 %1215  ;;  %v1684_v52 = vrot.slane %v641_v34, 1  ;;  %v1711_v56 = vrot.slane %v641_v34, 2 }
 0x170   : > { %v1285_v13 = vsel %vm971_vm11, %v1277_v43, %v1216_v8  ;;  %v3931_v18 = vpop.permute.xlu0 %1153  ;;  %v4276_v43 = vld [vmem:[#allocation13_spill] sm:$0xff] }
 0x171   : > { %1747 = vrot.lane.b32.xlu1 %v3845_v32, %s4242_s17  ;;  %2599 = vmatmul.mubr.msk.f32.gmra.mxu0 %vm1293_vm12, %v1285_v13  ;;  %v1685_v45 = vsel %vm658_vm1, %v1683_v39, %v1684_v52  ;;  %v1712_v36 = vsel %vm707_vm2, %v1710_v22, %v1711_v56 }
 0x172   : > { %1698 = vrot.lane.b32.xlu0 %v1593_v49, %s2810_s14 }
 0x173   : > { %v849_v7 = vpop.permute.xlu1 %848 }
 0x174   : > { %v3939_v48 = vpop.permute.xlu0 %1594 }
 0x175   : > { %1672 = vrot.lane.b32.xlu1 %v633_v5, %s2809_s23 }
 0x176   : > { %1787 = vrot.lane.b32.xlu0 %v1632_v51, %s2814_s12  ;;  %v4268_v51 = vld [vmem:[#allocation14_spill] sm:$0xff] }
 0x177   : > { %v1176_v41 = vpop.permute.xlu1 %1175  ;;  %v1231_v20 = vsel %vm908_vm4, %v4268_v51, %v3751_v29  ;;  %v4271_v29 = vld [vmem:[#allocation11_spill] sm:$0xff] }
 0x178   : > { %v873_v17 = vpop.permute.xlu0 %872  ;;  %v1238_v26 = vsel %vm917_vm5, %v1231_v20, %v3775_v62  ;;  %v924_v6 = vsel %vm917_vm5, %v915_v28, %v4271_v29  ;;  %v2763_v28 = vld [vmem:[%s3063_s13 + $0x20] sm:$0xff] }
 0x179   : > { %1768 = vrot.lane.b32.xlu1 %v1593_v49, %s2813_s21  ;;  %v1246_v25 = vsel %vm926_vm6, %v1238_v26, %v3799_v30  ;;  %v933_v30 = vsel %vm926_vm6, %v924_v6, %v4272_v35  ;;  %v2760_v26 = vld [vmem:[%s3063_s13 + $0x8] sm:$0xff] }
 0x17a   : > { %1725 = vrot.lane.b32.xlu0 %v1635_v37, %s2811_s16  ;;  %v1254_v42 = vsel %vm935_vm7, %v1246_v25, %v3866_v1  ;;  %v942_v16 = vsel %vm935_vm7, %v933_v30, %v3827_v58  ;;  %v4273_v58 = vld [vmem:[#allocation9_spill] sm:$0xff]  ;;  %v2764_v6 = vld [vmem:[%s3063_s13 + $0x28] sm:$0xff] }
 0x17b   : > { %v3946_v33 = vpop.permute.xlu1 %850  ;;  %v1262_v62 = vsel %vm944_vm8, %v1254_v42, %v1152_v4  ;;  %v951_v60 = vsel %vm944_vm8, %v942_v16, %v825_v31  ;;  %v916_v3 = vsel %vm908_vm4, %v4274_v21, %v4273_v58  ;;  %v4275_v31 = vld [vmem:[#allocation19_spill] sm:$0xff] }
 0x17c   : > { %v3949_v15 = vpop.permute.xlu0 %1636  ;;  %v1270_v53 = vsel %vm953_vm9, %v1262_v62, %v1176_v41  ;;  %v960_v4 = vsel %vm953_vm9, %v951_v60, %v849_v7  ;;  %v1232_v38 = vsel %vm908_vm4, %v4275_v31, %v3781_v24  ;;  %v925_v8 = vsel %vm917_vm5, %v916_v3, %v4276_v43  ;;  %v2765_v62 = vld [vmem:[%s3063_s13 + $0x30] sm:$0xff] }
 0x17d   : > { %1700 = vrot.lane.b32.xlu1 %v1685_v45, %s2810_s14  ;;  %v1239_v13 = vsel %vm917_vm5, %v1232_v38, %v3803_v63 }
 0x17e   : > { %1727 = vrot.lane.b32.xlu0 %v1712_v36, %s2811_s16  ;;  %v1247_v34 = vsel %vm926_vm6, %v1239_v13, %v3834_v54 }
 0x17f   : > { %v1197_v61 = vpop.permute.xlu1 %1196  ;;  %v1255_v52 = vsel %vm935_vm7, %v1247_v34, %v3914_v55 }
 0x180   : > { %v3960_v49 = vpop.permute.xlu0 %874  ;;  %v1278_v1 = vsel %vm962_vm10, %v1270_v53, %v1197_v61  ;;  %v1263_v63 = vsel %vm944_vm8, %v1255_v52, %v3931_v18  ;;  %v2761_v61 = vld [vmem:[%s3063_s13 + $0x10] sm:$0xff] }
 0x181   : > { %1789 = vrot.lane.b32.xlu1 %v1635_v37, %s2814_s12  ;;  %v969_v37 = vsel %vm962_vm10, %v960_v4, %v873_v17  ;;  %v1271_v56 = vsel %vm953_vm9, %v1263_v63, %v3946_v33  ;;  %v4278_v53 = vld [vmem:[#allocation20_spill] sm:$0xff] }
 0x182   : > { %1770 = vrot.lane.b32.xlu0 %v1685_v45, %s2813_s21  ;;  %v1279_v55 = vsel %vm962_vm10, %v1271_v56, %v3960_v49  ;;  %s4171_s21 = scalar_lea.vmem %s4221_s5, %s3053_s8 }
 0x183   : > { %v1659_v23 = vpop.permute.xlu1 %1658 }
 0x184   : > { %v1218_v57 = vpop.permute.xlu0 %1217 }
 0x185   : > { %v1286_v10 = vsel %vm971_vm11, %v1278_v1, %v1218_v57  ;;  %1749 = vrot.lane.b32.xlu1 %v633_v5, %s4242_s17  ;;  %v4277_v5 = vld [vmem:[#allocation18_spill] sm:$0xff]  ;;  %v1814_v1 = vsel %vm926_vm6, %v3444_v14, %v1659_v23 }
 0x186   : > { %2601 = vmatprep.mubr.msk.f32.mxu0 %vm1293_vm12, %v1286_v10  ;;  %v934_v7 = vsel %vm926_vm6, %v925_v8, %v4277_v5 }
 0x187   : > { %v897_v47 = vpop.permute.xlu1 %896  ;;  %v943_v24 = vsel %vm935_vm7, %v934_v7, %v3873_v59 }
 0x188   : > { %v978_v19 = vsel %vm971_vm11, %v969_v37, %v897_v47  ;;  %v1687_v27 = vpop.permute.xlu0 %1686  ;;  %v952_v41 = vsel %vm944_vm8, %v943_v24, %v3920_v11  ;;  %v1800_v47 = vsel %vm908_vm4, %v3501_v50, %v3939_v48 }
 0x189   : > { %1791 = vrot.lane.b32.xlu1 %v1712_v36, %s2814_s12  ;;  %2623 = vmatprep.mubr.msk.f32.mxu1 %vm1293_vm12, %v978_v19  ;;  %v961_v54 = vsel %vm953_vm9, %v952_v41, %v3946_v33  ;;  %v2759_v36 = vld [vmem:[%s3063_s13] sm:$0xff]  ;;  %v1822_v60 = vsel %vm935_vm7, %v1814_v1, %v1687_v27  ;;  %v1807_v14 = vsel %vm917_vm5, %v1800_v47, %v3949_v15  ;;  %s4153_s13 = scalar_lea.vmem %s4222_s6, %s3053_s8  ;;  %s2492_s8 = sshll.u32 %s4290_s25, 3 }
 0x18a   : > { %v970_v59 = vsel %vm962_vm10, %v961_v54, %v3960_v49  ;;  %s465_s12 = sadd.s32 %s2492_s8, %s3025_s20 }
 0x18b   : > { %v1661_v39 = vpop.permute.xlu1 %1660  ;;  %s2493_s17 = sshll.u32 %s465_s12, 2 }
 0x18c   : > { %v4005_v22 = vpop.permute.xlu0 %1596  ;;  %v1815_v27 = vsel %vm926_vm6, %v1807_v14, %v1661_v39  ;;  %s467_s19 = scalar_lea.vmem %s4223_s7, %s2493_s17 }
 0x18d   : > { %v1801_v41 = vsel %vm908_vm4, %v3579_v2, %v4005_v22 }
 0x18f   : > { %v4019_v17 = vpop.permute.xlu1 %898 }
 0x190   : > { %v1714_v11 = vpop.permute.xlu0 %1713  ;;  %v1287_v18 = vsel %vm971_vm11, %v1279_v55, %v4019_v17  ;;  %v979_v45 = vsel %vm971_vm11, %v970_v59, %v4019_v17 }
 0x191   : > { %2602 = vmatmul.mubr.msk.f32.gmra.mxu0 %vm1293_vm12, %v1287_v18  ;;  %2624 = vmatmul.mubr.msk.f32.gmra.mxu1 %vm1293_vm12, %v979_v45  ;;  %v1830_v10 = vsel %vm944_vm8, %v1822_v60, %v1714_v11 }
 0x192   : > { %2650 = vmatprep.mubr.msk.f32.mxu1 %vm908_vm4, %v2759_v36 }
 0x193   : > { %v1689_v51 = vpop.permute.xlu1 %1688 }
 0x194   : > { %v1639_v20 = vpop.permute.xlu0 %1638  ;;  %v1823_v31 = vsel %vm935_vm7, %v1815_v27, %v1689_v51 }
 0x195   : > { %2651 = vmatmul.mubr.msk.f32.vlgmr.msra.gmra.mxu1 %vm908_vm4, %v2760_v26  ;;  %v1808_v54 = vsel %vm917_vm5, %v1801_v41, %v1639_v20 }
 0x196   : > { %2653 = vmatprep.mubr.msk.f32.mxu1 %vm908_vm4, %v2761_v61 }
 0x197   : > { %v1599_v25 = vpop.permute.xlu1 %1598 }
 0x198   : > { %v1738_v12 = vpop.permute.xlu0 %1737  ;;  %v1802_v2 = vsel %vm908_vm4, %v3608_v0, %v1599_v25 }
 0x199   : > { %2654 = vmatmul.mubr.msk.f32.gmra.mxu1 %vm908_vm4, %v2762_v46  ;;  %v1838_v4 = vsel %vm953_vm9, %v1830_v10, %v1738_v12 }
 0x19a   : > { %2656 = vmatprep.mubr.msk.f32.mxu1 %vm908_vm4, %v2763_v28 }
 0x19b   : > { %v1716_v42 = vpop.permute.xlu1 %1715 }
 0x19c   : > { %v1663_v29 = vpop.permute.xlu0 %1662  ;;  %v1831_v38 = vsel %vm944_vm8, %v1823_v31, %v1716_v42 }
 0x19d   : > { %2657 = vmatmul.mubr.msk.f32.gmra.mxu1 %vm908_vm4, %v2764_v6  ;;  %v1816_v59 = vsel %vm926_vm6, %v1808_v54, %v1663_v29 }
 0x19e   : > { %2659 = vmatprep.mubr.msk.f32.mxu1 %vm908_vm4, %v2765_v62 }
 0x19f   : > { %v1641_v35 = vpop.permute.xlu1 %1640 }
 0x1a0   : > { %v1759_v30 = vpop.permute.xlu0 %1758  ;;  %v1809_v22 = vsel %vm917_vm5, %v1802_v2, %v1641_v35 }
 0x1a1   : > { %2660 = vmatmul.mubr.msk.f32.gmra.mxu1 %vm908_vm4, %v4278_v53  ;;  %v1846_v19 = vsel %vm962_vm10, %v1838_v4, %v1759_v30 }
 0x1a3   : > { %v1740_v16 = vpop.permute.xlu1 %1739 }
 0x1a4   : > { %v1691_v57 = vpop.permute.xlu0 %1690  ;;  %v1839_v50 = vsel %vm953_vm9, %v1831_v38, %v1740_v16 }
 0x1a5   : > { %v1824_v11 = vsel %vm935_vm7, %v1816_v59, %v1691_v57 }
 0x1a7   : > { %v1665_v37 = vpop.permute.xlu1 %1664 }
 0x1a8   : > { %v1780_v58 = vpop.permute.xlu0 %1779  ;;  %v1817_v12 = vsel %vm926_vm6, %v1809_v22, %v1665_v37 }
 0x1a9   : > { %v1854_v21 = vsel %vm971_vm11, %v1846_v19, %v1780_v58 }
 0x1aa   : > { %2636 = vmatprep.mubr.msk.f32.mxu0 %vm1293_vm12, %v1854_v21 }
 0x1ab   : > { %v1761_v23 = vpop.permute.xlu1 %1760 }
 0x1ac   : > { %v1693_v3 = vpop.permute.xlu0 %1692  ;;  %v1847_v43 = vsel %vm962_vm10, %v1839_v50, %v1761_v23 }
 0x1ad   : > { %v1825_v28 = vsel %vm935_vm7, %v1817_v12, %v1693_v3 }
 0x1af   : > { %v1601_v48 = vpop.permute.xlu1 %1600 }
 0x1b0   : > { %v1782_v8 = vpop.permute.xlu0 %1781  ;;  %v1803_v4 = vsel %vm908_vm4, %v3717_v9, %v1601_v48 }
 0x1b1   : > { %v1855_v13 = vsel %vm971_vm11, %v1847_v43, %v1782_v8 }
 0x1b2   : > { %2637 = vmatmul.mubr.msk.f32.vlgmr.msra.gmra.mxu0 %vm1293_vm12, %v1855_v13 }
 0x1b3   : > { %v1718_v5 = vpop.permute.xlu1 %1717 }
 0x1b4   : > { %v1643_v15 = vpop.permute.xlu0 %1642  ;;  %v1832_v18 = vsel %vm944_vm8, %v1824_v11, %v1718_v5 }
 0x1b5   : > { %v1810_v37 = vsel %vm917_vm5, %v1803_v4, %v1643_v15 }
 0x1b7   : > { %v1603_v7 = vpop.permute.xlu1 %1602 }
 0x1b8   : > { %v1742_v34 = vpop.permute.xlu0 %1741  ;;  %v1804_v48 = vsel %vm908_vm4, %v3765_v44, %v1603_v7 }
 0x1b9   : > { %v1840_v45 = vsel %vm953_vm9, %v1832_v18, %v1742_v34 }
 0x1bb   : > { %v1720_v39 = vpop.permute.xlu1 %1719 }
 0x1bc   : > { %v1667_v24 = vpop.permute.xlu0 %1666  ;;  %v1833_v42 = vsel %vm944_vm8, %v1825_v28, %v1720_v39 }
 0x1bd   : > { %v1818_v19 = vsel %vm926_vm6, %v1810_v37, %v1667_v24 }
 0x1bf   : > { %v1645_v52 = vpop.permute.xlu1 %1644 }
 0x1c0   : > { %v1763_v63 = vpop.permute.xlu0 %1762  ;;  %v1811_v43 = vsel %vm917_vm5, %v1804_v48, %v1645_v52 }
 0x1c1   : > { %v1848_v51 = vsel %vm962_vm10, %v1840_v45, %v1763_v63 }
 0x1c3   : > { %v1744_v56 = vpop.permute.xlu1 %1743 }
 0x1c4   : > { %v1695_v55 = vpop.permute.xlu0 %1694  ;;  %v1841_v29 = vsel %vm953_vm9, %v1833_v42, %v1744_v56 }
 0x1c5   : > { %v1826_v21 = vsel %vm935_vm7, %v1818_v19, %v1695_v55  ;;  %v4129_v12 = vpop.f32.mrf.mxu0 }
 0x1c7   : > { %v1669_v36 = vpop.permute.xlu1 %1668  ;;  %v4133_v28 = vpop.f32.mrf.mxu0 }
 0x1c8   : > { %v1784_v26 = vpop.permute.xlu0 %1783  ;;  %v1819_v13 = vsel %vm926_vm6, %v1811_v43, %v1669_v36 }
 0x1c9   : > { %v1856_v61 = vsel %vm971_vm11, %v1848_v51, %v1784_v26 }
 0x1ca   : > { %2639 = vmatprep.mubr.msk.f32.mxu0 %vm1293_vm12, %v1856_v61 }
 0x1cb   : > { %v1765_v20 = vpop.permute.xlu1 %1764 }
 0x1cc   : > { %v1697_v46 = vpop.permute.xlu0 %1696  ;;  %v1849_v62 = vsel %vm962_vm10, %v1841_v29, %v1765_v20 }
 0x1cd   : > { %v1827_v34 = vsel %vm935_vm7, %v1819_v13, %v1697_v46 }
 0x1cf   : > { %v1605_v6 = vpop.permute.xlu1 %1604 }
 0x1d0   : > { %v1786_v30 = vpop.permute.xlu0 %1785  ;;  %v1805_v7 = vsel %vm908_vm4, %v3806_v40, %v1605_v6 }
 0x1d1   : > { %v1857_v0 = vsel %vm971_vm11, %v1849_v62, %v1786_v30 }
 0x1d2   : > { %2640 = vmatmul.mubr.msk.f32.gmra.mxu0 %vm1293_vm12, %v1857_v0 }
 0x1d3   : > { %v1722_v25 = vpop.permute.xlu1 %1721 }
 0x1d4   : > { %v1647_v35 = vpop.permute.xlu0 %1646  ;;  %v1834_v14 = vsel %vm944_vm8, %v1826_v21, %v1722_v25 }
 0x1d5   : > { %v1812_v54 = vsel %vm917_vm5, %v1805_v7, %v1647_v35 }
 0x1d7   : > { %v1607_v53 = vpop.permute.xlu1 %1606 }
 0x1d8   : > { %v1746_v16 = vpop.permute.xlu0 %1745  ;;  %v1806_v8 = vsel %vm908_vm4, %v3845_v32, %v1607_v53 }
 0x1d9   : > { %v1842_v23 = vsel %vm953_vm9, %v1834_v14, %v1746_v16 }
 0x1db   : > { %v1724_v1 = vpop.permute.xlu1 %1723 }
 0x1dc   : > { %v1671_v57 = vpop.permute.xlu0 %1670  ;;  %v1835_v24 = vsel %vm944_vm8, %v1827_v34, %v1724_v1 }
 0x1dd   : > { %v1820_v55 = vsel %vm926_vm6, %v1812_v54, %v1671_v57 }
 0x1df   : > { %v1649_v60 = vpop.permute.xlu1 %1648 }
 0x1e0   : > { %v1767_v10 = vpop.permute.xlu0 %1766  ;;  %v1813_v5 = vsel %vm917_vm5, %v1806_v8, %v1649_v60 }
 0x1e1   : > { %v1850_v3 = vsel %vm962_vm10, %v1842_v23, %v1767_v10 }
 0x1e3   : > { %v1748_v47 = vpop.permute.xlu1 %1747 }
 0x1e4   : > { %v1699_v58 = vpop.permute.xlu0 %1698  ;;  %v1843_v44 = vsel %vm953_vm9, %v1835_v24, %v1748_v47 }
 0x1e5   : > { %v1828_v11 = vsel %vm935_vm7, %v1820_v55, %v1699_v58 }
 0x1e7   : > { %v1673_v27 = vpop.permute.xlu1 %1672 }
 0x1e8   : > { %v1788_v31 = vpop.permute.xlu0 %1787  ;;  %v1821_v39 = vsel %vm926_vm6, %v1813_v5, %v1673_v27 }
 0x1e9   : > { %v1858_v38 = vsel %vm971_vm11, %v1850_v3, %v1788_v31 }
 0x1ea   : > { %2642 = vmatprep.mubr.msk.f32.mxu0 %vm1293_vm12, %v1858_v38 }
 0x1eb   : > { %v1769_v9 = vpop.permute.xlu1 %1768 }
 0x1ec   : > { %v1726_v50 = vpop.permute.xlu0 %1725  ;;  %v1851_v32 = vsel %vm962_vm10, %v1843_v44, %v1769_v9 }
 0x1ed   : > { %v1836_v18 = vsel %vm944_vm8, %v1828_v11, %v1726_v50 }
 0x1ef   : > { %v1701_v15 = vpop.permute.xlu1 %1700 }
 0x1f0   : > { %v1829_v41 = vsel %vm935_vm7, %v1821_v39, %v1701_v15  ;;  %v1728_v63 = vpop.permute.xlu0 %1727 }
 0x1f1   : > { %v1837_v56 = vsel %vm944_vm8, %v1829_v41, %v1728_v63 }
 0x1f2   : > { %v1845_v40 = vsel %vm953_vm9, %v1837_v56, %v3946_v33  ;;  %v4127_v33 = vpop.f32.mrf.mxu1 }
 0x1f3   : > { %v1790_v52 = vpop.permute.xlu1 %1789  ;;  %v1853_v26 = vsel %vm962_vm10, %v1845_v40, %v3960_v49 }
 0x1f4   : > { %v1859_v59 = vsel %vm971_vm11, %v1851_v32, %v1790_v52  ;;  %v1771_v51 = vpop.permute.xlu0 %1770  ;;  %v1861_v20 = vsel %vm971_vm11, %v1853_v26, %v4019_v17  ;;  %v4131_v46 = vpop.f32.mrf.mxu1  ;;  %v1526_v26 = vadd.f32 %v4127_v33, %v4129_v12 }
 0x1f5   : > { %2643 = vmatmul.mubr.msk.f32.gmra.mxu0 %vm1293_vm12, %v1859_v59 }
 0x1f6   : > { %v4135_v49 = vpop.f32.mrf.mxu1 }
 0x1f7   : > { %v1750_v45 = vpop.permute.xlu1 %1749 }
 0x1f8   : > { %v1844_v36 = vsel %vm953_vm9, %v1836_v18, %v1750_v45  ;;  %v4139_v29 = vpop.f32.mrf.mxu1 }
 0x1f9   : > { %v1852_v61 = vsel %vm962_vm10, %v1844_v36, %v1771_v51  ;;  %v4137_v42 = vpop.f32.mrf.mxu0 }
 0x1fb   : > { %v1792_v2 = vpop.permute.xlu1 %1791  ;;  %v4141_v6 = vpop.f32.mrf.mxu0 }
 0x1fc   : > { %v1860_v22 = vsel %vm971_vm11, %v1852_v61, %v1792_v2 }
 0x1fd   : > { %2645 = vmatprep.mubr.msk.f32.mxu0 %vm1293_vm12, %v1860_v22 }
 0x1fe   : > { %2646 = vmatmul.mubr.msk.f32.gmra.mxu0 %vm1293_vm12, %v1861_v20  ;;  %v1521_v20 = vadd.f32 %v4131_v46, %v4133_v28  ;;  %v1531_v46 = vadd.f32 %v4139_v29, %v4141_v6 }
 0x226   : > { %v2622_v17 = vpop.f32.mrf.mxu1 }
 0x228   : > { %v1540_v0 = vpop.f32.mrf.mxu1 }
 0x231   : > { %v2600_v62 = vpop.f32.mrf.mxu0 }
 0x232   : > { %v4143_v30 = vadd.f32 %v2622_v17, %v2600_v62 }
 0x233   : > { %v1408_v25 = vpop.f32.mrf.mxu0 }
 0x234   : > { %v4145_v35 = vadd.f32 %v1540_v0, %v1408_v25 }
 0x251   : > { %v2603_v53 = vpop.f32.mrf.mxu0  ;;  %v2625_v16 = vpop.f32.mrf.mxu1 }
 0x252   : > { %v4147_v1 = vadd.f32 %v2625_v16, %v2603_v53 }
 0x253   : > { %v1418_v57 = vpop.f32.mrf.mxu0  ;;  %v1550_v60 = vpop.f32.mrf.mxu1 }
 0x254   : > { %v4155_v10 = vadd.f32 %v1550_v60, %v1418_v57  ;;  %v1536_v60 = vadd.f32 %v4135_v49, %v4137_v42 }
 0x255   : > { %v2652_v4 = vpop.f32.mrf.mxu1 }
 0x256   : > { %2141 = vst [vmem:[%s4153_s13 + $0x8] sm:$0xff] %v2652_v4  ;;  %v2197_v37 = vmul.f32 %v2652_v4, %v2652_v4 }
 0x257   : > { %v2093_v47 = vpop.f32.mrf.mxu1 }
 0x258   : > { %2140 = vst [vmem:[%s4153_s13] sm:$0xff] %v2093_v47  ;;  %v2183_v19 = vadd.f32 %v2652_v4, %v2093_v47  ;;  %v2196_v58 = vmul.f32 %v2093_v47, %v2093_v47 }
 0x259   : > { %v2655_v21 = vpop.f32.mrf.mxu1 }
 0x25a   : > { %v2204_v14 = vadd.f32 %v2197_v37, %v2196_v58  ;;  %2143 = vst [vmem:[%s4153_s13 + $0x18] sm:$0xff] %v2655_v21  ;;  %v2199_v27 = vmul.f32 %v2655_v21, %v2655_v21 }
 0x25b   : > { %v2103_v23 = vpop.f32.mrf.mxu1 }
 0x25c   : > { %2142 = vst [vmem:[%s4153_s13 + $0x10] sm:$0xff] %v2103_v23  ;;  %v2184_v3 = vadd.f32 %v2183_v19, %v2103_v23  ;;  %v2198_v31 = vmul.f32 %v2103_v23, %v2103_v23 }
 0x25d   : > { %v2658_v38 = vpop.f32.mrf.mxu1 }
 0x25e   : > { %v2205_v9 = vadd.f32 %v2204_v14, %v2198_v31  ;;  %2145 = vst [vmem:[%s4153_s13 + $0x28] sm:$0xff] %v2658_v38  ;;  %v2185_v50 = vadd.f32 %v2655_v21, %v2184_v3  ;;  %v2201_v43 = vmul.f32 %v2658_v38, %v2658_v38 }
 0x25f   : > { %v2113_v48 = vpop.f32.mrf.mxu1 }
 0x260   : > { %2144 = vst [vmem:[%s4153_s13 + $0x20] sm:$0xff] %v2113_v48  ;;  %v2186_v8 = vadd.f32 %v2185_v50, %v2113_v48  ;;  %v2200_v13 = vmul.f32 %v2113_v48, %v2113_v48  ;;  %v2206_v5 = vadd.f32 %v2205_v9, %v2199_v27 }
 0x261   : > { %v2661_v15 = vpop.f32.mrf.mxu1 }
 0x262   : > { %v2207_v34 = vadd.f32 %v2206_v5, %v2200_v13  ;;  %2147 = vst [vmem:[%s4153_s13 + $0x38] sm:$0xff] %v2661_v15  ;;  %v2187_v39 = vadd.f32 %v2658_v38, %v2186_v8  ;;  %v2203_v41 = vmul.f32 %v2661_v15, %v2661_v15 }
 0x263   : > { %v2123_v24 = vpop.f32.mrf.mxu1 }
 0x264   : > { %2146 = vst [vmem:[%s4153_s13 + $0x30] sm:$0xff] %v2123_v24  ;;  %v2188_v63 = vadd.f32 %v2187_v39, %v2123_v24  ;;  %v2202_v44 = vmul.f32 %v2123_v24, %v2123_v24  ;;  %v2208_v7 = vadd.f32 %v2207_v34, %v2201_v43 }
 0x266   : > { %v2189_v32 = vadd.f32 %v2661_v15, %v2188_v63  ;;  %v2209_v52 = vadd.f32 %v2208_v7, %v2202_v44 }
 0x268   : > { %v2190_v54 = vrot.slane %v2189_v32, 4  ;;  %v2210_v56 = vadd.f32 %v2209_v52, %v2203_v41 }
 0x26a   : > { %v2191_v59 = vadd.f32 %v2190_v54, %v2189_v32  ;;  %v2211_v55 = vrot.slane %v2210_v56, 4 }
 0x26c   : > { %v2192_v11 = vrot.slane %v2191_v59, 2  ;;  %v2212_v18 = vadd.f32 %v2211_v55, %v2210_v56 }
 0x26e   : > { %v2193_v40 = vadd.f32 %v2192_v11, %v2191_v59  ;;  %v2213_v45 = vrot.slane %v2212_v18, 2 }
 0x270   : > { %v2194_v36 = vrot.slane %v2193_v40, 1  ;;  %v2214_v51 = vadd.f32 %v2213_v45, %v2212_v18 }
 0x272   : > { %v2638_v61 = vpop.f32.mrf.mxu0  ;;  %v2195_v2 = vadd.f32 %v2194_v36, %v2193_v40  ;;  %v2215_v22 = vrot.slane %v2214_v51, 1 }
 0x273   : > { %v2000_v17 = vadd.f32 %v2638_v61, %v1526_v26 }
 0x274   : > { %v1960_v62 = vpop.f32.mrf.mxu0  ;;  %v2216_v0 = vadd.f32 %v2215_v22, %v2214_v51 }
 0x275   : > { %2133 = vst [vmem:[%s4171_s21 + $0x8] sm:$0xff] %v2000_v17  ;;  %v1999_v33 = vadd.f32 %v1960_v62, %v1521_v20  ;;  %v2162_v25 = vmul.f32 %v2000_v17, %v2000_v17 }
 0x276   : > { %v4177_v12 = vsel %vm543_vm0, %v2195_v2, %v2216_v0 }
 0x277   : > { %2132 = vst [vmem:[%s4171_s21] sm:$0xff] %v1999_v33  ;;  %v2148_v53 = vadd.f32 %v2000_v17, %v1999_v33  ;;  %v2161_v16 = vmul.f32 %v1999_v33, %v1999_v33  ;;  %v2219_v11 = vrot.slane %v4177_v12, 6 }
 0x279   : > { %v2169_v57 = vadd.f32 %v2162_v25, %v2161_v16 }
 0x292   : > { %v2641_v4 = vpop.f32.mrf.mxu0 }
 0x293   : > { %v2002_v28 = vadd.f32 %v2641_v4, %v1536_v60 }
 0x294   : > { %v1970_v37 = vpop.f32.mrf.mxu0 }
 0x295   : > { %2135 = vst [vmem:[%s4171_s21 + $0x18] sm:$0xff] %v2002_v28  ;;  %v2001_v47 = vadd.f32 %v1970_v37, %v1531_v46  ;;  %v2164_v21 = vmul.f32 %v2002_v28, %v2002_v28 }
 0x297   : > { %2134 = vst [vmem:[%s4171_s21 + $0x10] sm:$0xff] %v2001_v47  ;;  %v2149_v19 = vadd.f32 %v2148_v53, %v2001_v47  ;;  %v2163_v58 = vmul.f32 %v2001_v47, %v2001_v47 }
 0x299   : > { %v2170_v14 = vadd.f32 %v2169_v57, %v2163_v58  ;;  %v2150_v23 = vadd.f32 %v2149_v19, %v2002_v28 }
 0x29b   : > { %v2171_v27 = vadd.f32 %v2170_v14, %v2164_v21 }
 0x2b5   : > { %v2644_v3 = vpop.f32.mrf.mxu0 }
 0x2b6   : > { %v2004_v49 = vadd.f32 %v2644_v3, %v4143_v30 }
 0x2b7   : > { %v1980_v42 = vpop.f32.mrf.mxu0 }
 0x2b8   : > { %2137 = vst [vmem:[%s4171_s21 + $0x28] sm:$0xff] %v2004_v49  ;;  %v2003_v29 = vadd.f32 %v1980_v42, %v4145_v35  ;;  %v2166_v38 = vmul.f32 %v2004_v49, %v2004_v49 }
 0x2ba   : > { %2136 = vst [vmem:[%s4171_s21 + $0x20] sm:$0xff] %v2003_v29  ;;  %v2151_v6 = vadd.f32 %v2150_v23, %v2003_v29  ;;  %v2165_v31 = vmul.f32 %v2003_v29, %v2003_v29 }
 0x2bc   : > { %v2172_v9 = vadd.f32 %v2171_v27, %v2165_v31  ;;  %v2152_v50 = vadd.f32 %v2151_v6, %v2004_v49 }
 0x2be   : > { %v2647_v48 = vpop.f32.mrf.mxu0  ;;  %v2173_v43 = vadd.f32 %v2172_v9, %v2166_v38 }
 0x2bf   : > { %v2006_v8 = vadd.f32 %v2647_v48, %v4147_v1 }
 0x2c0   : > { %v1990_v13 = vpop.f32.mrf.mxu0 }
 0x2c1   : > { %2139 = vst [vmem:[%s4171_s21 + $0x38] sm:$0xff] %v2006_v8  ;;  %v2005_v30 = vadd.f32 %v1990_v13, %v4155_v10  ;;  %v2168_v35 = vmul.f32 %v2006_v8, %v2006_v8 }
 0x2c3   : > { %2138 = vst [vmem:[%s4171_s21 + $0x30] sm:$0xff] %v2005_v30  ;;  %v2153_v5 = vadd.f32 %v2152_v50, %v2005_v30  ;;  %v2167_v15 = vmul.f32 %v2005_v30, %v2005_v30 }
 0x2c5   : > { %v2154_v34 = vadd.f32 %v2153_v5, %v2006_v8  ;;  %v2174_v39 = vadd.f32 %v2173_v43, %v2167_v15 }
 0x2c7   : > { %v2155_v24 = vrot.slane %v2154_v34, 4  ;;  %v2175_v41 = vadd.f32 %v2174_v39, %v2168_v35 }
 0x2c9   : > { %v2156_v63 = vadd.f32 %v2155_v24, %v2154_v34  ;;  %v2176_v44 = vrot.slane %v2175_v41, 4 }
 0x2cb   : > { %v2157_v7 = vrot.slane %v2156_v63, 2  ;;  %v2177_v32 = vadd.f32 %v2176_v44, %v2175_v41 }
 0x2cd   : > { %v2158_v52 = vadd.f32 %v2157_v7, %v2156_v63  ;;  %v2178_v1 = vrot.slane %v2177_v32, 2 }
 0x2cf   : > { %v2159_v54 = vrot.slane %v2158_v52, 1  ;;  %v2179_v56 = vadd.f32 %v2178_v1, %v2177_v32 }
 0x2d1   : > { %v2180_v10 = vrot.slane %v2179_v56, 1  ;;  %v2160_v59 = vadd.f32 %v2159_v54, %v2158_v52 }
 0x2d3   : > { %v2181_v55 = vadd.f32 %v2180_v10, %v2179_v56 }
 0x2d5   : > { %v2182_v18 = vsel %vm543_vm0, %v2160_v59, %v2181_v55 }
 0x2d6   : > { %v2222_v40 = vsel %vm2221_vm13, %v2182_v18, %v2219_v11 }
 0x2d7   : > { %2223 = vst [vmem:[%s467_s19] sm:$0xf] %v2222_v40 }
 0x2d8 PF: > { %s18_s28 = sadd.s32 1, %s2804_s28   ;;  %s4279_s24 = smov %s2796_s26 }
 0x2d9   : > { %p15_p11 = scmp.ge.s32.totalorder %s18_s28, 18   ;;  %s4280_s25 = smov %s2800_s27 }
 0x2da   : > { %s4281_s26 = smov %s4284_s29  ;;  %s4282_s27 = smov %s4288_s30 }
 0x2db   :  { %17 = sbr.rel (!%p15_p11) target bundleno = 3 (0x3), region = 100 }

// kernel: basic_block_forward.4
= control target key start
LH: loop header
LB: loop body
LE: loop exit
PB: predicated region body
PF: predicated region fallthrough
CT: control target
= control target key end

     0   :  { %s4415_s24 = smov 0   ;;  %s4417_s25 = smov 0   ;;  %s6835_s0 = inlined_call_operand.vmem [shape: f32[2,8,8,8,128], index: 0, kind: input, shape index: {}, may-alias: {0,1,2}]   ;;  %s6836_s1 = inlined_call_operand.vmem [shape: f32[2,8,8,8,128], index: 1, kind: input, shape index: {}, may-alias: {0,1,2}]   ;;  %s6837_s2 = inlined_call_operand.vmem [shape: f32[2,8,8,8,128], index: 2, kind: input, shape index: {}, may-alias: {0,1,2}]   ;;  %s6838_s3 = inlined_call_operand.vmem [shape: f32[1,128], index: 3, kind: input, shape index: {}]   ;;  %s6839_s4 = inlined_call_operand.vmem [shape: f32[1,128], index: 4, kind: input, shape index: {}]   ;;  %s6840_s5 = inlined_call_operand.vmem [shape: f32[3456,128], index: 5, kind: input, shape index: {}]   ;;  %s6841_s6 = inlined_call_operand.vmem [shape: f32[2,8,64,128], index: 6, kind: output, shape index: {0}]   ;;  %s6842_s7 = inlined_call_operand.vmem [shape: f32[2,8,2,128], index: 7, kind: output, shape index: {1}]  }
   0x1   :  { %s4419_s26 = smov 0   ;;  %s4421_s27 = smov 0  }
   0x2   :  { %s4423_s28 = smov 0  }
   0x3 LB: > { %s27_s29 = sadd.s32 1, %s4364_s26  ;;  %s30_s30 = sadd.s32 1, %s4368_s27  ;;  %s4372_s28 = sphi %s4423_s28, %s18_s28   ;;  %s4368_s27 = sphi %s4421_s27, %s6889_s27   ;;  %s4364_s26 = sphi %s4419_s26, %s6888_s26   ;;  %s4360_s25 = sphi %s4417_s25, %s6887_s25   ;;  %s4356_s24 = sphi %s4415_s24, %s6886_s24  }
   0x4   : > { %p28_p0 = scmp.ge.s32.totalorder %s27_s29, 8  ;;  %p3207_p1 = scmp.ge.s32.totalorder %s4372_s28, 1 }
   0x5   : > { %p318_p2 = scmp.lt.s32.totalorder %s4372_s28, 17 }
   0x6   : > { %s6891_s29 = smov (%p28_p0, %s27_s29), 0  ;;  %s6893_s30 = smov (!%p28_p0, %s30_s30), %s4368_s27 }
   0x7   : > { %p319_p3 = pnand %p3207_p1, %p318_p2  ;;  %p32_p4 = scmp.ge.s32.totalorder %s6893_s30, 2 }
   0x9   : > { %s6895_s30 = smov (%p32_p4, %s6893_s30), 0  ;;  %322 = sbr.rel (%p319_p3) target bundleno = 608 (0x260), region = 44 }
   0xe   : > { %v1053_v0 = vld [vmem:[%s6840_s5 + $0x578] sm:$0xff]  ;;  %v1052_v4 = vld [vmem:[%s6840_s5 + $0x570] sm:$0xff]  ;;  %v1051_v8 = vld [vmem:[%s6840_s5 + $0x568] sm:$0xff]  ;;  %p393_p5 = scmp.lt.s32.totalorder %s4360_s25, 1  ;;  %p407_p6 = scmp.lt.s32.totalorder %s4356_s24, 7  ;;  %v4374_v42 = vmov 0.0  }
   0xf   : > { %v1085_v1 = vld [vmem:[%s6840_s5 + $0x678] sm:$0xff]  ;;  %3381 = vmatprep.subr.mxu0 %v1053_v0  ;;  %v1084_v5 = vld [vmem:[%s6840_s5 + $0x670] sm:$0xff]  ;;  %v1083_v9 = vld [vmem:[%s6840_s5 + $0x668] sm:$0xff]  ;;  %v4595_v43 = vrot.slane %v4374_v42, 7  ;;  %vm531_vm0 = vcmask 1040384   ;;  %vm722_vm1 = vcmask 1046528  }
  0x10   : > { %v1037_v2 = vld [vmem:[%s6840_s5 + $0x4f8] sm:$0xff]  ;;  %3437 = vmatprep.subr.mxu1 %v1085_v1  ;;  %v1036_v6 = vld [vmem:[%s6840_s5 + $0x4f0] sm:$0xff]  ;;  %v1035_v10 = vld [vmem:[%s6840_s5 + $0x4e8] sm:$0xff]  ;;  %s6897_s25 = smov (!%p393_p5, %s4360_s25), 1  ;;  %vm755_vm2 = vcmask 1045504   ;;  %s5034_s21 = sadd.s32 4294967295, %s4356_s24 }
  0x11   : > { %v1069_v3 = vld [vmem:[%s6840_s5 + $0x5f8] sm:$0xff]  ;;  %3382 = vmatpush3.msra.mxu0 %v1037_v2  ;;  %v1068_v7 = vld [vmem:[%s6840_s5 + $0x5f0] sm:$0xff]  ;;  %v1067_v11 = vld [vmem:[%s6840_s5 + $0x5e8] sm:$0xff]  ;;  %s4519_s16 = scalar_select %p407_p6, %s4356_s24, 7  ;;  %v532_v53 = vsel %vm531_vm0, 0.0, %v4595_v43  ;;  %v541_v54 = vsel %vm531_vm0, %v4595_v43, 0.0 }
  0x12   : > { %3438 = vmatpush3.msra.mxu1 %v1069_v3  ;;  %3383 = vmatprep.subr.mxu0 %v1052_v4  ;;  %v1050_v12 = vld [vmem:[%s6840_s5 + $0x560] sm:$0xff]  ;;  %v1049_v16 = vld [vmem:[%s6840_s5 + $0x558] sm:$0xff]  ;;  %v1048_v20 = vld [vmem:[%s6840_s5 + $0x550] sm:$0xff]  ;;  %s4540_s13 = sshll.u32 %s6897_s25, 6  ;;  %v723_v1 = vrot.slane %v532_v53, 1  ;;  %v724_v2 = vrot.slane %v541_v54, 1 }
  0x13   : > { %3439 = vmatprep.subr.mxu1 %v1084_v5  ;;  %3384 = vmatpush3.msra.mxu0 %v1036_v6  ;;  %v1082_v13 = vld [vmem:[%s6840_s5 + $0x660] sm:$0xff]  ;;  %v1081_v17 = vld [vmem:[%s6840_s5 + $0x658] sm:$0xff]  ;;  %v1080_v21 = vld [vmem:[%s6840_s5 + $0x650] sm:$0xff]  ;;  %s3217_s14 = sshll.u32 %s4519_s16, 3  ;;  %p391_p7 = scmp.gt.s32.totalorder %s5034_s21, 0 }
  0x14   : > { %3440 = vmatpush3.msra.mxu1 %v1068_v7  ;;  %3385 = vmatprep.subr.mxu0 %v1051_v8  ;;  %v1034_v14 = vld [vmem:[%s6840_s5 + $0x4e0] sm:$0xff]  ;;  %v1033_v18 = vld [vmem:[%s6840_s5 + $0x4d8] sm:$0xff]  ;;  %v1032_v22 = vld [vmem:[%s6840_s5 + $0x4d0] sm:$0xff]  ;;  %s4562_s12 = sadd.s32 %s3217_s14, %s4540_s13  ;;  %v756_v7 = vrot.slane %v532_v53, 2  ;;  %v757_v8 = vrot.slane %v541_v54, 2  ;;  %p3209_p8 = scmp.lt.s32.totalorder %s5034_s21, 7 }
  0x15   : > { %3441 = vmatprep.subr.mxu1 %v1083_v9  ;;  %v1066_v15 = vld [vmem:[%s6840_s5 + $0x5e0] sm:$0xff]  ;;  %3386 = vmatpush3.msra.mxu0 %v1035_v10  ;;  %v1065_v19 = vld [vmem:[%s6840_s5 + $0x5d8] sm:$0xff]  ;;  %v1064_v23 = vld [vmem:[%s6840_s5 + $0x5d0] sm:$0xff]  ;;  %s3219_s11 = sshll.u32 %s4562_s12, 3  ;;  %p456_p9 = scmp.gt.s32.totalorder %s4356_s24, 0 }
  0x16   : > { %3442 = vmatpush3.msra.mxu1 %v1067_v11  ;;  %3387 = vmatprep.subr.mxu0 %v1050_v12  ;;  %v1047_v24 = vld [vmem:[%s6840_s5 + $0x548] sm:$0xff]  ;;  %v1046_v28 = vld [vmem:[%s6840_s5 + $0x540] sm:$0xff]  ;;  %v1045_v32 = vld [vmem:[%s6840_s5 + $0x538] sm:$0xff]  ;;  %s4608_s18 = scalar_lea.vmem %s6836_s1, %s3219_s11  ;;  %s3229_s12 = sshll.u32 %s6897_s25, 3 }
  0x17   : > { %3443 = vmatprep.subr.mxu1 %v1082_v13  ;;  %3388 = vmatpush3.msra.mxu0 %v1034_v14  ;;  %v1079_v25 = vld [vmem:[%s6840_s5 + $0x648] sm:$0xff]  ;;  %v1078_v29 = vld [vmem:[%s6840_s5 + $0x640] sm:$0xff]  ;;  %v1077_v33 = vld [vmem:[%s6840_s5 + $0x638] sm:$0xff]  ;;  %s392_s15 = scalar_select %p391_p7, %s5034_s21, 0 }
  0x18   : > { %3444 = vmatpush3.msra.mxu1 %v1066_v15  ;;  %3389 = vmatprep.subr.mxu0 %v1049_v16  ;;  %v1031_v26 = vld [vmem:[%s6840_s5 + $0x4c8] sm:$0xff]  ;;  %v1030_v30 = vld [vmem:[%s6840_s5 + $0x4c0] sm:$0xff]  ;;  %v1029_v34 = vld [vmem:[%s6840_s5 + $0x4b8] sm:$0xff]  ;;  %s5167_s19 = scalar_select %p456_p9, 1, 0 }
  0x19   : > { %3445 = vmatprep.subr.mxu1 %v1081_v17  ;;  %3390 = vmatpush3.msra.mxu0 %v1033_v18  ;;  %v1063_v27 = vld [vmem:[%s6840_s5 + $0x5c8] sm:$0xff]  ;;  %v1062_v31 = vld [vmem:[%s6840_s5 + $0x5c0] sm:$0xff]  ;;  %v1061_v35 = vld [vmem:[%s6840_s5 + $0x5b8] sm:$0xff]  ;;  %v4690_v18 = vsel %vm722_vm1, %v723_v1, %v724_v2  ;;  %s6899_s15 = smov (!%p3209_p8, %s392_s15), 7 }
  0x1a   : > { %3446 = vmatpush3.msra.mxu1 %v1065_v19  ;;  %3391 = vmatprep.subr.mxu0 %v1048_v20  ;;  %v1044_v36 = vld [vmem:[%s6840_s5 + $0x530] sm:$0xff]  ;;  %v1043_v40 = vld [vmem:[%s6840_s5 + $0x528] sm:$0xff]  ;;  %v1042_v46 = vld [vmem:[%s6840_s5 + $0x520] sm:$0xff]  ;;  %s3214_s14 = sshll.u32 %s6899_s15, 3 }
  0x1b   : > { %3447 = vmatprep.subr.mxu1 %v1080_v21  ;;  %3392 = vmatpush3.msra.mxu0 %v1032_v22  ;;  %v1076_v37 = vld [vmem:[%s6840_s5 + $0x630] sm:$0xff]  ;;  %v1075_v41 = vld [vmem:[%s6840_s5 + $0x628] sm:$0xff]  ;;  %v1074_v47 = vld [vmem:[%s6840_s5 + $0x620] sm:$0xff]  ;;  %s399_s15 = sadd.s32 %s4540_s13, %s3214_s14 }
  0x1c   : > { %3448 = vmatpush3.msra.mxu1 %v1064_v23  ;;  %3393 = vmatprep.subr.mxu0 %v1047_v24  ;;  %v1028_v38 = vld [vmem:[%s6840_s5 + $0x4b0] sm:$0xff]  ;;  %v1027_v44 = vld [vmem:[%s6840_s5 + $0x4a8] sm:$0xff]  ;;  %v1026_v48 = vld [vmem:[%s6840_s5 + $0x4a0] sm:$0xff]  ;;  %v4701_v23 = vsel %vm755_vm2, %v756_v7, %v757_v8  ;;  %s3216_s14 = sshll.u32 %s399_s15, 3 }
  0x1d   : > { %3449 = vmatprep.subr.mxu1 %v1079_v25  ;;  %3394 = vmatpush3.msra.mxu0 %v1031_v26  ;;  %v1060_v39 = vld [vmem:[%s6840_s5 + $0x5b0] sm:$0xff]  ;;  %v1059_v45 = vld [vmem:[%s6840_s5 + $0x5a8] sm:$0xff]  ;;  %v1058_v49 = vld [vmem:[%s6840_s5 + $0x5a0] sm:$0xff]  ;;  %s6071_s21 = scalar_select %p407_p6, 1, 0 }
  0x1e   : > { %3450 = vmatpush3.msra.mxu1 %v1063_v27  ;;  %3395 = vmatprep.subr.mxu0 %v1046_v28  ;;  %v1041_v50 = vld [vmem:[%s6840_s5 + $0x518] sm:$0xff]  ;;  %v4628_v51 = vld [vmem:[%s6838_s3] ss:$0 sm:$0xff]  ;;  %v1040_v60 = vld [vmem:[%s6840_s5 + $0x510] sm:$0xff] }
  0x1f   : > { %3451 = vmatprep.subr.mxu1 %v1078_v29  ;;  %3396 = vmatpush3.msra.mxu0 %v1030_v30  ;;  %v1073_v52 = vld [vmem:[%s6840_s5 + $0x618] sm:$0xff]  ;;  %v4640_v55 = vld [vmem:[%s6839_s4] ss:$0 sm:$0xff]  ;;  %v1072_v61 = vld [vmem:[%s6840_s5 + $0x610] sm:$0xff] }
  0x20   : > { %3452 = vmatpush3.msra.mxu1 %v1062_v31  ;;  %3397 = vmatprep.subr.mxu0 %v1045_v32  ;;  %v550_v56 = vld [vmem:[%s4608_s18] sm:$0xff]  ;;  %v1025_v57 = vld [vmem:[%s6840_s5 + $0x498] sm:$0xff]  ;;  %v551_v62 = vld [vmem:[%s4608_s18 + $0x8] sm:$0xff] }
  0x21   : > { %3453 = vmatprep.subr.mxu1 %v1077_v33  ;;  %3398 = vmatpush3.msra.mxu0 %v1029_v34  ;;  %v1057_v58 = vld [vmem:[%s6840_s5 + $0x598] sm:$0xff]  ;;  %v558_v59 = vmul.f32 %v4628_v51, %v550_v56  ;;  %v1024_v63 = vld [vmem:[%s6840_s5 + $0x490] sm:$0xff]  ;;  %v559_v4 = vmul.f32 %v4628_v51, %v551_v62  ;;  %v1039_v5 = vld [vmem:[%s6840_s5 + $0x508] sm:$0xff] }
  0x22   : > { %3454 = vmatpush3.msra.mxu1 %v1061_v35  ;;  %3399 = vmatprep.subr.mxu0 %v1044_v36  ;;  %v1056_v0 = vld [vmem:[%s6840_s5 + $0x590] sm:$0xff]  ;;  %v1071_v6 = vld [vmem:[%s6840_s5 + $0x608] sm:$0xff]  ;;  %v1038_v14 = vld [vmem:[%s6840_s5 + $0x500] sm:$0xff] }
  0x23   : > { %3455 = vmatprep.subr.mxu1 %v1076_v37  ;;  %3400 = vmatpush3.msra.mxu0 %v1028_v38  ;;  %v566_v3 = vadd.f32 %v4640_v55, %v558_v59  ;;  %v1023_v9 = vld [vmem:[%s6840_s5 + $0x488] sm:$0xff]  ;;  %v567_v12 = vadd.f32 %v4640_v55, %v559_v4  ;;  %v552_v13 = vld [vmem:[%s4608_s18 + $0x10] sm:$0xff]  ;;  %v1070_v15 = vld [vmem:[%s6840_s5 + $0x600] sm:$0xff] }
  0x24   : > { %3456 = vmatpush3.msra.mxu1 %v1060_v39  ;;  %3401 = vmatprep.subr.mxu0 %v1043_v40  ;;  %v1055_v10 = vld [vmem:[%s6840_s5 + $0x588] sm:$0xff]  ;;  %v560_v16 = vmul.f32 %v4628_v51, %v552_v13  ;;  %v1022_v17 = vld [vmem:[%s6840_s5 + $0x480] sm:$0xff]  ;;  %vm4696_vm3 = vmneg %vm531_vm0 }
  0x25   : > { %3457 = vmatprep.subr.mxu1 %v1075_v41  ;;  %3402 = vmatpush3.msra.mxu0 %v1027_v44  ;;  %v574_v11 = vmax.f32 %v566_v3, 0.0  ;;  %v575_v20 = vmax.f32 %v567_v12, 0.0  ;;  %v1054_v21 = vld [vmem:[%s6840_s5 + $0x580] sm:$0xff]  ;;  %v553_v25 = vld [vmem:[%s4608_s18 + $0x18] sm:$0xff]  ;;  %v1116_v39 = vld [vmem:[%s6840_s5 + $0x770] sm:$0xff] }
  0x26   : > { %3458 = vmatpush3.msra.mxu1 %v1059_v45  ;;  %3403 = vmatprep.subr.mxu0 %v1042_v46  ;;  %v568_v24 = vadd.f32 %v4640_v55, %v560_v16  ;;  %v561_v29 = vmul.f32 %v4628_v51, %v553_v25  ;;  %v1117_v30 = vld [vmem:[%s6840_s5 + $0x778] sm:$0xff]  ;;  %v1148_v40 = vld [vmem:[%s6840_s5 + $0x870] sm:$0xff]  ;;  %v554_v45 = vld [vmem:[%s4608_s18 + $0x20] sm:$0xff] }
  0x27   : > { %3459 = vmatprep.subr.mxu1 %v1074_v47  ;;  %3404 = vmatpush3.msra.mxu0 %v1026_v48  ;;  %v590_v19 = vrot.slane %v574_v11, 7  ;;  %v4707_v28 = vrot.slane %v575_v20, 7  ;;  %v1149_v31 = vld [vmem:[%s6840_s5 + $0x878] sm:$0xff]  ;;  %v1100_v47 = vld [vmem:[%s6840_s5 + $0x6f0] sm:$0xff]  ;;  %v1115_v56 = vld [vmem:[%s6840_s5 + $0x768] sm:$0xff] }
  0x28   : > { %3460 = vmatpush3.msra.mxu1 %v1058_v49  ;;  %3405 = vmatprep.subr.mxu0 %v1041_v50  ;;  %v1101_v34 = vld [vmem:[%s6840_s5 + $0x6f8] sm:$0xff]  ;;  %v576_v38 = vmax.f32 %v568_v24, 0.0  ;;  %v569_v44 = vadd.f32 %v4640_v55, %v561_v29  ;;  %v1132_v48 = vld [vmem:[%s6840_s5 + $0x7f0] sm:$0xff]  ;;  %v562_v50 = vmul.f32 %v4628_v51, %v554_v45  ;;  %v1099_v59 = vld [vmem:[%s6840_s5 + $0x6e8] sm:$0xff] }
  0x29   : > { %3461 = vmatprep.subr.mxu1 %v1073_v52  ;;  %3406 = vmatpush3.msra.mxu0 %v1025_v57  ;;  %v606_v26 = vsel %vm531_vm0, 0.0, %v590_v19  ;;  %v614_v27 = vsel %vm531_vm0, %v590_v19, 0.0  ;;  %v1133_v35 = vld [vmem:[%s6840_s5 + $0x7f8] sm:$0xff]  ;;  %v607_v41 = vsel %vm531_vm0, 0.0, %v4707_v28  ;;  %v615_v42 = vsel %vm531_vm0, %v4707_v28, 0.0  ;;  %v1147_v57 = vld [vmem:[%s6840_s5 + $0x868] sm:$0xff] }
  0x2a   : > { %3462 = vmatpush3.msra.mxu1 %v1057_v58  ;;  %3407 = vmatprep.subr.mxu0 %v1040_v60  ;;  %v956_v32 = vrot.slane %v606_v26, 1  ;;  %v957_v33 = vrot.slane %v614_v27, 1  ;;  %v984_v36 = vrot.slane %v606_v26, 2  ;;  %v985_v37 = vrot.slane %v614_v27, 2  ;;  %v1131_v60 = vld [vmem:[%s6840_s5 + $0x7e8] sm:$0xff]  ;;  %v1146_v1 = vld [vmem:[%s6840_s5 + $0x860] sm:$0xff] }
  0x2b   : > { %3463 = vmatprep.subr.mxu1 %v1072_v61  ;;  %3408 = vmatpush3.msra.mxu0 %v1024_v63  ;;  %v4750_v49 = vrot.slane %v576_v38, 7  ;;  %v959_v53 = vrot.slane %v607_v41, 1  ;;  %v960_v54 = vrot.slane %v615_v42, 1  ;;  %v577_v58 = vmax.f32 %v569_v44, 0.0  ;;  %v555_v63 = vld [vmem:[%s4608_s18 + $0x28] sm:$0xff]  ;;  %v1130_v7 = vld [vmem:[%s6840_s5 + $0x7e0] sm:$0xff] }
  0x2c   : > { %3464 = vmatpush3.msra.mxu1 %v1056_v0  ;;  %3409 = vmatprep.subr.mxu0 %v1039_v5  ;;  %v4742_v46 = vsel %vm722_vm1, %v956_v32, %v957_v33  ;;  %v4754_v52 = vsel %vm755_vm2, %v984_v36, %v985_v37  ;;  %v987_v61 = vrot.slane %v607_v41, 2  ;;  %v988_v62 = vrot.slane %v615_v42, 2  ;;  %v1114_v0 = vld [vmem:[%s6840_s5 + $0x760] sm:$0xff]  ;;  %v1113_v13 = vld [vmem:[%s6840_s5 + $0x758] sm:$0xff]  ;;  %v1112_v24 = vld [vmem:[%s6840_s5 + $0x750] sm:$0xff] }
  0x2d   : > { %3465 = vmatprep.subr.mxu1 %v1071_v6  ;;  %3410 = vmatpush3.msra.mxu0 %v1023_v9  ;;  %v608_v2 = vsel %vm531_vm0, 0.0, %v4750_v49  ;;  %v616_v3 = vsel %vm531_vm0, %v4750_v49, 0.0  ;;  %v570_v4 = vadd.f32 %v4640_v55, %v562_v50  ;;  %v4788_v5 = vsel %vm722_vm1, %v959_v53, %v960_v54  ;;  %v1098_v6 = vld [vmem:[%s6840_s5 + $0x6e0] sm:$0xff]  ;;  %v1097_v16 = vld [vmem:[%s6840_s5 + $0x6d8] sm:$0xff]  ;;  %v1144_v25 = vld [vmem:[%s6840_s5 + $0x850] sm:$0xff] }
  0x2e   : > { %3466 = vmatpush3.msra.mxu1 %v1055_v10  ;;  %3411 = vmatprep.subr.mxu0 %v1038_v14  ;;  %v4796_v8 = vrot.slane %v577_v58, 7  ;;  %v563_v9 = vmul.f32 %v4628_v51, %v555_v63  ;;  %v4800_v10 = vsel %vm755_vm2, %v987_v61, %v988_v62  ;;  %v962_v11 = vrot.slane %v608_v2, 1  ;;  %v1145_v14 = vld [vmem:[%s6840_s5 + $0x858] sm:$0xff]  ;;  %v1128_v32 = vld [vmem:[%s6840_s5 + $0x7d0] sm:$0xff]  ;;  %v1111_v38 = vld [vmem:[%s6840_s5 + $0x748] sm:$0xff] }
  0x2f   : > { %3467 = vmatprep.subr.mxu1 %v1070_v15  ;;  %3412 = vmatpush3.msra.mxu0 %v1022_v17  ;;  %v963_v12 = vrot.slane %v616_v3, 1  ;;  %v578_v15 = vmax.f32 %v570_v4, 0.0  ;;  %v1129_v17 = vld [vmem:[%s6840_s5 + $0x7d8] sm:$0xff]  ;;  %v991_v20 = vrot.slane %v616_v3, 2  ;;  %v1095_v41 = vld [vmem:[%s6840_s5 + $0x6c8] sm:$0xff]  ;;  %v1126_v58 = vld [vmem:[%s6840_s5 + $0x7c0] sm:$0xff] }
  0x30   : > { %1230 = vmatprep.mubr.f32.mxu0 %v4690_v18  ;;  %3468 = vmatpush3.msra.mxu1 %v1054_v21  ;;  %v556_v21 = vld [vmem:[%s4608_s18 + $0x30] sm:$0xff]  ;;  %v609_v26 = vsel %vm531_vm0, 0.0, %v4796_v8  ;;  %v617_v27 = vsel %vm531_vm0, %v4796_v8, 0.0  ;;  %v571_v29 = vadd.f32 %v4640_v55, %v563_v9  ;;  %v1127_v42 = vld [vmem:[%s6840_s5 + $0x7c8] sm:$0xff]  ;;  %v557_v63 = vld [vmem:[%s4608_s18 + $0x38] sm:$0xff]  ;;  %s5150_s18 = scalar_lea.vmem %s6835_s0, %s3216_s14  ;;  %s414_s14 = sadd.s32 1, %s4356_s24 }
  0x31   : > { %3250 = vmatprep.mubr.msk.f32.mxu1 %vm4696_vm3, %v590_v19  ;;  %3234 = vmatmul.mubr.msk.f32.vlgmr.msra.gmra.mxu0 %vm4696_vm3, %v4595_v43  ;;  %v4843_v33 = vrot.slane %v578_v15, 7  ;;  %v965_v36 = vrot.slane %v609_v26, 1  ;;  %v966_v37 = vrot.slane %v617_v27, 1  ;;  %v993_v44 = vrot.slane %v609_v26, 2  ;;  %v1093_v3 = vld [vmem:[%s6840_s5 + $0x6b8] sm:$0xff]  ;;  %v1108_v9 = vld [vmem:[%s6840_s5 + $0x730] sm:$0xff] }
  0x32   : > { %1336 = vmatmul.mubr.f32.vlgmr.msra.gmra.mxu1 %v4701_v23  ;;  %3493 = vmatprep.subr.mxu0 %v1117_v30  ;;  %v4835_v30 = vsel %vm722_vm1, %v962_v11, %v963_v12  ;;  %v994_v45 = vrot.slane %v617_v27, 2  ;;  %v1125_v4 = vld [vmem:[%s6840_s5 + $0x7b8] sm:$0xff]  ;;  %v1140_v11 = vld [vmem:[%s6840_s5 + $0x830] sm:$0xff]  ;;  %v1139_v26 = vld [vmem:[%s6840_s5 + $0x828] sm:$0xff]  ;;  %p5890_p10 = scmp.lt.s32.totalorder %s414_s14, 7 }
  0x33   : > { %3549 = vmatprep.subr.mxu1 %v1149_v31  ;;  %3494 = vmatpush3.msra.mxu0 %v1101_v34  ;;  %v1096_v31 = vld [vmem:[%s6840_s5 + $0x6d0] sm:$0xff]  ;;  %v564_v34 = vmul.f32 %v4628_v51, %v556_v21  ;;  %v610_v50 = vsel %vm531_vm0, 0.0, %v4843_v33  ;;  %v618_v53 = vsel %vm531_vm0, %v4843_v33, 0.0 }
  0x34   : > { %3550 = vmatpush3.msra.mxu1 %v1133_v35  ;;  %3495 = vmatprep.subr.mxu0 %v1116_v39  ;;  %v1143_v39 = vld [vmem:[%s6840_s5 + $0x848] sm:$0xff]  ;;  %v968_v61 = vrot.slane %v610_v50, 1  ;;  %v969_v62 = vrot.slane %v618_v53, 1  ;;  %s6901_s14 = smov (!%p5890_p10, %s414_s14), 7 }
  0x35   : > { %3551 = vmatprep.subr.mxu1 %v1148_v40  ;;  %1235 = vmatprep.mubr.f32.mxu0 %v4742_v46  ;;  %v579_v40 = vmax.f32 %v571_v29, 0.0  ;;  %v572_v54 = vadd.f32 %v4640_v55, %v564_v34  ;;  %v1091_v29 = vld [vmem:[%s6840_s5 + $0x6a8] sm:$0xff]  ;;  %s6903_s14 = smov (!%p5890_p10, %s6901_s14), 7 }
  0x36   : > { %3252 = vmatprep.mubr.msk.f32.mxu1 %vm4696_vm3, %v4707_v28  ;;  %3496 = vmatpush3.msra.mxu0 %v1100_v47  ;;  %v1110_v47 = vld [vmem:[%s6840_s5 + $0x740] sm:$0xff]  ;;  %v4927_v15 = vsel %vm722_vm1, %v968_v61, %v969_v62  ;;  %v1104_v62 = vld [vmem:[%s6840_s5 + $0x710] sm:$0xff]  ;;  %s5959_s23 = sshll.u32 %s6903_s14, 3 }
  0x37   : > { %3552 = vmatpush3.msra.mxu1 %v1132_v48  ;;  %3236 = vmatmul.mubr.msk.f32.gmra.mxu0 %vm4696_vm3, %v590_v19  ;;  %v990_v19 = vrot.slane %v608_v2, 2  ;;  %v1142_v48 = vld [vmem:[%s6840_s5 + $0x840] sm:$0xff]  ;;  %v580_v2 = vmax.f32 %v572_v54, 0.0  ;;  %v1089_v54 = vld [vmem:[%s6840_s5 + $0x698] sm:$0xff]  ;;  %s423_s15 = sadd.s32 %s5959_s23, %s4540_s13 }
  0x38   : > { %1341 = vmatmul.mubr.f32.gmra.mxu1 %v4754_v52  ;;  %3497 = vmatprep.subr.mxu0 %v1115_v56  ;;  %v4881_v56 = vsel %vm722_vm1, %v965_v36, %v966_v37  ;;  %v1106_v36 = vld [vmem:[%s6840_s5 + $0x720] sm:$0xff] }
  0x39   : > { %3553 = vmatprep.subr.mxu1 %v1147_v57  ;;  %3498 = vmatpush3.msra.mxu0 %v1099_v59  ;;  %v4847_v35 = vsel %vm755_vm2, %v990_v19, %v991_v20  ;;  %v1094_v57 = vld [vmem:[%s6840_s5 + $0x6c0] sm:$0xff]  ;;  %v4889_v59 = vrot.slane %v579_v40, 7  ;;  %v4935_v19 = vrot.slane %v580_v2, 7  ;;  %v1088_v2 = vld [vmem:[%s6840_s5 + $0x690] sm:$0xff] }
  0x3a   : > { %3554 = vmatpush3.msra.mxu1 %v1131_v60  ;;  %3499 = vmatprep.subr.mxu0 %v1114_v0  ;;  %v4892_v60 = vsel %vm755_vm2, %v993_v44, %v994_v45  ;;  %v1109_v0 = vld [vmem:[%s6840_s5 + $0x738] sm:$0xff]  ;;  %v1138_v37 = vld [vmem:[%s6840_s5 + $0x820] sm:$0xff] }
  0x3b   : > { %3555 = vmatprep.subr.mxu1 %v1146_v1  ;;  %1240 = vmatprep.mubr.f32.mxu0 %v4788_v5  ;;  %v1141_v1 = vld [vmem:[%s6840_s5 + $0x838] sm:$0xff]  ;;  %v611_v12 = vsel %vm531_vm0, 0.0, %v4889_v59 }
  0x3c   : > { %3254 = vmatprep.mubr.msk.f32.mxu1 %vm4696_vm3, %v4750_v49  ;;  %3500 = vmatpush3.msra.mxu0 %v1098_v6  ;;  %v996_v6 = vrot.slane %v610_v50, 2  ;;  %v971_v21 = vrot.slane %v611_v12, 1  ;;  %v1105_v50 = vld [vmem:[%s6840_s5 + $0x718] sm:$0xff] }
  0x3d   : > { %3556 = vmatpush3.msra.mxu1 %v1130_v7  ;;  %3238 = vmatmul.mubr.msk.f32.gmra.mxu0 %vm4696_vm3, %v4707_v28  ;;  %v997_v7 = vrot.slane %v618_v53, 2  ;;  %v1137_v53 = vld [vmem:[%s6840_s5 + $0x818] sm:$0xff] }
  0x3e   : > { %1346 = vmatmul.mubr.f32.gmra.mxu1 %v4800_v10  ;;  %3501 = vmatprep.subr.mxu0 %v1113_v13  ;;  %v619_v13 = vsel %vm531_vm0, %v4889_v59, 0.0 }
  0x3f   : > { %3557 = vmatprep.subr.mxu1 %v1145_v14  ;;  %3502 = vmatpush3.msra.mxu0 %v1097_v16  ;;  %v565_v14 = vmul.f32 %v4628_v51, %v557_v63  ;;  %v1092_v16 = vld [vmem:[%s6840_s5 + $0x6b0] sm:$0xff]  ;;  %v4938_v20 = vsel %vm755_vm2, %v996_v6, %v997_v7  ;;  %v1000_v34 = vrot.slane %v619_v13, 2  ;;  %v1103_v6 = vld [vmem:[%s6840_s5 + $0x708] sm:$0xff] }
  0x40   : > { %3558 = vmatpush3.msra.mxu1 %v1129_v17  ;;  %3503 = vmatprep.subr.mxu0 %v1112_v24  ;;  %v1124_v17 = vld [vmem:[%s6840_s5 + $0x7b0] sm:$0xff]  ;;  %v972_v24 = vrot.slane %v619_v13, 1  ;;  %v1135_v7 = vld [vmem:[%s6840_s5 + $0x808] sm:$0xff]  ;;  %v1134_v13 = vld [vmem:[%s6840_s5 + $0x800] sm:$0xff] }
  0x41   : > { %3559 = vmatprep.subr.mxu1 %v1144_v25  ;;  %1245 = vmatprep.mubr.f32.mxu0 %v4835_v30  ;;  %v1107_v25 = vld [vmem:[%s6840_s5 + $0x728] sm:$0xff]  ;;  %v573_v27 = vadd.f32 %v4640_v55, %v565_v14  ;;  %v1136_v63 = vld [vmem:[%s6840_s5 + $0x810] sm:$0xff]  ;;  %v1086_v14 = vld [vmem:[%s6840_s5 + $0x680] sm:$0xff] }
  0x42   : > { %3256 = vmatprep.mubr.msk.f32.mxu1 %vm4696_vm3, %v4796_v8  ;;  %3504 = vmatpush3.msra.mxu0 %v1096_v31  ;;  %v1123_v31 = vld [vmem:[%s6840_s5 + $0x7a8] sm:$0xff]  ;;  %v4972_v40 = vsel %vm722_vm1, %v971_v21, %v972_v24  ;;  %v829_v21 = vld [vmem:[%s6840_s5 + $0xf8] sm:$0xff] }
  0x43   : > { %3560 = vmatpush3.msra.mxu1 %v1128_v32  ;;  %3240 = vmatmul.mubr.msk.f32.gmra.mxu0 %vm4696_vm3, %v4750_v49  ;;  %v999_v32 = vrot.slane %v611_v12, 2  ;;  %v581_v44 = vmax.f32 %v573_v27, 0.0  ;;  %v1102_v12 = vld [vmem:[%s6840_s5 + $0x700] sm:$0xff]  ;;  %v813_v24 = vld [vmem:[%s6840_s5 + $0x78] sm:$0xff]  ;;  %v811_v27 = vld [vmem:[%s6840_s5 + $0x68] sm:$0xff] }
  0x44   : > { %1351 = vmatmul.mubr.f32.gmra.mxu1 %v4847_v35  ;;  %3505 = vmatprep.subr.mxu0 %v1111_v38  ;;  %v612_v38 = vsel %vm531_vm0, 0.0, %v4935_v19 }
  0x45   : > { %3561 = vmatprep.subr.mxu1 %v1143_v39  ;;  %3506 = vmatpush3.msra.mxu0 %v1095_v41  ;;  %v620_v39 = vsel %vm531_vm0, %v4935_v19, 0.0  ;;  %v1090_v41 = vld [vmem:[%s6840_s5 + $0x6a0] sm:$0xff]  ;;  %v4981_v45 = vsel %vm755_vm2, %v999_v32, %v1000_v34  ;;  %v825_v32 = vld [vmem:[%s6840_s5 + $0xd8] sm:$0xff] }
  0x46   : > { %3562 = vmatpush3.msra.mxu1 %v1127_v42  ;;  %3507 = vmatprep.subr.mxu0 %v1110_v47  ;;  %v1122_v42 = vld [vmem:[%s6840_s5 + $0x7a0] sm:$0xff]  ;;  %v974_v47 = vrot.slane %v612_v38, 1  ;;  %v1003_v61 = vrot.slane %v620_v39, 2  ;;  %v809_v34 = vld [vmem:[%s6840_s5 + $0x58] sm:$0xff] }
  0x47   : > { %3563 = vmatprep.subr.mxu1 %v1142_v48  ;;  %1250 = vmatprep.mubr.f32.mxu0 %v4881_v56  ;;  %v975_v48 = vrot.slane %v620_v39, 1  ;;  %v807_v39 = vld [vmem:[%s6840_s5 + $0x48] sm:$0xff] }
  0x48   : > { %3258 = vmatprep.mubr.msk.f32.mxu1 %vm4696_vm3, %v4843_v33  ;;  %3508 = vmatpush3.msra.mxu0 %v1094_v57  ;;  %v1121_v57 = vld [vmem:[%s6840_s5 + $0x798] sm:$0xff] }
  0x49   : > { %3564 = vmatpush3.msra.mxu1 %v1126_v58  ;;  %3242 = vmatmul.mubr.msk.f32.gmra.mxu0 %vm4696_vm3, %v4796_v8  ;;  %v1002_v58 = vrot.slane %v612_v38, 2  ;;  %v823_v38 = vld [vmem:[%s6840_s5 + $0xc8] sm:$0xff] }
  0x4a   : > { %1356 = vmatmul.mubr.f32.gmra.mxu1 %v4892_v60  ;;  %3509 = vmatprep.subr.mxu0 %v1109_v0  ;;  %v5009_v0 = vrot.slane %v581_v44, 7  ;;  %v455_v44 = vld [vmem:[%s5150_s18 + $0x38] sm:$0xff] }
  0x4b   : > { %3565 = vmatprep.subr.mxu1 %v1141_v1  ;;  %3510 = vmatpush3.msra.mxu0 %v1093_v3  ;;  %v5012_v1 = vsel %vm722_vm1, %v974_v47, %v975_v48  ;;  %v1120_v3 = vld [vmem:[%s6840_s5 + $0x790] sm:$0xff]  ;;  %v470_v47 = vmul.f32 %v4628_v51, %v455_v44  ;;  %v1157_v48 = vld [vmem:[%s6840_s5 + $0x8b8] sm:$0xff]  ;;  %v814_v44 = vld [vmem:[%s6840_s5 + $0x80] sm:$0xff] }
  0x4c   : > { %3566 = vmatpush3.msra.mxu1 %v1125_v4  ;;  %3511 = vmatprep.subr.mxu0 %v1108_v9  ;;  %v5021_v4 = vsel %vm755_vm2, %v1002_v58, %v1003_v61  ;;  %v1087_v9 = vld [vmem:[%s6840_s5 + $0x688] sm:$0xff]  ;;  %v1156_v61 = vld [vmem:[%s6840_s5 + $0x8b0] sm:$0xff] }
  0x4d   : > { %3567 = vmatprep.subr.mxu1 %v1140_v11  ;;  %1255 = vmatprep.mubr.f32.mxu0 %v4927_v15  ;;  %v1119_v11 = vld [vmem:[%s6840_s5 + $0x788] sm:$0xff]  ;;  %v484_v58 = vadd.f32 %v4640_v55, %v470_v47 }
  0x4e   : > { %3260 = vmatprep.mubr.msk.f32.mxu1 %vm4696_vm3, %v4889_v59  ;;  %3512 = vmatpush3.msra.mxu0 %v1092_v16  ;;  %v1118_v16 = vld [vmem:[%s6840_s5 + $0x780] sm:$0xff] }
  0x4f   : > { %3568 = vmatpush3.msra.mxu1 %v1124_v17  ;;  %3244 = vmatmul.mubr.msk.f32.gmra.mxu0 %vm4696_vm3, %v4843_v33  ;;  %v1165_v17 = vld [vmem:[%s6840_s5 + $0x8f8] sm:$0xff] }
  0x50   : > { %1361 = vmatmul.mubr.f32.gmra.mxu1 %v4938_v20  ;;  %3513 = vmatprep.subr.mxu0 %v1107_v25  ;;  %v828_v25 = vld [vmem:[%s6840_s5 + $0xf0] sm:$0xff] }
  0x51   : > { %3569 = vmatprep.subr.mxu1 %v1139_v26  ;;  %3514 = vmatpush3.msra.mxu0 %v1091_v29  ;;  %v827_v26 = vld [vmem:[%s6840_s5 + $0xe8] sm:$0xff]  ;;  %v1162_v29 = vld [vmem:[%s6840_s5 + $0x8e0] sm:$0xff] }
  0x52   : > { %3570 = vmatpush3.msra.mxu1 %v1123_v31  ;;  %3515 = vmatprep.subr.mxu0 %v1106_v36  ;;  %v826_v31 = vld [vmem:[%s6840_s5 + $0xe0] sm:$0xff]  ;;  %v1160_v36 = vld [vmem:[%s6840_s5 + $0x8d0] sm:$0xff] }
  0x53   : > { %3571 = vmatprep.subr.mxu1 %v1138_v37  ;;  %1260 = vmatprep.mubr.f32.mxu0 %v4972_v40  ;;  %v824_v37 = vld [vmem:[%s6840_s5 + $0xd0] sm:$0xff] }
  0x54   : > { %3262 = vmatprep.mubr.msk.f32.mxu1 %vm4696_vm3, %v4935_v19  ;;  %3516 = vmatpush3.msra.mxu0 %v1090_v41  ;;  %v1158_v41 = vld [vmem:[%s6840_s5 + $0x8c0] sm:$0xff] }
  0x55   : > { %3572 = vmatpush3.msra.mxu1 %v1122_v42  ;;  %3246 = vmatmul.mubr.msk.f32.gmra.mxu0 %vm4696_vm3, %v4889_v59  ;;  %v822_v42 = vld [vmem:[%s6840_s5 + $0xc0] sm:$0xff] }
  0x56   : > { %1366 = vmatmul.mubr.f32.gmra.mxu1 %v4981_v45  ;;  %3517 = vmatprep.subr.mxu0 %v1105_v50  ;;  %v821_v50 = vld [vmem:[%s6840_s5 + $0xb8] sm:$0xff] }
  0x57   : > { %3573 = vmatprep.subr.mxu1 %v1137_v53  ;;  %3518 = vmatpush3.msra.mxu0 %v1089_v54  ;;  %v805_v53 = vld [vmem:[%s6840_s5 + $0x38] sm:$0xff] }
  0x58   : > { %3574 = vmatpush3.msra.mxu1 %v1121_v57  ;;  %3519 = vmatprep.subr.mxu0 %v1104_v62  ;;  %v494_v57 = vstv %s5167_s19  ;;  %v820_v62 = vld [vmem:[%s6840_s5 + $0xb0] sm:$0xff]  ;;  %s3225_s19 = sshll.u32 %s423_s15, 3 }
  0x59   : > { %3575 = vmatprep.subr.mxu1 %v1136_v63  ;;  %1265 = vmatprep.mubr.f32.mxu0 %v5012_v1  ;;  %v613_v63 = vsel %vm531_vm0, 0.0, %v5009_v0  ;;  %vm5206_vm4 = vcmp.eq.s32.totalorder %v494_v57, 1  ;;  %s6011_s13 = scalar_lea.vmem %s6837_s2, %s3225_s19 }
  0x5a   : > { %3264 = vmatprep.mubr.msk.f32.mxu1 %vm4696_vm3, %v5009_v0  ;;  %3520 = vmatpush3.msra.mxu0 %v1088_v2  ;;  %v621_v2 = vsel %vm531_vm0, %v5009_v0, 0.0 }
  0x5b   : > { %3576 = vmatpush3.msra.mxu1 %v1120_v3  ;;  %3248 = vmatmul.mubr.msk.f32.gmra.mxu0 %vm4696_vm3, %v4935_v19 }
  0x5c   : > { %1371 = vmatmul.mubr.f32.gmra.mxu1 %v5021_v4  ;;  %3521 = vmatprep.subr.mxu0 %v1103_v6  ;;  %v449_v6 = vld [vmem:[%s5150_s18 + $0x8] sm:$0xff] }
  0x5d   : > { %3577 = vmatprep.subr.mxu1 %v1135_v7  ;;  %3522 = vmatpush3.msra.mxu0 %v1087_v9  ;;  %v1014_v7 = vrot.slane %v613_v63, 1  ;;  %v1015_v9 = vrot.slane %v621_v2, 1 }
  0x5e   : > { %3578 = vmatpush3.msra.mxu1 %v1119_v11  ;;  %3523 = vmatprep.subr.mxu0 %v1102_v12 }
  0x5f   : > { %3579 = vmatprep.subr.mxu1 %v1134_v13  ;;  %3524 = vmatpush3.msra.mxu0 %v1086_v14  ;;  %v1155_v13 = vld [vmem:[%s6840_s5 + $0x8a8] sm:$0xff] }
  0x60   : > { %1440 = vmatprep.mubr.f32.mxu0 %v4754_v52  ;;  %3580 = vmatpush3.msra.mxu1 %v1118_v16  ;;  %v1164_v52 = vld [vmem:[%s6840_s5 + $0x8f0] sm:$0xff]  ;;  %v819_v14 = vld [vmem:[%s6840_s5 + $0xa8] sm:$0xff] }
  0x61   : > { %1545 = vmatprep.mubr.f32.mxu1 %v4788_v5  ;;  %1441 = vmatmul.mubr.f32.vlgmr.msra.gmra.mxu0 %v4742_v46  ;;  %v812_v46 = vld [vmem:[%s6840_s5 + $0x70] sm:$0xff]  ;;  %v803_v16 = vld [vmem:[%s6840_s5 + $0x28] sm:$0xff] }
  0x62   : > { %3266 = vmatmul.mubr.msk.f32.vlgmr.msra.gmra.mxu1 %vm4696_vm3, %v4707_v28  ;;  %4125 = vmatprep.subr.mxu0 %v1165_v17  ;;  %v1163_v28 = vld [vmem:[%s6840_s5 + $0x8e8] sm:$0xff] }
  0x63   : > { %3629 = vmatprep.subr.mxu1 %v829_v21  ;;  %4126 = vmatpush3.msra.mxu0 %v1165_v17  ;;  %v464_v17 = vmul.f32 %v4628_v51, %v449_v6  ;;  %v1154_v21 = vld [vmem:[%s6840_s5 + $0x8a0] sm:$0xff]  ;;  %v892_v6 = vld [vmem:[%s6840_s5 + $0x2f0] sm:$0xff] }
  0x64   : > { %3630 = vmatpush3.msra.mxu1 %v813_v24  ;;  %4127 = vmatprep.subr.mxu0 %v1164_v52  ;;  %v818_v24 = vld [vmem:[%s6840_s5 + $0xa0] sm:$0xff] }
  0x65   : > { %3631 = vmatprep.subr.mxu1 %v828_v25  ;;  %1445 = vmatprep.mubr.f32.mxu0 %v4800_v10 }
  0x66   : > { %1550 = vmatprep.mubr.f32.mxu1 %v4835_v30  ;;  %4128 = vmatpush3.msra.mxu0 %v1164_v52  ;;  %v1016_v52 = vsel %vm722_vm1, %v1014_v7, %v1015_v9 }
  0x67   : > { %3632 = vmatpush3.msra.mxu1 %v812_v46  ;;  %1446 = vmatmul.mubr.f32.gmra.mxu0 %v4788_v5  ;;  %v810_v5 = vld [vmem:[%s6840_s5 + $0x60] sm:$0xff]  ;;  %v1018_v46 = vrot.slane %v613_v63, 2  ;;  %v861_v63 = vld [vmem:[%s6840_s5 + $0x1f8] sm:$0xff] }
  0x68   : > { %3268 = vmatmul.mubr.msk.f32.gmra.mxu1 %vm4696_vm3, %v4750_v49  ;;  %4129 = vmatprep.subr.mxu0 %v1163_v28  ;;  %v1161_v49 = vld [vmem:[%s6840_s5 + $0x8d8] sm:$0xff] }
  0x69   : > { %3633 = vmatprep.subr.mxu1 %v827_v26  ;;  %4130 = vmatpush3.msra.mxu0 %v1163_v28  ;;  %v1019_v28 = vrot.slane %v621_v2, 2  ;;  %v478_v26 = vadd.f32 %v4640_v55, %v464_v17  ;;  %v893_v2 = vld [vmem:[%s6840_s5 + $0x2f8] sm:$0xff] }
  0x6a   : > { %3634 = vmatpush3.msra.mxu1 %v811_v27  ;;  %4131 = vmatprep.subr.mxu0 %v1162_v29  ;;  %v1153_v27 = vld [vmem:[%s6840_s5 + $0x898] sm:$0xff] }
  0x6b   : > { %3635 = vmatprep.subr.mxu1 %v826_v31  ;;  %1450 = vmatprep.mubr.f32.mxu0 %v4847_v35  ;;  %v801_v31 = vld [vmem:[%s6840_s5 + $0x18] sm:$0xff] }
  0x6c   : > { %1555 = vmatprep.mubr.f32.mxu1 %v4881_v56  ;;  %4132 = vmatpush3.msra.mxu0 %v1162_v29  ;;  %v817_v29 = vld [vmem:[%s6840_s5 + $0x98] sm:$0xff] }
  0x6d   : > { %3636 = vmatpush3.msra.mxu1 %v810_v5  ;;  %1451 = vmatmul.mubr.f32.gmra.mxu0 %v4835_v30  ;;  %v808_v30 = vld [vmem:[%s6840_s5 + $0x50] sm:$0xff] }
  0x6e   : > { %3270 = vmatmul.mubr.msk.f32.gmra.mxu1 %vm4696_vm3, %v4796_v8  ;;  %4133 = vmatprep.subr.mxu0 %v1161_v49  ;;  %v1159_v8 = vld [vmem:[%s6840_s5 + $0x8c8] sm:$0xff] }
  0x6f   : > { %3637 = vmatprep.subr.mxu1 %v825_v32  ;;  %4134 = vmatpush3.msra.mxu0 %v1161_v49  ;;  %v1152_v32 = vld [vmem:[%s6840_s5 + $0x890] sm:$0xff] }
  0x70   : > { %3638 = vmatpush3.msra.mxu1 %v809_v34  ;;  %4135 = vmatprep.subr.mxu0 %v1160_v36  ;;  %v816_v34 = vld [vmem:[%s6840_s5 + $0x90] sm:$0xff] }
  0x71   : > { %3639 = vmatprep.subr.mxu1 %v824_v37  ;;  %1455 = vmatprep.mubr.f32.mxu0 %v4892_v60  ;;  %v486_v37 = vmax.f32 %v478_v26, 0.0  ;;  %v843_v26 = vld [vmem:[%s6840_s5 + $0x168] sm:$0xff] }
  0x72   : > { %1560 = vmatprep.mubr.f32.mxu1 %v4927_v15  ;;  %4136 = vmatpush3.msra.mxu0 %v1160_v36  ;;  %v5268_v36 = vsel %vm755_vm2, %v1018_v46, %v1019_v28  ;;  %v859_v46 = vld [vmem:[%s6840_s5 + $0x1e8] sm:$0xff] }
  0x73   : > { %3640 = vmatpush3.msra.mxu1 %v808_v30  ;;  %1456 = vmatmul.mubr.f32.gmra.mxu0 %v4881_v56  ;;  %v448_v56 = vld [vmem:[%s5150_s18] sm:$0xff]  ;;  %v451_v30 = vld [vmem:[%s5150_s18 + $0x18] sm:$0xff]  ;;  %v891_v28 = vld [vmem:[%s6840_s5 + $0x2e8] sm:$0xff] }
  0x74   : > { %3272 = vmatmul.mubr.msk.f32.gmra.mxu1 %vm4696_vm3, %v4843_v33  ;;  %4137 = vmatprep.subr.mxu0 %v1159_v8  ;;  %v806_v33 = vld [vmem:[%s6840_s5 + $0x40] sm:$0xff]  ;;  %v463_v54 = vmul.f32 %v4628_v51, %v448_v56 }
  0x75   : > { %3641 = vmatprep.subr.mxu1 %v823_v38  ;;  %4138 = vmatpush3.msra.mxu0 %v1159_v8  ;;  %v1151_v38 = vld [vmem:[%s6840_s5 + $0x888] sm:$0xff]  ;;  %v1150_v56 = vld [vmem:[%s6840_s5 + $0x880] sm:$0xff] }
  0x76   : > { %3642 = vmatpush3.msra.mxu1 %v807_v39  ;;  %4139 = vmatprep.subr.mxu0 %v1158_v41  ;;  %v477_v11 = vadd.f32 %v4640_v55, %v463_v54  ;;  %v815_v39 = vld [vmem:[%s6840_s5 + $0x88] sm:$0xff]  ;;  %v798_v54 = vld [vmem:[%s6840_s5] sm:$0xff] }
  0x77   : > { %3643 = vmatprep.subr.mxu1 %v822_v42  ;;  %1460 = vmatprep.mubr.f32.mxu0 %v4938_v20  ;;  %v497_v42 = vsel %vm5206_vm4, %v486_v37, 0.0 }
  0x78   : > { %1565 = vmatprep.mubr.f32.mxu1 %v4972_v40  ;;  %4140 = vmatpush3.msra.mxu0 %v1158_v41  ;;  %v485_v25 = vmax.f32 %v477_v11, 0.0  ;;  %v799_v41 = vld [vmem:[%s6840_s5 + $0x8] sm:$0xff]  ;;  %v5312_v57 = vrot.slane %v497_v42, 7  ;;  %v857_v42 = vld [vmem:[%s6840_s5 + $0x1d8] sm:$0xff] }
  0x79   : > { %3644 = vmatpush3.msra.mxu1 %v806_v33  ;;  %1461 = vmatmul.mubr.f32.gmra.mxu0 %v4927_v15  ;;  %v492_v15 = vmax.f32 %v484_v58, 0.0  ;;  %v466_v33 = vmul.f32 %v4628_v51, %v451_v30  ;;  %v874_v30 = vld [vmem:[%s6840_s5 + $0x260] sm:$0xff] }
  0x7a   : > { %3274 = vmatmul.mubr.msk.f32.gmra.mxu1 %vm4696_vm3, %v4889_v59  ;;  %4141 = vmatprep.subr.mxu0 %v1157_v48  ;;  %v804_v59 = vld [vmem:[%s6840_s5 + $0x30] sm:$0xff]  ;;  %v496_v5 = vsel %vm5206_vm4, %v485_v25, 0.0  ;;  %v5346_v7 = vsel %vm531_vm0, 0.0, %v5312_v57  ;;  %v5350_v9 = vsel %vm531_vm0, %v5312_v57, 0.0 }
  0x7b   : > { %3645 = vmatprep.subr.mxu1 %v821_v50  ;;  %4142 = vmatpush3.msra.mxu0 %v1157_v48  ;;  %v5214_v12 = vsel %vm5206_vm4, %v492_v15, 0.0  ;;  %v730_v25 = vrot.slane %v5350_v9, 1 }
  0x7c   : > { %3646 = vmatpush3.msra.mxu1 %v805_v53  ;;  %4143 = vmatprep.subr.mxu0 %v1156_v61  ;;  %v452_v53 = vld [vmem:[%s5150_s18 + $0x20] sm:$0xff] }
  0x7d   : > { %3647 = vmatprep.subr.mxu1 %v820_v62  ;;  %1465 = vmatprep.mubr.f32.mxu0 %v4981_v45  ;;  %v480_v62 = vadd.f32 %v4640_v55, %v466_v33  ;;  %v467_v15 = vmul.f32 %v4628_v51, %v452_v53  ;;  %v889_v33 = vld [vmem:[%s6840_s5 + $0x2d8] sm:$0xff]  ;;  %v856_v53 = vld [vmem:[%s6840_s5 + $0x1d0] sm:$0xff] }
  0x7e   : > { %1570 = vmatprep.mubr.f32.mxu1 %v5012_v1  ;;  %4144 = vmatpush3.msra.mxu0 %v1156_v61 }
  0x7f   : > { %3648 = vmatpush3.msra.mxu1 %v804_v59  ;;  %1466 = vmatmul.mubr.f32.gmra.mxu0 %v4972_v40  ;;  %v802_v40 = vld [vmem:[%s6840_s5 + $0x20] sm:$0xff] }
  0x80   : > { %3276 = vmatmul.mubr.msk.f32.gmra.mxu1 %vm4696_vm3, %v4935_v19  ;;  %4145 = vmatprep.subr.mxu0 %v1155_v13  ;;  %v450_v19 = vld [vmem:[%s5150_s18 + $0x10] sm:$0xff] }
  0x81   : > { %3649 = vmatprep.subr.mxu1 %v819_v14  ;;  %4146 = vmatpush3.msra.mxu0 %v1155_v13  ;;  %v465_v49 = vmul.f32 %v4628_v51, %v450_v19  ;;  %v860_v51 = vld [vmem:[%s6840_s5 + $0x1f0] sm:$0xff]  ;;  %v488_v13 = vmax.f32 %v480_v62, 0.0 }
  0x82   : > { %3650 = vmatpush3.msra.mxu1 %v803_v16  ;;  %4147 = vmatprep.subr.mxu0 %v1154_v21  ;;  %v844_v14 = vld [vmem:[%s6840_s5 + $0x170] sm:$0xff] }
  0x83   : > { %3651 = vmatprep.subr.mxu1 %v818_v24  ;;  %1470 = vmatprep.mubr.f32.mxu0 %v5021_v4  ;;  %v479_v8 = vadd.f32 %v4640_v55, %v465_v49  ;;  %v845_v55 = vld [vmem:[%s6840_s5 + $0x178] sm:$0xff]  ;;  %v876_v16 = vld [vmem:[%s6840_s5 + $0x270] sm:$0xff] }
  0x84   : > { %1575 = vmatprep.mubr.f32.mxu1 %v1016_v52  ;;  %4148 = vmatpush3.msra.mxu0 %v1154_v21  ;;  %v5367_v21 = vld [vmem:[%s6839_s4] ss:$0 sm:$0xff] }
  0x85   : > { %3652 = vmatpush3.msra.mxu1 %v802_v40  ;;  %1471 = vmatmul.mubr.f32.gmra.mxu0 %v5012_v1  ;;  %v5273_v1 = vrot.slane %v496_v5, 7  ;;  %v487_v50 = vmax.f32 %v479_v8, 0.0  ;;  %v481_v24 = vadd.f32 %v5367_v21, %v467_v15  ;;  %v5375_v40 = vld [vmem:[%s6838_s3] ss:$0 sm:$0xff]  ;;  %v872_v15 = vld [vmem:[%s6840_s5 + $0x250] sm:$0xff] }
  0x86   : > { %3278 = vmatmul.mubr.msk.f32.gmra.mxu1 %vm4696_vm3, %v5009_v0  ;;  %4149 = vmatprep.subr.mxu0 %v1153_v27  ;;  %v800_v0 = vld [vmem:[%s6840_s5 + $0x10] sm:$0xff]  ;;  %v890_v5 = vld [vmem:[%s6840_s5 + $0x2e0] sm:$0xff] }
  0x87   : > { %3653 = vmatprep.subr.mxu1 %v817_v29  ;;  %4150 = vmatpush3.msra.mxu0 %v1153_v27  ;;  %v5302_v47 = vsel %vm531_vm0, 0.0, %v5273_v1  ;;  %v5306_v48 = vsel %vm531_vm0, %v5273_v1, 0.0  ;;  %v498_v59 = vsel %vm5206_vm4, %v487_v50, 0.0  ;;  %v499_v27 = vsel %vm5206_vm4, %v488_v13, 0.0  ;;  %v454_v29 = vld [vmem:[%s5150_s18 + $0x30] sm:$0xff]  ;;  %v839_v13 = vld [vmem:[%s6840_s5 + $0x148] sm:$0xff] }
  0x88   : > { %3654 = vmatpush3.msra.mxu1 %v801_v31  ;;  %4151 = vmatprep.subr.mxu0 %v1152_v32  ;;  %v726_v58 = vrot.slane %v5302_v47, 1  ;;  %v727_v61 = vrot.slane %v5306_v48, 1  ;;  %v5362_v17 = vrot.slane %v498_v59, 7  ;;  %v858_v31 = vld [vmem:[%s6840_s5 + $0x1e0] sm:$0xff]  ;;  %v5423_v8 = vrot.slane %v499_v27, 7 }
  0x89   : > { %3655 = vmatprep.subr.mxu1 %v816_v34  ;;  %1475 = vmatprep.mubr.f32.mxu0 %v5268_v36 }
  0x8a   : > { %1580 = vmatprep.mubr.f32.mxu1 %v4690_v18  ;;  %4152 = vmatpush3.msra.mxu0 %v1152_v32  ;;  %v5354_v11 = vsel %vm722_vm1, %v726_v58, %v727_v61  ;;  %v5407_v49 = vsel %vm531_vm0, 0.0, %v5362_v17  ;;  %v5411_v32 = vsel %vm531_vm0, %v5362_v17, 0.0  ;;  %v5456_v58 = vsel %vm531_vm0, 0.0, %v5423_v8 }
  0x8b   : > { %3656 = vmatpush3.msra.mxu1 %v800_v0  ;;  %1476 = vmatmul.mubr.f32.gmra.mxu0 %v1016_v52  ;;  %v729_v52 = vrot.slane %v5346_v7, 1  ;;  %v842_v0 = vld [vmem:[%s6840_s5 + $0x160] sm:$0xff]  ;;  %v5460_v61 = vsel %vm531_vm0, %v5423_v8, 0.0 }
  0x8c   : > { %3280 = vmatmul.mubr.msk.f32.gmra.mxu1 %vm4696_vm3, %v4595_v43  ;;  %4153 = vmatprep.subr.mxu0 %v1151_v38 }
  0x8d   : > { %3657 = vmatprep.subr.mxu1 %v815_v39  ;;  %4154 = vmatpush3.msra.mxu0 %v1151_v38  ;;  %v5414_v34 = vsel %vm722_vm1, %v729_v52, %v730_v25  ;;  %v469_v38 = vmul.f32 %v5375_v40, %v454_v29  ;;  %v732_v39 = vrot.slane %v5407_v49, 1  ;;  %v886_v52 = vld [vmem:[%s6840_s5 + $0x2c0] sm:$0xff] }
  0x8e   : > { %3658 = vmatpush3.msra.mxu1 %v799_v41  ;;  %4155 = vmatprep.subr.mxu0 %v1150_v56  ;;  %v733_v41 = vrot.slane %v5411_v32, 1 }
  0x8f   : > { %3659 = vmatprep.subr.mxu1 %v814_v44  ;;  %4156 = vmatpush3.msra.mxu0 %v1150_v56  ;;  %v841_v44 = vld [vmem:[%s6840_s5 + $0x158] sm:$0xff] }
  0x90   : > { %4157 = vmatprep.mubr.f32.mxu0 %v4800_v10  ;;  %3660 = vmatpush3.msra.mxu1 %v798_v54  ;;  %v877_v10 = vld [vmem:[%s6840_s5 + $0x278] sm:$0xff]  ;;  %v888_v54 = vld [vmem:[%s6840_s5 + $0x2d0] sm:$0xff]  ;;  %v5464_v62 = vsel %vm722_vm1, %v732_v39, %v733_v41 }
  0x91   : > { %1755 = vmatprep.mubr.f32.mxu1 %v4690_v18  ;;  %4158 = vmatmul.mubr.f32.vlgmr.msra.gmra.mxu0 %v4847_v35  ;;  %v453_v35 = vld [vmem:[%s5150_s18 + $0x28] sm:$0xff]  ;;  %v836_v41 = vld [vmem:[%s6840_s5 + $0x130] sm:$0xff] }
  0x92   : > { %3282 = vmatmul.mubr.msk.f32.vlgmr.msra.gmra.mxu1 %vm4696_vm3, %v4595_v43  ;;  %3685 = vmatprep.subr.mxu0 %v861_v63  ;;  %v468_v19 = vmul.f32 %v5375_v40, %v453_v35 }
  0x93   : > { %3741 = vmatprep.subr.mxu1 %v893_v2  ;;  %3686 = vmatpush3.msra.mxu0 %v845_v55  ;;  %v840_v2 = vld [vmem:[%s6840_s5 + $0x150] sm:$0xff]  ;;  %v735_v55 = vrot.slane %v5456_v58, 1 }
  0x94   : > { %3742 = vmatpush3.msra.mxu1 %v877_v10  ;;  %3687 = vmatprep.subr.mxu0 %v860_v51  ;;  %v482_v37 = vadd.f32 %v5367_v21, %v468_v19  ;;  %v736_v10 = vrot.slane %v5460_v61, 1  ;;  %v855_v51 = vld [vmem:[%s6840_s5 + $0x1c8] sm:$0xff] }
  0x95   : > { %3743 = vmatprep.subr.mxu1 %v892_v6  ;;  %4160 = vmatprep.mubr.f32.mxu0 %v4892_v60  ;;  %v875_v60 = vld [vmem:[%s6840_s5 + $0x268] sm:$0xff] }
  0x96   : > { %1760 = vmatprep.mubr.f32.mxu1 %v5354_v11  ;;  %3688 = vmatpush3.msra.mxu0 %v844_v14  ;;  %v490_v50 = vmax.f32 %v482_v37, 0.0  ;;  %v887_v6 = vld [vmem:[%s6840_s5 + $0x2c8] sm:$0xff]  ;;  %v5513_v19 = vsel %vm722_vm1, %v735_v55, %v736_v10  ;;  %v834_v10 = vld [vmem:[%s6840_s5 + $0x120] sm:$0xff] }
  0x97   : > { %3744 = vmatpush3.msra.mxu1 %v876_v16  ;;  %4161 = vmatmul.mubr.f32.gmra.mxu0 %v4938_v20  ;;  %v489_v20 = vmax.f32 %v481_v24, 0.0  ;;  %v854_v24 = vld [vmem:[%s6840_s5 + $0x1c0] sm:$0xff] }
  0x98   : > { %3284 = vmatmul.mubr.msk.f32.gmra.mxu1 %vm4696_vm3, %v5273_v1  ;;  %3689 = vmatprep.subr.mxu0 %v859_v46  ;;  %v501_v59 = vsel %vm5206_vm4, %v490_v50, 0.0  ;;  %v838_v46 = vld [vmem:[%s6840_s5 + $0x140] sm:$0xff]  ;;  %v835_v50 = vld [vmem:[%s6840_s5 + $0x128] sm:$0xff] }
  0x99   : > { %3745 = vmatprep.subr.mxu1 %v891_v28  ;;  %3690 = vmatpush3.msra.mxu0 %v843_v26  ;;  %v500_v56 = vsel %vm5206_vm4, %v489_v20, 0.0  ;;  %v5510_v25 = vrot.slane %v501_v59, 7  ;;  %v870_v28 = vld [vmem:[%s6840_s5 + $0x240] sm:$0xff]  ;;  %v853_v26 = vld [vmem:[%s6840_s5 + $0x1b8] sm:$0xff] }
  0x9a   : > { %3746 = vmatpush3.msra.mxu1 %v875_v60  ;;  %3691 = vmatprep.subr.mxu0 %v858_v31  ;;  %v5466_v63 = vrot.slane %v500_v56, 7  ;;  %v885_v31 = vld [vmem:[%s6840_s5 + $0x2b8] sm:$0xff]  ;;  %v866_v59 = vld [vmem:[%s6840_s5 + $0x220] sm:$0xff] }
  0x9b   : > { %3747 = vmatprep.subr.mxu1 %v890_v5  ;;  %4163 = vmatprep.mubr.f32.mxu0 %v4981_v45  ;;  %v873_v45 = vld [vmem:[%s6840_s5 + $0x258] sm:$0xff]  ;;  %v5540_v3 = vsel %vm531_vm0, 0.0, %v5510_v25  ;;  %v5544_v37 = vsel %vm531_vm0, %v5510_v25, 0.0 }
  0x9c   : > { %1765 = vmatprep.mubr.f32.mxu1 %v5414_v34  ;;  %3692 = vmatpush3.msra.mxu0 %v842_v0  ;;  %v5494_v14 = vsel %vm531_vm0, 0.0, %v5466_v63  ;;  %v5498_v16 = vsel %vm531_vm0, %v5466_v63, 0.0  ;;  %v837_v5 = vld [vmem:[%s6840_s5 + $0x138] sm:$0xff]  ;;  %v852_v0 = vld [vmem:[%s6840_s5 + $0x1b0] sm:$0xff]  ;;  %v741_v56 = vrot.slane %v5540_v3, 1 }
  0x9d   : > { %3748 = vmatpush3.msra.mxu1 %v874_v30  ;;  %4164 = vmatmul.mubr.f32.gmra.mxu0 %v5021_v4  ;;  %v483_v4 = vadd.f32 %v5367_v21, %v469_v38  ;;  %v738_v60 = vrot.slane %v5494_v14, 1  ;;  %v739_v27 = vrot.slane %v5498_v16, 1  ;;  %v869_v20 = vld [vmem:[%s6840_s5 + $0x238] sm:$0xff]  ;;  %v884_v30 = vld [vmem:[%s6840_s5 + $0x2b0] sm:$0xff] }
  0x9e   : > { %3286 = vmatmul.mubr.msk.f32.gmra.mxu1 %vm4696_vm3, %v5312_v57  ;;  %3693 = vmatprep.subr.mxu0 %v857_v42  ;;  %v868_v42 = vld [vmem:[%s6840_s5 + $0x230] sm:$0xff] }
  0x9f   : > { %3749 = vmatprep.subr.mxu1 %v889_v33  ;;  %3694 = vmatpush3.msra.mxu0 %v841_v44  ;;  %v491_v35 = vmax.f32 %v483_v4, 0.0  ;;  %v5558_v39 = vsel %vm722_vm1, %v738_v60, %v739_v27  ;;  %v851_v33 = vld [vmem:[%s6840_s5 + $0x1a8] sm:$0xff]  ;;  %v742_v44 = vrot.slane %v5544_v37, 1  ;;  %v864_v60 = vld [vmem:[%s6840_s5 + $0x210] sm:$0xff] }
  0xa0   : > { %3750 = vmatpush3.msra.mxu1 %v873_v45  ;;  %3695 = vmatprep.subr.mxu0 %v856_v53  ;;  %v883_v45 = vld [vmem:[%s6840_s5 + $0x2a8] sm:$0xff] }
  0xa1   : > { %3751 = vmatprep.subr.mxu1 %v888_v54  ;;  %4166 = vmatprep.mubr.f32.mxu0 %v5268_v36  ;;  %v871_v36 = vld [vmem:[%s6840_s5 + $0x248] sm:$0xff]  ;;  %v502_v29 = vsel %vm5206_vm4, %v491_v35, 0.0  ;;  %v5599_v55 = vsel %vm722_vm1, %v741_v56, %v742_v44  ;;  %v941_v56 = vld [vmem:[%s6840_s5 + $0x478] sm:$0xff] }
  0xa2   : > { %1770 = vmatprep.mubr.f32.mxu1 %v5464_v62  ;;  %3696 = vmatpush3.msra.mxu0 %v840_v2  ;;  %v5552_v38 = vrot.slane %v502_v29, 7  ;;  %v867_v53 = vld [vmem:[%s6840_s5 + $0x228] sm:$0xff]  ;;  %v850_v2 = vld [vmem:[%s6840_s5 + $0x1a0] sm:$0xff]  ;;  %v909_v44 = vld [vmem:[%s6840_s5 + $0x378] sm:$0xff] }
  0xa3   : > { %3752 = vmatpush3.msra.mxu1 %v872_v15  ;;  %4167 = vmatmul.mubr.f32.gmra.mxu0 %v4701_v23  ;;  %v882_v15 = vld [vmem:[%s6840_s5 + $0x2a0] sm:$0xff]  ;;  %v847_v27 = vld [vmem:[%s6840_s5 + $0x188] sm:$0xff] }
  0xa4   : > { %3288 = vmatmul.mubr.msk.f32.gmra.mxu1 %vm4696_vm3, %v5362_v17  ;;  %3697 = vmatprep.subr.mxu0 %v855_v51  ;;  %v5583_v54 = vsel %vm531_vm0, 0.0, %v5552_v38  ;;  %v5587_v4 = vsel %vm531_vm0, %v5552_v38, 0.0  ;;  %v849_v51 = vld [vmem:[%s6840_s5 + $0x198] sm:$0xff]  ;;  %v879_v29 = vld [vmem:[%s6840_s5 + $0x288] sm:$0xff] }
  0xa5   : > { %3753 = vmatprep.subr.mxu1 %v887_v6  ;;  %3698 = vmatpush3.msra.mxu0 %v839_v13  ;;  %v744_v6 = vrot.slane %v5583_v54, 1  ;;  %v745_v35 = vrot.slane %v5587_v4, 1  ;;  %v881_v13 = vld [vmem:[%s6840_s5 + $0x298] sm:$0xff] }
  0xa6   : > { %3754 = vmatpush3.msra.mxu1 %v871_v36  ;;  %3699 = vmatprep.subr.mxu0 %v854_v24  ;;  %v833_v36 = vld [vmem:[%s6840_s5 + $0x118] sm:$0xff] }
  0xa7   : > { %3755 = vmatprep.subr.mxu1 %v886_v52  ;;  %1775 = vmatprep.mubr.f32.mxu1 %v5513_v19  ;;  %v865_v24 = vld [vmem:[%s6840_s5 + $0x218] sm:$0xff]  ;;  %v848_v52 = vld [vmem:[%s6840_s5 + $0x190] sm:$0xff] }
  0xa8   : > { %3700 = vmatpush3.msra.mxu0 %v838_v46  ;;  %3756 = vmatpush3.msra.mxu1 %v870_v28  ;;  %v880_v46 = vld [vmem:[%s6840_s5 + $0x290] sm:$0xff]  ;;  %v5632_v28 = vsel %vm722_vm1, %v744_v6, %v745_v35  ;;  %v938_v6 = vld [vmem:[%s6840_s5 + $0x460] sm:$0xff]  ;;  %v921_v35 = vld [vmem:[%s6840_s5 + $0x3d8] sm:$0xff] }
  0xa9   : > { %3701 = vmatprep.subr.mxu0 %v853_v26  ;;  %3290 = vmatmul.mubr.msk.f32.gmra.mxu1 %vm4696_vm3, %v5423_v8  ;;  %v832_v26 = vld [vmem:[%s6840_s5 + $0x110] sm:$0xff] }
  0xaa   : > { %3757 = vmatprep.subr.mxu1 %v885_v31  ;;  %3702 = vmatpush3.msra.mxu0 %v837_v5  ;;  %v831_v31 = vld [vmem:[%s6840_s5 + $0x108] sm:$0xff] }
  0xab   : > { %3758 = vmatpush3.msra.mxu1 %v869_v20  ;;  %3703 = vmatprep.subr.mxu0 %v852_v0  ;;  %v863_v5 = vld [vmem:[%s6840_s5 + $0x208] sm:$0xff]  ;;  %v759_v20 = vrot.slane %v5302_v47, 2  ;;  %v760_v0 = vrot.slane %v5306_v48, 2  ;;  %v830_v47 = vld [vmem:[%s6840_s5 + $0x100] sm:$0xff] }
  0xac   : > { %3759 = vmatprep.subr.mxu1 %v884_v30  ;;  %1780 = vmatprep.mubr.f32.mxu1 %v5558_v39  ;;  %v846_v30 = vld [vmem:[%s6840_s5 + $0x180] sm:$0xff] }
  0xad   : > { %3704 = vmatpush3.msra.mxu0 %v836_v41  ;;  %3760 = vmatpush3.msra.mxu1 %v868_v42  ;;  %v878_v41 = vld [vmem:[%s6840_s5 + $0x280] sm:$0xff]  ;;  %v761_v42 = vsel %vm755_vm2, %v759_v20, %v760_v0 }
  0xae   : > { %3705 = vmatprep.subr.mxu0 %v851_v33  ;;  %3292 = vmatmul.mubr.msk.f32.gmra.mxu1 %vm4696_vm3, %v5466_v63  ;;  %v862_v48 = vld [vmem:[%s6840_s5 + $0x200] sm:$0xff]  ;;  %v925_v33 = vld [vmem:[%s6840_s5 + $0x3f8] sm:$0xff] }
  0xaf   : > { %3761 = vmatprep.subr.mxu1 %v883_v45  ;;  %3706 = vmatpush3.msra.mxu0 %v835_v50  ;;  %v762_v45 = vrot.slane %v5346_v7, 2  ;;  %v763_v50 = vrot.slane %v5350_v9, 2  ;;  %v923_v9 = vld [vmem:[%s6840_s5 + $0x3e8] sm:$0xff]  ;;  %v918_v20 = vld [vmem:[%s6840_s5 + $0x3c0] sm:$0xff] }
  0xb0   : > { %3762 = vmatpush3.msra.mxu1 %v867_v53  ;;  %3707 = vmatprep.subr.mxu0 %v850_v2  ;;  %v940_v53 = vld [vmem:[%s6840_s5 + $0x470] sm:$0xff]  ;;  %v934_v0 = vld [vmem:[%s6840_s5 + $0x440] sm:$0xff] }
  0xb1   : > { %3763 = vmatprep.subr.mxu1 %v882_v15  ;;  %1785 = vmatprep.mubr.f32.mxu1 %v5599_v55  ;;  %v908_v2 = vld [vmem:[%s6840_s5 + $0x370] sm:$0xff]  ;;  %v5697_v7 = vsel %vm755_vm2, %v762_v45, %v763_v50  ;;  %v907_v15 = vld [vmem:[%s6840_s5 + $0x368] sm:$0xff]  ;;  %v5824_v50 = vrot.slane %v5214_v12, 7  ;;  %v930_v12 = vld [vmem:[%s6840_s5 + $0x420] sm:$0xff] }
  0xb2   : > { %3708 = vmatpush3.msra.mxu0 %v834_v10  ;;  %3764 = vmatpush3.msra.mxu1 %v866_v59  ;;  %v765_v10 = vrot.slane %v5407_v49, 2  ;;  %v766_v59 = vrot.slane %v5411_v32, 2  ;;  %v906_v49 = vld [vmem:[%s6840_s5 + $0x360] sm:$0xff]  ;;  %v931_v45 = vld [vmem:[%s6840_s5 + $0x428] sm:$0xff] }
  0xb3   : > { %3709 = vmatprep.subr.mxu0 %v849_v51  ;;  %3294 = vmatmul.mubr.msk.f32.gmra.mxu1 %vm4696_vm3, %v5510_v25  ;;  %v922_v51 = vld [vmem:[%s6840_s5 + $0x3e0] sm:$0xff] }
  0xb4   : > { %3765 = vmatprep.subr.mxu1 %v881_v13  ;;  %3710 = vmatpush3.msra.mxu0 %v833_v36  ;;  %v5725_v32 = vsel %vm755_vm2, %v765_v10, %v766_v59  ;;  %v937_v13 = vld [vmem:[%s6840_s5 + $0x458] sm:$0xff] }
  0xb5   : > { %3766 = vmatpush3.msra.mxu1 %v865_v24  ;;  %3711 = vmatprep.subr.mxu0 %v848_v52  ;;  %v905_v36 = vld [vmem:[%s6840_s5 + $0x358] sm:$0xff]  ;;  %v768_v24 = vrot.slane %v5456_v58, 2  ;;  %v769_v52 = vrot.slane %v5460_v61, 2  ;;  %v904_v58 = vld [vmem:[%s6840_s5 + $0x350] sm:$0xff] }
  0xb6   : > { %3767 = vmatprep.subr.mxu1 %v880_v46  ;;  %1790 = vmatprep.mubr.f32.mxu1 %v5632_v28  ;;  %v920_v46 = vld [vmem:[%s6840_s5 + $0x3d0] sm:$0xff]  ;;  %v913_v10 = vld [vmem:[%s6840_s5 + $0x398] sm:$0xff] }
  0xb7   : > { %3712 = vmatpush3.msra.mxu0 %v832_v26  ;;  %3768 = vmatpush3.msra.mxu1 %v864_v60  ;;  %v936_v26 = vld [vmem:[%s6840_s5 + $0x450] sm:$0xff]  ;;  %v5754_v61 = vsel %vm755_vm2, %v768_v24, %v769_v52  ;;  %v919_v60 = vld [vmem:[%s6840_s5 + $0x3c8] sm:$0xff]  ;;  %v929_v59 = vld [vmem:[%s6840_s5 + $0x418] sm:$0xff] }
  0xb8   : > { %3713 = vmatprep.subr.mxu0 %v847_v27  ;;  %3296 = vmatmul.mubr.msk.f32.gmra.mxu1 %vm4696_vm3, %v5552_v38  ;;  %v935_v27 = vld [vmem:[%s6840_s5 + $0x448] sm:$0xff]  ;;  %v896_v52 = vld [vmem:[%s6840_s5 + $0x310] sm:$0xff] }
  0xb9   : > { %3769 = vmatprep.subr.mxu1 %v879_v29  ;;  %3714 = vmatpush3.msra.mxu0 %v831_v31  ;;  %v903_v29 = vld [vmem:[%s6840_s5 + $0x348] sm:$0xff]  ;;  %v771_v31 = vrot.slane %v5494_v14, 2  ;;  %v902_v14 = vld [vmem:[%s6840_s5 + $0x340] sm:$0xff] }
  0xba   : > { %3770 = vmatpush3.msra.mxu1 %v863_v5  ;;  %3715 = vmatprep.subr.mxu0 %v846_v30  ;;  %v772_v5 = vrot.slane %v5498_v16, 2  ;;  %v917_v30 = vld [vmem:[%s6840_s5 + $0x3b8] sm:$0xff] }
  0xbb   : > { %3771 = vmatprep.subr.mxu1 %v878_v41  ;;  %3716 = vmatpush3.msra.mxu0 %v830_v47  ;;  %v933_v41 = vld [vmem:[%s6840_s5 + $0x438] sm:$0xff] }
  0xbc   : > { %3298 = vmatprep.mubr.msk.f32.mxu0 %vm4696_vm3, %v5273_v1  ;;  %3772 = vmatpush3.msra.mxu1 %v862_v48  ;;  %v924_v1 = vld [vmem:[%s6840_s5 + $0x3f0] sm:$0xff]  ;;  %v5783_v16 = vsel %vm755_vm2, %v771_v31, %v772_v5  ;;  %v901_v47 = vld [vmem:[%s6840_s5 + $0x338] sm:$0xff]  ;;  %v774_v48 = vrot.slane %v5540_v3, 2  ;;  %v926_v31 = vld [vmem:[%s6840_s5 + $0x400] sm:$0xff] }
  0xbd   : > { %1861 = vmatmul.mubr.f32.vlgmr.msra.gmra.mxu0 %v4701_v23  ;;  %1965 = vmatprep.mubr.f32.mxu1 %v761_v42  ;;  %v900_v3 = vld [vmem:[%s6840_s5 + $0x330] sm:$0xff]  ;;  %v894_v5 = vld [vmem:[%s6840_s5 + $0x300] sm:$0xff] }
  0xbe   : > { %3797 = vmatprep.subr.mxu0 %v925_v33  ;;  %4169 = vmatprep.subr.mxu1 %v941_v56  ;;  %v916_v33 = vld [vmem:[%s6840_s5 + $0x3b0] sm:$0xff] }
  0xbf   : > { %1966 = vmatmul.mubr.f32.vlgmr.msra.gmra.mxu1 %v5354_v11  ;;  %3798 = vmatpush3.msra.mxu0 %v909_v44  ;;  %v939_v11 = vld [vmem:[%s6840_s5 + $0x468] sm:$0xff] }
  0xc0   : > { %4170 = vmatpush3.msra.mxu1 %v941_v56  ;;  %3799 = vmatprep.subr.mxu0 %v924_v1  ;;  %v932_v56 = vld [vmem:[%s6840_s5 + $0x430] sm:$0xff]  ;;  %v915_v44 = vld [vmem:[%s6840_s5 + $0x3a8] sm:$0xff] }
  0xc1   : > { %4171 = vmatprep.subr.mxu1 %v940_v53  ;;  %3300 = vmatprep.mubr.msk.f32.mxu0 %vm4696_vm3, %v5312_v57  ;;  %v899_v1 = vld [vmem:[%s6840_s5 + $0x328] sm:$0xff] }
  0xc2   : > { %3800 = vmatpush3.msra.mxu0 %v908_v2  ;;  %4172 = vmatpush3.msra.mxu1 %v940_v53  ;;  %v777_v53 = vrot.slane %v5583_v54, 2  ;;  %v778_v2 = vrot.slane %v5587_v4, 2  ;;  %v898_v54 = vld [vmem:[%s6840_s5 + $0x320] sm:$0xff]  ;;  %v540_v4 = vsel %vm531_vm0, 0.0, %v5824_v50 }
  0xc3   : > { %1866 = vmatmul.mubr.f32.gmra.mxu0 %v761_v42  ;;  %1970 = vmatprep.mubr.f32.mxu1 %v5697_v7  ;;  %v775_v42 = vrot.slane %v5544_v37, 2 }
  0xc4   : > { %3801 = vmatprep.subr.mxu0 %v923_v9  ;;  %4173 = vmatprep.subr.mxu1 %v939_v11  ;;  %v914_v9 = vld [vmem:[%s6840_s5 + $0x3a0] sm:$0xff] }
  0xc5   : > { %1971 = vmatmul.mubr.f32.gmra.mxu1 %v5414_v34  ;;  %3802 = vmatpush3.msra.mxu0 %v907_v15  ;;  %v5812_v37 = vsel %vm755_vm2, %v774_v48, %v775_v42  ;;  %v5848_v15 = vsel %vm755_vm2, %v777_v53, %v778_v2  ;;  %v2309_v48 = vld [vmem:[%s6840_s5 + $0x968] sm:$0xff] }
  0xc6   : > { %4174 = vmatpush3.msra.mxu1 %v939_v11  ;;  %3803 = vmatprep.subr.mxu0 %v922_v51  ;;  %v549_v11 = vsel %vm531_vm0, %v5824_v50, 0.0  ;;  %v897_v51 = vld [vmem:[%s6840_s5 + $0x318] sm:$0xff]  ;;  %v2341_v42 = vld [vmem:[%s6840_s5 + $0xa68] sm:$0xff] }
  0xc7   : > { %4175 = vmatprep.subr.mxu1 %v938_v6  ;;  %3302 = vmatprep.mubr.msk.f32.mxu0 %vm4696_vm3, %v5362_v17  ;;  %v791_v24 = vrot.slane %v549_v11, 1 }
  0xc8   : > { %3804 = vmatpush3.msra.mxu0 %v906_v49  ;;  %4176 = vmatpush3.msra.mxu1 %v938_v6  ;;  %v794_v6 = vrot.slane %v540_v4, 2  ;;  %v795_v49 = vrot.slane %v549_v11, 2 }
  0xc9   : > { %1871 = vmatmul.mubr.f32.gmra.mxu0 %v5697_v7  ;;  %1975 = vmatprep.mubr.f32.mxu1 %v5725_v32 }
  0xca   : > { %3805 = vmatprep.subr.mxu0 %v921_v35  ;;  %4177 = vmatprep.subr.mxu1 %v937_v13  ;;  %v912_v35 = vld [vmem:[%s6840_s5 + $0x390] sm:$0xff] }
  0xcb   : > { %1976 = vmatmul.mubr.f32.gmra.mxu1 %v5464_v62  ;;  %3806 = vmatpush3.msra.mxu0 %v905_v36  ;;  %v790_v36 = vrot.slane %v540_v4, 1  ;;  %v2339_v4 = vld [vmem:[%s6840_s5 + $0xa58] sm:$0xff] }
  0xcc   : > { %4178 = vmatpush3.msra.mxu1 %v937_v13  ;;  %3807 = vmatprep.subr.mxu0 %v920_v46  ;;  %v928_v13 = vld [vmem:[%s6840_s5 + $0x410] sm:$0xff]  ;;  %v5876_v46 = vsel %vm755_vm2, %v794_v6, %v795_v49 }
  0xcd   : > { %4179 = vmatprep.subr.mxu1 %v936_v26  ;;  %3304 = vmatprep.mubr.msk.f32.mxu0 %vm4696_vm3, %v5423_v8  ;;  %v2306_v6 = vld [vmem:[%s6840_s5 + $0x950] sm:$0xff] }
  0xce   : > { %3808 = vmatpush3.msra.mxu0 %v904_v58  ;;  %4180 = vmatpush3.msra.mxu1 %v936_v26  ;;  %v911_v26 = vld [vmem:[%s6840_s5 + $0x388] sm:$0xff] }
  0xcf   : > { %1876 = vmatmul.mubr.f32.gmra.mxu0 %v5725_v32  ;;  %1980 = vmatprep.mubr.f32.mxu1 %v5754_v61  ;;  %v927_v58 = vld [vmem:[%s6840_s5 + $0x408] sm:$0xff] }
  0xd0   : > { %3809 = vmatprep.subr.mxu0 %v919_v60  ;;  %4181 = vmatprep.subr.mxu1 %v935_v27  ;;  %v5888_v60 = vsel %vm722_vm1, %v790_v36, %v791_v24  ;;  %v2321_v24 = vld [vmem:[%s6840_s5 + $0x9c8] sm:$0xff] }
  0xd1   : > { %1981 = vmatmul.mubr.f32.gmra.mxu1 %v5513_v19  ;;  %3810 = vmatpush3.msra.mxu0 %v903_v29  ;;  %v910_v29 = vld [vmem:[%s6840_s5 + $0x380] sm:$0xff] }
  0xd2   : > { %4182 = vmatpush3.msra.mxu1 %v935_v27  ;;  %3811 = vmatprep.subr.mxu0 %v918_v20  ;;  %v895_v27 = vld [vmem:[%s6840_s5 + $0x308] sm:$0xff]  ;;  %v2327_v20 = vld [vmem:[%s6840_s5 + $0x9f8] sm:$0xff] }
  0xd3   : > { %4183 = vmatprep.subr.mxu1 %v934_v0  ;;  %3306 = vmatprep.mubr.msk.f32.mxu0 %vm4696_vm3, %v5466_v63 }
  0xd4   : > { %3812 = vmatpush3.msra.mxu0 %v902_v14  ;;  %4184 = vmatpush3.msra.mxu1 %v934_v0  ;;  %v2359_v0 = vld [vmem:[%s6840_s5 + $0xaf8] sm:$0xff] }
  0xd5   : > { %1881 = vmatmul.mubr.f32.gmra.mxu0 %v5754_v61  ;;  %1985 = vmatprep.mubr.f32.mxu1 %v5783_v16  ;;  %v2311_v14 = vld [vmem:[%s6840_s5 + $0x978] sm:$0xff] }
  0xd6   : > { %3813 = vmatprep.subr.mxu0 %v917_v30  ;;  %4185 = vmatprep.subr.mxu1 %v933_v41  ;;  %v2343_v30 = vld [vmem:[%s6840_s5 + $0xa78] sm:$0xff] }
  0xd7   : > { %1986 = vmatmul.mubr.f32.gmra.mxu1 %v5558_v39  ;;  %3814 = vmatpush3.msra.mxu0 %v901_v47  ;;  %v2325_v47 = vld [vmem:[%s6840_s5 + $0x9e8] sm:$0xff] }
  0xd8   : > { %4186 = vmatpush3.msra.mxu1 %v933_v41  ;;  %3815 = vmatprep.subr.mxu0 %v916_v33  ;;  %v2358_v41 = vld [vmem:[%s6840_s5 + $0xaf0] sm:$0xff] }
  0xd9   : > { %4187 = vmatprep.subr.mxu1 %v932_v56  ;;  %3308 = vmatprep.mubr.msk.f32.mxu0 %vm4696_vm3, %v5510_v25 }
  0xda   : > { %3816 = vmatpush3.msra.mxu0 %v900_v3  ;;  %4188 = vmatpush3.msra.mxu1 %v932_v56  ;;  %v2356_v3 = vld [vmem:[%s6840_s5 + $0xae0] sm:$0xff] }
  0xdb   : > { %1886 = vmatmul.mubr.f32.gmra.mxu0 %v5783_v16  ;;  %1990 = vmatprep.mubr.f32.mxu1 %v5812_v37 }
  0xdc   : > { %3817 = vmatprep.subr.mxu0 %v915_v44  ;;  %4189 = vmatprep.subr.mxu1 %v931_v45  ;;  %v2308_v44 = vld [vmem:[%s6840_s5 + $0x960] sm:$0xff] }
  0xdd   : > { %1991 = vmatmul.mubr.f32.gmra.mxu1 %v5599_v55  ;;  %3818 = vmatpush3.msra.mxu0 %v899_v1 }
  0xde   : > { %4190 = vmatpush3.msra.mxu1 %v931_v45  ;;  %3819 = vmatprep.subr.mxu0 %v914_v9  ;;  %v2323_v9 = vld [vmem:[%s6840_s5 + $0x9d8] sm:$0xff] }
  0xdf   : > { %4191 = vmatprep.subr.mxu1 %v930_v12  ;;  %3310 = vmatprep.mubr.msk.f32.mxu0 %vm4696_vm3, %v5552_v38 }
  0xe0   : > { %3820 = vmatpush3.msra.mxu0 %v898_v54  ;;  %4192 = vmatpush3.msra.mxu1 %v930_v12  ;;  %v2355_v12 = vld [vmem:[%s6840_s5 + $0xad8] sm:$0xff] }
  0xe1   : > { %1891 = vmatmul.mubr.f32.gmra.mxu0 %v5812_v37  ;;  %1995 = vmatprep.mubr.f32.mxu1 %v5848_v15  ;;  %v2307_v54 = vld [vmem:[%s6840_s5 + $0x958] sm:$0xff] }
  0xe2   : > { %3821 = vmatprep.subr.mxu0 %v913_v10  ;;  %4193 = vmatprep.subr.mxu1 %v929_v59  ;;  %v2354_v10 = vld [vmem:[%s6840_s5 + $0xad0] sm:$0xff] }
  0xe3   : > { %1996 = vmatmul.mubr.f32.gmra.mxu1 %v5632_v28  ;;  %3822 = vmatpush3.msra.mxu0 %v897_v51 }
  0xe4   : > { %4194 = vmatpush3.msra.mxu1 %v929_v59  ;;  %3823 = vmatprep.subr.mxu0 %v912_v35 }
  0xe5   : > { %4195 = vmatprep.subr.mxu1 %v928_v13  ;;  %3312 = vmatprep.mubr.msk.f32.mxu0 %vm4696_vm3, %v5824_v50 }
  0xe6   : > { %3824 = vmatpush3.msra.mxu0 %v896_v52  ;;  %4196 = vmatpush3.msra.mxu1 %v928_v13  ;;  %v2353_v52 = vld [vmem:[%s6840_s5 + $0xac8] sm:$0xff] }
  0xe7   : > { %1896 = vmatmul.mubr.f32.gmra.mxu0 %v5848_v15  ;;  %2000 = vmatprep.mubr.f32.mxu1 %v5876_v46 }
  0xe8   : > { %3825 = vmatprep.subr.mxu0 %v911_v26  ;;  %4197 = vmatprep.subr.mxu1 %v927_v58  ;;  %v2305_v26 = vld [vmem:[%s6840_s5 + $0x948] sm:$0xff] }
  0xe9   : > { %2001 = vmatmul.mubr.f32.gmra.mxu1 %v5888_v60  ;;  %3826 = vmatpush3.msra.mxu0 %v895_v27  ;;  %v2352_v27 = vld [vmem:[%s6840_s5 + $0xac0] sm:$0xff] }
  0xea   : > { %4198 = vmatpush3.msra.mxu1 %v927_v58  ;;  %3827 = vmatprep.subr.mxu0 %v910_v29  ;;  %v622_v29 = vld [vmem:[%s6011_s13] sm:$0xff] }
  0xeb   : > { %4199 = vmatprep.subr.mxu1 %v926_v31  ;;  %3828 = vmatpush3.msra.mxu0 %v894_v5 }
  0xec   : > { %2070 = vmatprep.mubr.f32.mxu0 %v5414_v34  ;;  %4200 = vmatpush3.msra.mxu1 %v926_v31  ;;  %v2326_v34 = vld [vmem:[%s6840_s5 + $0x9f0] sm:$0xff] }
  0xed   : > { %3314 = vmatmul.mubr.msk.f32.vlgmr.msra.gmra.mxu0 %vm4696_vm3, %v5312_v57  ;;  %4201 = vmatprep.mubr.f32.mxu1 %v5697_v7  ;;  %v2310_v57 = vld [vmem:[%s6840_s5 + $0x970] sm:$0xff] }
  0xee   : > { %3877 = vmatprep.subr.mxu0 %v2327_v20  ;;  %3933 = vmatprep.subr.mxu1 %v2359_v0  ;;  %v2342_v7 = vld [vmem:[%s6840_s5 + $0xa70] sm:$0xff]  ;;  %v2304_v20 = vld [vmem:[%s6840_s5 + $0x940] sm:$0xff] }
  0xef   : > { %4202 = vmatmul.mubr.f32.vlgmr.msra.gmra.mxu1 %v5725_v32  ;;  %3878 = vmatpush3.msra.mxu0 %v2311_v14  ;;  %v2357_v32 = vld [vmem:[%s6840_s5 + $0xae8] sm:$0xff]  ;;  %v2319_v14 = vld [vmem:[%s6840_s5 + $0x9b8] sm:$0xff] }
  0xf0   : > { %3934 = vmatpush3.msra.mxu1 %v2343_v30  ;;  %3879 = vmatprep.subr.mxu0 %v2326_v34  ;;  %v2351_v30 = vld [vmem:[%s6840_s5 + $0xab8] sm:$0xff]  ;;  %v631_v34 = vmul.f32 %v5375_v40, %v622_v29  ;;  %v2314_v29 = vld [vmem:[%s6840_s5 + $0x990] sm:$0xff] }
  0xf1   : > { %3935 = vmatprep.subr.mxu1 %v2358_v41  ;;  %2075 = vmatprep.mubr.f32.mxu0 %v5464_v62  ;;  %v3413_v33 = vpop.f32.mrf.mxu0  ;;  %v2324_v62 = vld [vmem:[%s6840_s5 + $0x9e0] sm:$0xff] }
  0xf2   : > { %3880 = vmatpush3.msra.mxu0 %v2310_v57  ;;  %v3469_v56 = vpop.f32.mrf.mxu1  ;;  %3936 = vmatpush3.msra.mxu1 %v2342_v7  ;;  %v2303_v7 = vld [vmem:[%s6840_s5 + $0x938] sm:$0xff] }
  0xf3   : > { %3316 = vmatmul.mubr.msk.f32.gmra.mxu0 %vm4696_vm3, %v5362_v17  ;;  %3881 = vmatprep.subr.mxu0 %v2325_v47  ;;  %v3414_v45 = vpop.f32.mrf.mxu0  ;;  %v2340_v17 = vld [vmem:[%s6840_s5 + $0xa60] sm:$0xff]  ;;  %v2335_v47 = vld [vmem:[%s6840_s5 + $0xa38] sm:$0xff] }
  0xf4   : > { %3937 = vmatprep.subr.mxu1 %v2357_v32  ;;  %v3470_v1 = vpop.f32.mrf.mxu1  ;;  %3882 = vmatpush3.msra.mxu0 %v2309_v48  ;;  %v3415_v53 = vadd.f32 %v3414_v45, %v3413_v33  ;;  %v2318_v32 = vld [vmem:[%s6840_s5 + $0x9b0] sm:$0xff] }
  0xf5   : > { %3938 = vmatpush3.msra.mxu1 %v2341_v42  ;;  %v3471_v2 = vadd.f32 %v3470_v1, %v3469_v56  ;;  %3883 = vmatprep.subr.mxu0 %v2324_v62  ;;  %v623_v42 = vld [vmem:[%s6011_s13 + $0x8] sm:$0xff]  ;;  %v2334_v62 = vld [vmem:[%s6840_s5 + $0xa30] sm:$0xff] }
  0xf6   : > { %3939 = vmatprep.subr.mxu1 %v2356_v3  ;;  %2080 = vmatprep.mubr.f32.mxu0 %v5513_v19  ;;  %v2322_v19 = vld [vmem:[%s6840_s5 + $0x9d0] sm:$0xff]  ;;  %v639_v3 = vadd.f32 %v5367_v21, %v631_v34  ;;  %v2317_v1 = vld [vmem:[%s6840_s5 + $0x9a8] sm:$0xff] }
  0xf7   : > { %3884 = vmatpush3.msra.mxu0 %v2308_v44  ;;  %v5991_v11 = vadd.f32 %v3471_v2, %v3415_v53  ;;  %3940 = vmatpush3.msra.mxu1 %v2340_v17  ;;  %v3416_v59 = vpop.f32.mrf.mxu0  ;;  %v2349_v17 = vld [vmem:[%s6840_s5 + $0xaa8] sm:$0xff]  ;;  %v656_v53 = vstv %s6071_s21  ;;  %v632_v2 = vmul.f32 %v5375_v40, %v623_v42  ;;  %v2316_v40 = vld [vmem:[%s6840_s5 + $0x9a0] sm:$0xff] }
  0xf8   : > { %3318 = vmatmul.mubr.msk.f32.gmra.mxu0 %vm4696_vm3, %v5423_v8  ;;  %v3472_v51 = vpop.f32.mrf.mxu1  ;;  %3885 = vmatprep.subr.mxu0 %v2323_v9  ;;  %v2338_v8 = vld [vmem:[%s6840_s5 + $0xa50] sm:$0xff]  ;;  %vm6114_vm5 = vcmp.eq.s32.totalorder %v656_v53, 1  ;;  %v2328_v53 = vld [vmem:[%s6840_s5 + $0xa00] sm:$0xff] }
  0xf9   : > { %3941 = vmatprep.subr.mxu1 %v2355_v12  ;;  %3886 = vmatpush3.msra.mxu0 %v2307_v54  ;;  %v3417_v49 = vpop.f32.mrf.mxu0  ;;  %v2348_v12 = vld [vmem:[%s6840_s5 + $0xaa0] sm:$0xff]  ;;  %v647_v54 = vmax.f32 %v639_v3, 0.0 }
  0xfa   : > { %3942 = vmatpush3.msra.mxu1 %v2339_v4  ;;  %v3473_v35 = vpop.f32.mrf.mxu1  ;;  %3887 = vmatprep.subr.mxu0 %v2322_v19  ;;  %v3418_v13 = vadd.f32 %v3417_v49, %v3416_v59  ;;  %v2300_v19 = vld [vmem:[%s6840_s5 + $0x920] sm:$0xff]  ;;  %v2315_v49 = vld [vmem:[%s6840_s5 + $0x998] sm:$0xff] }
  0xfb   : > { %3943 = vmatprep.subr.mxu1 %v2354_v10  ;;  %v3474_v36 = vadd.f32 %v3473_v35, %v3472_v51  ;;  %2085 = vmatprep.mubr.f32.mxu0 %v5558_v39  ;;  %v2337_v39 = vld [vmem:[%s6840_s5 + $0xa48] sm:$0xff]  ;;  %v2332_v51 = vld [vmem:[%s6840_s5 + $0xa20] sm:$0xff]  ;;  %v2347_v35 = vld [vmem:[%s6840_s5 + $0xa98] sm:$0xff] }
  0xfc   : > { %4204 = vmatprep.mubr.f32.mxu1 %v5754_v61  ;;  %3888 = vmatpush3.msra.mxu0 %v2306_v6  ;;  %v2320_v61 = vld [vmem:[%s6840_s5 + $0x9c0] sm:$0xff] }
  0xfd   : > { %3944 = vmatpush3.msra.mxu1 %v2338_v8  ;;  %v6027_v58 = vadd.f32 %v3474_v36, %v3418_v13  ;;  %3320 = vmatmul.mubr.msk.f32.gmra.mxu0 %vm4696_vm3, %v5466_v63  ;;  %v3419_v31 = vpop.f32.mrf.mxu0  ;;  %v2336_v63 = vld [vmem:[%s6840_s5 + $0xa40] sm:$0xff] }
  0xfe   : > { %4205 = vmatmul.mubr.f32.gmra.mxu1 %v5783_v16  ;;  %v3475_v5 = vpop.f32.mrf.mxu1  ;;  %3889 = vmatprep.subr.mxu0 %v2321_v24  ;;  %v6125_v6 = vld [vmem:[%s6839_s4] ss:$0 sm:$0xff]  ;;  %v2299_v24 = vld [vmem:[%s6840_s5 + $0x918] sm:$0xff] }
  0xff   : > { %3945 = vmatprep.subr.mxu1 %v2353_v52  ;;  %3890 = vmatpush3.msra.mxu0 %v2305_v26  ;;  %v3420_v16 = vpop.f32.mrf.mxu0  ;;  %v640_v8 = vadd.f32 %v6125_v6, %v632_v2  ;;  %v2331_v52 = vld [vmem:[%s6840_s5 + $0xa18] sm:$0xff]  ;;  %v658_v26 = vsel %vm6114_vm5, %v647_v54, 0.0 }
 0x100   : > { %3946 = vmatpush3.msra.mxu1 %v2337_v39  ;;  %v3476_v0 = vpop.f32.mrf.mxu1  ;;  %3891 = vmatprep.subr.mxu0 %v2320_v61  ;;  %v3421_v41 = vadd.f32 %v3420_v16, %v3419_v31  ;;  %v6146_v39 = vld [vmem:[%s6838_s3] ss:$0 sm:$0xff]  ;;  %v2346_v31 = vld [vmem:[%s6840_s5 + $0xa90] sm:$0xff]  ;;  %v6166_v16 = vrot.slane %v658_v26, 7  ;;  %v2391_v54 = vld [vmem:[%s6840_s5 + $0xbf8] sm:$0xff] }
 0x101   : > { %3947 = vmatprep.subr.mxu1 %v2352_v27  ;;  %v3477_v57 = vadd.f32 %v3476_v0, %v3475_v5  ;;  %2090 = vmatprep.mubr.f32.mxu0 %v5599_v55  ;;  %v2350_v55 = vld [vmem:[%s6840_s5 + $0xab0] sm:$0xff]  ;;  %v648_v5 = vmax.f32 %v640_v8, 0.0  ;;  %v625_v0 = vld [vmem:[%s6011_s13 + $0x18] sm:$0xff] }
 0x102   : > { %3892 = vmatpush3.msra.mxu0 %v2304_v20  ;;  %3948 = vmatpush3.msra.mxu1 %v2336_v63  ;;  %v2298_v63 = vld [vmem:[%s6840_s5 + $0x910] sm:$0xff]  ;;  %v634_v42 = vmul.f32 %v6146_v39, %v625_v0  ;;  %v690_v3 = vsel %vm531_vm0, 0.0, %v6166_v16  ;;  %v2375_v8 = vld [vmem:[%s6840_s5 + $0xb78] sm:$0xff]  ;;  %v627_v0 = vld [vmem:[%s6011_s13 + $0x28] sm:$0xff] }
 0x103   : > { %3322 = vmatmul.mubr.msk.f32.gmra.mxu0 %vm4696_vm3, %v5510_v25  ;;  %v6073_v48 = vadd.f32 %v3477_v57, %v3421_v41  ;;  %3893 = vmatprep.subr.mxu0 %v2319_v14  ;;  %v3422_v33 = vpop.f32.mrf.mxu0  ;;  %v2302_v25 = vld [vmem:[%s6840_s5 + $0x930] sm:$0xff]  ;;  %v2313_v41 = vld [vmem:[%s6840_s5 + $0x988] sm:$0xff] }
 0x104   : > { %3949 = vmatprep.subr.mxu1 %v2351_v30  ;;  %v3478_v56 = vpop.f32.mrf.mxu1  ;;  %3894 = vmatpush3.msra.mxu0 %v2303_v7  ;;  %v2345_v57 = vld [vmem:[%s6840_s5 + $0xa88] sm:$0xff]  ;;  %v2422_v26 = vld [vmem:[%s6840_s5 + $0xcf0] sm:$0xff] }
 0x105   : > { %3950 = vmatpush3.msra.mxu1 %v2335_v47  ;;  %3895 = vmatprep.subr.mxu0 %v2318_v32  ;;  %v3423_v44 = vpop.f32.mrf.mxu0  ;;  %v2297_v32 = vld [vmem:[%s6840_s5 + $0x908] sm:$0xff] }
 0x106   : > { %3951 = vmatprep.subr.mxu1 %v2350_v55  ;;  %v3479_v45 = vpop.f32.mrf.mxu1  ;;  %2095 = vmatprep.mubr.f32.mxu0 %v5632_v28  ;;  %v3424_v21 = vadd.f32 %v3423_v44, %v3422_v33  ;;  %v2301_v28 = vld [vmem:[%s6840_s5 + $0x928] sm:$0xff]  ;;  %v659_v55 = vsel %vm6114_vm5, %v648_v5, 0.0  ;;  %v698_v44 = vsel %vm531_vm0, %v6166_v16, 0.0  ;;  %v2374_v5 = vld [vmem:[%s6840_s5 + $0xb70] sm:$0xff] }
 0x107   : > { %4207 = vmatprep.mubr.f32.mxu1 %v5812_v37  ;;  %v3480_v9 = vadd.f32 %v3479_v45, %v3478_v56  ;;  %3896 = vmatpush3.msra.mxu0 %v2302_v25  ;;  %v2333_v37 = vld [vmem:[%s6840_s5 + $0xa28] sm:$0xff]  ;;  %v2312_v25 = vld [vmem:[%s6840_s5 + $0x980] sm:$0xff]  ;;  %v6209_v2 = vrot.slane %v659_v55, 7 }
 0x108   : > { %3952 = vmatpush3.msra.mxu1 %v2334_v62  ;;  %3324 = vmatmul.mubr.msk.f32.gmra.mxu0 %vm4696_vm3, %v5552_v38  ;;  %v2344_v62 = vld [vmem:[%s6840_s5 + $0xa80] sm:$0xff]  ;;  %v2363_v38 = vld [vmem:[%s6840_s5 + $0xb18] sm:$0xff] }
 0x109   : > { %4208 = vmatmul.mubr.f32.gmra.mxu1 %v5848_v15  ;;  %v6109_v4 = vadd.f32 %v3480_v9, %v3424_v21  ;;  %3897 = vmatprep.subr.mxu0 %v2317_v1  ;;  %v624_v15 = vld [vmem:[%s6011_s13 + $0x10] sm:$0xff]  ;;  %v3425_v10 = vpop.f32.mrf.mxu0  ;;  %v2296_v45 = vld [vmem:[%s6840_s5 + $0x900] sm:$0xff] }
 0x10a   : > { %3953 = vmatprep.subr.mxu1 %v2349_v17  ;;  %v3481_v59 = vpop.f32.mrf.mxu1  ;;  %3898 = vmatpush3.msra.mxu0 %v2301_v28  ;;  %v633_v61 = vmul.f32 %v6146_v39, %v624_v15  ;;  %v626_v21 = vld [vmem:[%s6011_s13 + $0x20] sm:$0xff]  ;;  %v2258_v15 = vrot.slane %v690_v3, 2 }
 0x10b   : > { %3954 = vmatpush3.msra.mxu1 %v2333_v37  ;;  %3899 = vmatprep.subr.mxu0 %v2316_v40  ;;  %v3426_v13 = vpop.f32.mrf.mxu0  ;;  %v2230_v37 = vrot.slane %v690_v3, 1  ;;  %v2231_v40 = vrot.slane %v698_v44, 1  ;;  %v636_v3 = vmul.f32 %v6146_v39, %v627_v0 }
 0x10c   : > { %3955 = vmatprep.subr.mxu1 %v2348_v12  ;;  %v3482_v36 = vpop.f32.mrf.mxu1  ;;  %2100 = vmatprep.mubr.f32.mxu0 %v5888_v60  ;;  %v3427_v60 = vadd.f32 %v3426_v13, %v3425_v10  ;;  %v641_v34 = vadd.f32 %v6125_v6, %v633_v61  ;;  %v642_v12 = vadd.f32 %v6125_v6, %v634_v42  ;;  %v2259_v10 = vrot.slane %v698_v44, 2 }
 0x10d   : > { %3900 = vmatpush3.msra.mxu0 %v2300_v19  ;;  %v3483_v27 = vadd.f32 %v3482_v36, %v3481_v59  ;;  %3956 = vmatpush3.msra.mxu1 %v2332_v51  ;;  %v2423_v19 = vld [vmem:[%s6840_s5 + $0xcf8] sm:$0xff]  ;;  %v635_v13 = vmul.f32 %v6146_v39, %v626_v21  ;;  %v691_v61 = vsel %vm531_vm0, 0.0, %v6209_v2 }
 0x10e   : > { %3326 = vmatmul.mubr.msk.f32.gmra.mxu0 %vm4696_vm3, %v5824_v50  ;;  %3901 = vmatprep.subr.mxu0 %v2315_v49  ;;  %v2330_v50 = vld [vmem:[%s6840_s5 + $0xa10] sm:$0xff]  ;;  %v649_v1 = vmax.f32 %v641_v34, 0.0  ;;  %v2407_v49 = vld [vmem:[%s6840_s5 + $0xc78] sm:$0xff]  ;;  %v6261_v34 = vsel %vm755_vm2, %v2258_v15, %v2259_v10 }
 0x10f   : > { %3957 = vmatprep.subr.mxu1 %v2347_v35  ;;  %v6158_v20 = vadd.f32 %v3483_v27, %v3427_v60  ;;  %3902 = vmatpush3.msra.mxu0 %v2299_v24  ;;  %v3428_v14 = vpop.f32.mrf.mxu0  ;;  %v699_v60 = vsel %vm531_vm0, %v6209_v2, 0.0  ;;  %v6247_v27 = vsel %vm722_vm1, %v2230_v37, %v2231_v40  ;;  %v2372_v40 = vld [vmem:[%s6840_s5 + $0xb60] sm:$0xff] }
 0x110   : > { %3958 = vmatpush3.msra.mxu1 %v2331_v52  ;;  %v3484_v30 = vpop.f32.mrf.mxu1  ;;  %3903 = vmatprep.subr.mxu0 %v2314_v29  ;;  %v660_v35 = vsel %vm6114_vm5, %v649_v1, 0.0  ;;  %v2390_v52 = vld [vmem:[%s6840_s5 + $0xbf0] sm:$0xff]  ;;  %v650_v29 = vmax.f32 %v642_v12, 0.0  ;;  %v2262_v55 = vrot.slane %v699_v60, 2  ;;  %v2388_v1 = vld [vmem:[%s6840_s5 + $0xbe0] sm:$0xff] }
 0x111   : > { %3959 = vmatprep.subr.mxu1 %v2346_v31  ;;  %2105 = vmatprep.mubr.f32.mxu0 %v4690_v18  ;;  %v3429_v7 = vpop.f32.mrf.mxu0  ;;  %v2404_v12 = vld [vmem:[%s6840_s5 + $0xc60] sm:$0xff] }
 0x112   : > { %4210 = vmatprep.mubr.f32.mxu1 %v5876_v46  ;;  %v3485_v47 = vpop.f32.mrf.mxu1  ;;  %3904 = vmatpush3.msra.mxu0 %v2298_v63  ;;  %v2329_v46 = vld [vmem:[%s6840_s5 + $0xa08] sm:$0xff]  ;;  %v3430_v33 = vadd.f32 %v3429_v7, %v3428_v14  ;;  %v2406_v63 = vld [vmem:[%s6840_s5 + $0xc70] sm:$0xff]  ;;  %v643_v7 = vadd.f32 %v6125_v6, %v635_v13  ;;  %v2419_v13 = vld [vmem:[%s6840_s5 + $0xcd8] sm:$0xff] }
 0x113   : > { %3960 = vmatpush3.msra.mxu1 %v2330_v50  ;;  %v3486_v56 = vadd.f32 %v3485_v47, %v3484_v30  ;;  %3328 = vmatmul.mubr.msk.f32.gmra.mxu0 %vm4696_vm3, %v4595_v43  ;;  %v6257_v50 = vrot.slane %v660_v35, 7  ;;  %v2389_v47 = vld [vmem:[%s6840_s5 + $0xbe8] sm:$0xff]  ;;  %v2387_v35 = vld [vmem:[%s6840_s5 + $0xbd8] sm:$0xff] }
 0x114   : > { %4211 = vmatmul.mubr.f32.gmra.mxu1 %v4701_v23  ;;  %3905 = vmatprep.subr.mxu0 %v2313_v41  ;;  %v2233_v41 = vrot.slane %v691_v61, 1 }
 0x115   : > { %3961 = vmatprep.subr.mxu1 %v2345_v57  ;;  %v6204_v17 = vadd.f32 %v3486_v56, %v3430_v33  ;;  %3906 = vmatpush3.msra.mxu0 %v2297_v32  ;;  %v3431_v9 = vpop.f32.mrf.mxu0  ;;  %v2234_v57 = vrot.slane %v699_v60, 1  ;;  %v2421_v32 = vld [vmem:[%s6840_s5 + $0xce8] sm:$0xff]  ;;  %v692_v21 = vsel %vm531_vm0, 0.0, %v6257_v50  ;;  %v2403_v60 = vld [vmem:[%s6840_s5 + $0xc58] sm:$0xff] }
 0x116   : > { %3962 = vmatpush3.msra.mxu1 %v2329_v46  ;;  %v3487_v28 = vpop.f32.mrf.mxu1  ;;  %3907 = vmatprep.subr.mxu0 %v2312_v25  ;;  %v2261_v46 = vrot.slane %v691_v61, 2  ;;  %v2373_v56 = vld [vmem:[%s6840_s5 + $0xb68] sm:$0xff]  ;;  %v2371_v61 = vld [vmem:[%s6840_s5 + $0xb58] sm:$0xff] }
 0x117   : > { %3963 = vmatprep.subr.mxu1 %v2344_v62  ;;  %3908 = vmatpush3.msra.mxu0 %v2296_v45  ;;  %v3432_v59 = vpop.f32.mrf.mxu0  ;;  %v2405_v25 = vld [vmem:[%s6840_s5 + $0xc68] sm:$0xff]  ;;  %v661_v62 = vsel %vm6114_vm5, %v650_v29, 0.0 }
 0x118   : > { %2504 = vmatprep.mubr.f32.mxu0 %v4690_v18  ;;  %v3488_v51 = vpop.f32.mrf.mxu1  ;;  %3964 = vmatpush3.msra.mxu1 %v2328_v53  ;;  %v3433_v36 = vadd.f32 %v3432_v59, %v3431_v9  ;;  %v2420_v53 = vld [vmem:[%s6840_s5 + $0xce0] sm:$0xff]  ;;  %v700_v9 = vsel %vm531_vm0, %v6257_v50, 0.0  ;;  %v6312_v59 = vsel %vm755_vm2, %v2261_v46, %v2262_v55  ;;  %v2370_v46 = vld [vmem:[%s6840_s5 + $0xb50] sm:$0xff] }
 0x119   : > { %3346 = vmatprep.mubr.msk.f32.mxu1 %vm4696_vm3, %v6166_v16  ;;  %v3489_v24 = vadd.f32 %v3488_v51, %v3487_v28  ;;  %3330 = vmatmul.mubr.msk.f32.vlgmr.msra.gmra.mxu0 %vm4696_vm3, %v4595_v43  ;;  %v651_v28 = vmax.f32 %v643_v7, 0.0  ;;  %v2236_v51 = vrot.slane %v692_v21, 1  ;;  %v2402_v55 = vld [vmem:[%s6840_s5 + $0xc50] sm:$0xff] }
 0x11a   : > { %2610 = vmatmul.mubr.f32.vlgmr.msra.gmra.mxu1 %v4701_v23  ;;  %3989 = vmatprep.subr.mxu0 %v2391_v54  ;;  %v6308_v54 = vrot.slane %v661_v62, 7 }
 0x11b   : > { %4045 = vmatprep.subr.mxu1 %v2423_v19  ;;  %v6249_v31 = vadd.f32 %v3489_v24, %v3433_v36  ;;  %3990 = vmatpush3.msra.mxu0 %v2375_v8  ;;  %v3434_v14 = vpop.f32.mrf.mxu0  ;;  %v628_v19 = vld [vmem:[%s6011_s13 + $0x30] sm:$0xff]  ;;  %v2237_v8 = vrot.slane %v700_v9, 1  ;;  %v2264_v36 = vrot.slane %v692_v21, 2  ;;  %v2265_v24 = vrot.slane %v700_v9, 2 }
 0x11c   : > { %4046 = vmatpush3.msra.mxu1 %v2407_v49  ;;  %v3490_v30 = vpop.f32.mrf.mxu1  ;;  %3991 = vmatprep.subr.mxu0 %v2390_v52  ;;  %v644_v49 = vadd.f32 %v6125_v6, %v636_v3  ;;  %v662_v29 = vsel %vm6114_vm5, %v651_v28, 0.0 }
 0x11d   : > { %4047 = vmatprep.subr.mxu1 %v2422_v26  ;;  %2509 = vmatprep.mubr.f32.mxu0 %v6247_v27  ;;  %v3435_v42 = vpop.f32.mrf.mxu0  ;;  %v6349_v7 = vsel %vm722_vm1, %v2236_v51, %v2237_v8  ;;  %v2384_v51 = vld [vmem:[%s6840_s5 + $0xbc0] sm:$0xff] }
 0x11e   : > { %3348 = vmatprep.mubr.msk.f32.mxu1 %vm4696_vm3, %v6209_v2  ;;  %v3491_v33 = vpop.f32.mrf.mxu1  ;;  %3992 = vmatpush3.msra.mxu0 %v2374_v5  ;;  %v3436_v44 = vadd.f32 %v3435_v42, %v3434_v14  ;;  %v637_v5 = vmul.f32 %v6146_v39, %v628_v19  ;;  %v2386_v14 = vld [vmem:[%s6840_s5 + $0xbd0] sm:$0xff]  ;;  %v6359_v42 = vsel %vm755_vm2, %v2264_v36, %v2265_v24  ;;  %v2416_v8 = vld [vmem:[%s6840_s5 + $0xcc0] sm:$0xff] }
 0x11f   : > { %4048 = vmatpush3.msra.mxu1 %v2406_v63  ;;  %v3492_v45 = vadd.f32 %v3491_v33, %v3490_v30  ;;  %3332 = vmatmul.mubr.msk.f32.gmra.mxu0 %vm4696_vm3, %v6166_v16  ;;  %v6298_v16 = vsel %vm722_vm1, %v2233_v41, %v2234_v57  ;;  %v2418_v30 = vld [vmem:[%s6840_s5 + $0xcd0] sm:$0xff]  ;;  %v693_v41 = vsel %vm531_vm0, 0.0, %v6308_v54  ;;  %v701_v57 = vsel %vm531_vm0, %v6308_v54, 0.0 }
 0x120   : > { %2615 = vmatmul.mubr.f32.gmra.mxu1 %v6261_v34  ;;  %3993 = vmatprep.subr.mxu0 %v2389_v47  ;;  %v652_v47 = vmax.f32 %v644_v49, 0.0  ;;  %v6361_v33 = vrot.slane %v662_v29, 7  ;;  %v2240_v62 = vrot.slane %v701_v57, 1  ;;  %v645_v3 = vadd.f32 %v6125_v6, %v637_v5 }
 0x121   : > { %4049 = vmatprep.subr.mxu1 %v2421_v32  ;;  %v6300_v37 = vadd.f32 %v3492_v45, %v3436_v44  ;;  %3994 = vmatpush3.msra.mxu0 %v2373_v56  ;;  %v3525_v15 = vpop.f32.mrf.mxu0  ;;  %v2385_v45 = vld [vmem:[%s6840_s5 + $0xbc8] sm:$0xff]  ;;  %v2268_v21 = vrot.slane %v701_v57, 2  ;;  %v2415_v57 = vld [vmem:[%s6840_s5 + $0xcb8] sm:$0xff] }
 0x122   : > { %4050 = vmatpush3.msra.mxu1 %v2405_v25  ;;  %v3581_v10 = vpop.f32.mrf.mxu1  ;;  %3995 = vmatprep.subr.mxu0 %v2388_v1  ;;  %v2417_v1 = vld [vmem:[%s6840_s5 + $0xcc8] sm:$0xff]  ;;  %v663_v19 = vsel %vm6114_vm5, %v652_v47, 0.0  ;;  %v694_v49 = vsel %vm531_vm0, 0.0, %v6361_v33  ;;  %v653_v24 = vmax.f32 %v645_v3, 0.0  ;;  %v2382_v3 = vld [vmem:[%s6840_s5 + $0xbb0] sm:$0xff] }
 0x123   : > { %4051 = vmatprep.subr.mxu1 %v2420_v53  ;;  %2514 = vmatprep.mubr.f32.mxu0 %v6298_v16  ;;  %v3526_v52 = vpop.f32.mrf.mxu0  ;;  %v2267_v53 = vrot.slane %v693_v41, 2  ;;  %v6412_v29 = vrot.slane %v663_v19, 7  ;;  %v2270_v47 = vrot.slane %v694_v49, 2 }
 0x124   : > { %3350 = vmatprep.mubr.msk.f32.mxu1 %vm4696_vm3, %v6257_v50  ;;  %v3582_v26 = vpop.f32.mrf.mxu1  ;;  %3996 = vmatpush3.msra.mxu0 %v2372_v40  ;;  %v3527_v63 = vadd.f32 %v3526_v52, %v3525_v15  ;;  %v2369_v40 = vld [vmem:[%s6840_s5 + $0xb48] sm:$0xff] }
 0x125   : > { %4052 = vmatpush3.msra.mxu1 %v2404_v12  ;;  %v3583_v0 = vadd.f32 %v3582_v26, %v3581_v10  ;;  %3334 = vmatmul.mubr.msk.f32.gmra.mxu0 %vm4696_vm3, %v6209_v2  ;;  %v2401_v12 = vld [vmem:[%s6840_s5 + $0xc48] sm:$0xff]  ;;  %v2368_v26 = vld [vmem:[%s6840_s5 + $0xb40] sm:$0xff] }
 0x126   : > { %2620 = vmatmul.mubr.f32.gmra.mxu1 %v6312_v59  ;;  %3997 = vmatprep.subr.mxu0 %v2387_v35  ;;  %v1443_v32 = vadd.f32 %v3527_v63, %v5991_v11  ;;  %v2239_v11 = vrot.slane %v693_v41, 1  ;;  %v702_v35 = vsel %vm531_vm0, %v6361_v33, 0.0  ;;  %v2383_v41 = vld [vmem:[%s6840_s5 + $0xbb8] sm:$0xff] }
 0x127   : > { %4053 = vmatprep.subr.mxu1 %v2419_v13  ;;  %3998 = vmatpush3.msra.mxu0 %v2371_v61  ;;  %v3528_v56 = vpop.f32.mrf.mxu0  ;;  %v629_v13 = vld [vmem:[%s6011_s13 + $0x38] sm:$0xff]  ;;  %v2400_v61 = vld [vmem:[%s6840_s5 + $0xc40] sm:$0xff]  ;;  %s6796_s13 = scalar_lea.vmem %s6841_s6, %s3219_s11  ;;  %s443_s11 = sadd.s32 %s3229_s12, %s4519_s16 }
 0x128   : > { %4054 = vmatpush3.msra.mxu1 %v2403_v60  ;;  %v3584_v25 = vpop.f32.mrf.mxu1  ;;  %3999 = vmatprep.subr.mxu0 %v2386_v14  ;;  %v6364_v44 = vadd.f32 %v3583_v0, %v1443_v32  ;;  %v6400_v36 = vsel %vm722_vm1, %v2239_v11, %v2240_v62  ;;  %v6410_v60 = vsel %vm755_vm2, %v2267_v53, %v2268_v21  ;;  %v2243_v0 = vrot.slane %v702_v35, 1  ;;  %s3230_s8 = sshll.u32 %s443_s11, 1 }
 0x129   : > { %4055 = vmatprep.subr.mxu1 %v2418_v30  ;;  %2519 = vmatprep.mubr.f32.mxu0 %v6349_v7  ;;  %v3529_v9 = vpop.f32.mrf.mxu0  ;;  %v638_v14 = vmul.f32 %v6146_v39, %v629_v13  ;;  %v2367_v39 = vld [vmem:[%s6840_s5 + $0xb38] sm:$0xff]  ;;  %v703_v53 = vsel %vm531_vm0, %v6412_v29, 0.0  ;;  %s445_s10 = scalar_lea.vmem %s6842_s7, %s3230_s8 }
 0x12a   : > { %3352 = vmatprep.mubr.msk.f32.mxu1 %vm4696_vm3, %v6308_v54  ;;  %v3585_v28 = vpop.f32.mrf.mxu1  ;;  %4000 = vmatpush3.msra.mxu0 %v2370_v46  ;;  %v3530_v15 = vadd.f32 %v3529_v9, %v3528_v56  ;;  %v2271_v56 = vrot.slane %v702_v35, 2  ;;  %v2413_v35 = vld [vmem:[%s6840_s5 + $0xca8] sm:$0xff] }
 0x12b   : > { %4056 = vmatpush3.msra.mxu1 %v2402_v55  ;;  %v3586_v10 = vadd.f32 %v3585_v28, %v3584_v25  ;;  %3336 = vmatmul.mubr.msk.f32.gmra.mxu0 %vm4696_vm3, %v6257_v50  ;;  %v2399_v55 = vld [vmem:[%s6840_s5 + $0xc38] sm:$0xff]  ;;  %v664_v25 = vsel %vm6114_vm5, %v653_v24, 0.0  ;;  %v646_v9 = vadd.f32 %v6125_v6, %v638_v14  ;;  %v2274_v24 = vrot.slane %v703_v53, 2  ;;  %v2380_v14 = vld [vmem:[%s6840_s5 + $0xba0] sm:$0xff] }
 0x12c   : > { %2625 = vmatmul.mubr.f32.gmra.mxu1 %v6359_v42  ;;  %4001 = vmatprep.subr.mxu0 %v2385_v45  ;;  %v1448_v52 = vadd.f32 %v3530_v15, %v6027_v58  ;;  %v2242_v58 = vrot.slane %v694_v49, 1  ;;  %v2414_v45 = vld [vmem:[%s6840_s5 + $0xcb0] sm:$0xff]  ;;  %v6460_v19 = vrot.slane %v664_v25, 7  ;;  %v6463_v6 = vsel %vm755_vm2, %v2270_v47, %v2271_v56  ;;  %v2381_v49 = vld [vmem:[%s6840_s5 + $0xba8] sm:$0xff] }
 0x12d   : > { %4057 = vmatprep.subr.mxu1 %v2417_v1  ;;  %4002 = vmatpush3.msra.mxu0 %v2369_v40  ;;  %v3531_v5 = vpop.f32.mrf.mxu0  ;;  %v695_v1 = vsel %vm531_vm0, 0.0, %v6412_v29  ;;  %v2366_v40 = vld [vmem:[%s6840_s5 + $0xb30] sm:$0xff] }
 0x12e   : > { %4058 = vmatpush3.msra.mxu1 %v2401_v12  ;;  %v3587_v63 = vpop.f32.mrf.mxu1  ;;  %4003 = vmatprep.subr.mxu0 %v2384_v51  ;;  %v6415_v30 = vadd.f32 %v3586_v10, %v1448_v52  ;;  %v6450_v21 = vsel %vm722_vm1, %v2242_v58, %v2243_v0  ;;  %v2398_v12 = vld [vmem:[%s6840_s5 + $0xc30] sm:$0xff]  ;;  %v2246_v51 = vrot.slane %v703_v53, 1  ;;  %v2273_v13 = vrot.slane %v695_v1, 2  ;;  %v2411_v53 = vld [vmem:[%s6840_s5 + $0xc98] sm:$0xff] }
 0x12f   : > { %4059 = vmatprep.subr.mxu1 %v2416_v8  ;;  %2524 = vmatprep.mubr.f32.mxu0 %v6400_v36  ;;  %v3532_v32 = vpop.f32.mrf.mxu0  ;;  %v704_v47 = vsel %vm531_vm0, %v6460_v19, 0.0 }
 0x130   : > { %3354 = vmatprep.mubr.msk.f32.mxu1 %vm4696_vm3, %v6361_v33  ;;  %v3588_v46 = vpop.f32.mrf.mxu1  ;;  %4004 = vmatpush3.msra.mxu0 %v2368_v26  ;;  %v3533_v11 = vadd.f32 %v3532_v32, %v3531_v5  ;;  %v2397_v5 = vld [vmem:[%s6840_s5 + $0xc28] sm:$0xff]  ;;  %v6508_v56 = vsel %vm755_vm2, %v2273_v13, %v2274_v24 }
 0x131   : > { %4060 = vmatpush3.msra.mxu1 %v2400_v61  ;;  %v3589_v62 = vadd.f32 %v3588_v46, %v3587_v63  ;;  %3338 = vmatmul.mubr.msk.f32.gmra.mxu0 %vm4696_vm3, %v6308_v54  ;;  %v2365_v61 = vld [vmem:[%s6840_s5 + $0xb28] sm:$0xff]  ;;  %v654_v63 = vmax.f32 %v646_v9, 0.0 }
 0x132   : > { %2630 = vmatmul.mubr.f32.gmra.mxu1 %v6410_v60  ;;  %4005 = vmatprep.subr.mxu0 %v2383_v41  ;;  %v1453_v28 = vadd.f32 %v3533_v11, %v6073_v48  ;;  %v2245_v48 = vrot.slane %v695_v1, 1  ;;  %v2412_v41 = vld [vmem:[%s6840_s5 + $0xca0] sm:$0xff]  ;;  %v2379_v1 = vld [vmem:[%s6840_s5 + $0xb98] sm:$0xff] }
 0x133   : > { %4061 = vmatprep.subr.mxu1 %v2415_v57  ;;  %4006 = vmatpush3.msra.mxu0 %v2367_v39  ;;  %v3534_v15 = vpop.f32.mrf.mxu0  ;;  %v696_v57 = vsel %vm531_vm0, 0.0, %v6460_v19  ;;  %v2364_v39 = vld [vmem:[%s6840_s5 + $0xb20] sm:$0xff] }
 0x134   : > { %4062 = vmatpush3.msra.mxu1 %v2399_v55  ;;  %v3590_v10 = vpop.f32.mrf.mxu1  ;;  %4007 = vmatprep.subr.mxu0 %v2382_v3  ;;  %v6465_v8 = vadd.f32 %v3589_v62, %v1453_v28  ;;  %v6498_v32 = vsel %vm722_vm1, %v2245_v48, %v2246_v51  ;;  %v2396_v55 = vld [vmem:[%s6840_s5 + $0xc20] sm:$0xff]  ;;  %v2248_v62 = vrot.slane %v696_v57, 1  ;;  %v2249_v3 = vrot.slane %v704_v47, 1  ;;  %v2378_v51 = vld [vmem:[%s6840_s5 + $0xb90] sm:$0xff] }
 0x135   : > { %4063 = vmatprep.subr.mxu1 %v2414_v45  ;;  %2529 = vmatprep.mubr.f32.mxu0 %v6450_v21  ;;  %v3535_v52 = vpop.f32.mrf.mxu0 }
 0x136   : > { %3356 = vmatprep.mubr.msk.f32.mxu1 %vm4696_vm3, %v6412_v29  ;;  %v3591_v26 = vpop.f32.mrf.mxu1  ;;  %4008 = vmatpush3.msra.mxu0 %v2366_v40  ;;  %v3536_v58 = vadd.f32 %v3535_v52, %v3534_v15  ;;  %v2395_v40 = vld [vmem:[%s6840_s5 + $0xc18] sm:$0xff]  ;;  %v2277_v15 = vrot.slane %v704_v47, 2  ;;  %v6543_v13 = vsel %vm722_vm1, %v2248_v62, %v2249_v3  ;;  %v2362_v52 = vld [vmem:[%s6840_s5 + $0xb10] sm:$0xff]  ;;  %v2393_v47 = vld [vmem:[%s6840_s5 + $0xc08] sm:$0xff] }
 0x137   : > { %4064 = vmatpush3.msra.mxu1 %v2398_v12  ;;  %v3592_v0 = vadd.f32 %v3591_v26, %v3590_v10  ;;  %3340 = vmatmul.mubr.msk.f32.gmra.mxu0 %vm4696_vm3, %v6361_v33  ;;  %v2276_v12 = vrot.slane %v696_v57, 2  ;;  %v2394_v26 = vld [vmem:[%s6840_s5 + $0xc10] sm:$0xff]  ;;  %v2361_v57 = vld [vmem:[%s6840_s5 + $0xb08] sm:$0xff]  ;;  %v2392_v3 = vld [vmem:[%s6840_s5 + $0xc00] sm:$0xff] }
 0x138   : > { %2635 = vmatmul.mubr.f32.gmra.mxu1 %v6463_v6  ;;  %4009 = vmatprep.subr.mxu0 %v2381_v49  ;;  %v1458_v46 = vadd.f32 %v3536_v58, %v6109_v4  ;;  %v665_v4 = vsel %vm6114_vm5, %v654_v63, 0.0  ;;  %v2410_v49 = vld [vmem:[%s6840_s5 + $0xc90] sm:$0xff] }
 0x139   : > { %4065 = vmatprep.subr.mxu1 %v2413_v35  ;;  %4010 = vmatpush3.msra.mxu0 %v2365_v61  ;;  %v3537_v25 = vpop.f32.mrf.mxu0  ;;  %v6540_v35 = vrot.slane %v665_v4, 7  ;;  %v6553_v63 = vsel %vm755_vm2, %v2276_v12, %v2277_v15 }
 0x13a   : > { %4066 = vmatpush3.msra.mxu1 %v2397_v5  ;;  %v3593_v11 = vpop.f32.mrf.mxu1  ;;  %4011 = vmatprep.subr.mxu0 %v2380_v14  ;;  %v6512_v45 = vadd.f32 %v3592_v0, %v1458_v46  ;;  %v2409_v0 = vld [vmem:[%s6840_s5 + $0xc88] sm:$0xff] }
 0x13b   : > { %4067 = vmatprep.subr.mxu1 %v2412_v41  ;;  %2534 = vmatprep.mubr.f32.mxu0 %v6498_v32  ;;  %v3538_v9 = vpop.f32.mrf.mxu0 }
 0x13c   : > { %3358 = vmatprep.mubr.msk.f32.mxu1 %vm4696_vm3, %v6460_v19  ;;  %v3594_v28 = vpop.f32.mrf.mxu1  ;;  %4012 = vmatpush3.msra.mxu0 %v2364_v39  ;;  %v3539_v10 = vadd.f32 %v3538_v9, %v3537_v25  ;;  %v2408_v25 = vld [vmem:[%s6840_s5 + $0xc80] sm:$0xff]  ;;  %v2439_v9 = vld [vmem:[%s6840_s5 + $0xd78] sm:$0xff] }
 0x13d   : > { %4068 = vmatpush3.msra.mxu1 %v2396_v55  ;;  %v3595_v48 = vadd.f32 %v3594_v28, %v3593_v11  ;;  %3342 = vmatmul.mubr.msk.f32.gmra.mxu0 %vm4696_vm3, %v6412_v29  ;;  %v2376_v55 = vld [vmem:[%s6840_s5 + $0xb80] sm:$0xff] }
 0x13e   : > { %2640 = vmatmul.mubr.f32.gmra.mxu1 %v6508_v56  ;;  %4013 = vmatprep.subr.mxu0 %v2379_v1  ;;  %v1463_v24 = vadd.f32 %v3539_v10, %v6158_v20  ;;  %v2377_v20 = vld [vmem:[%s6840_s5 + $0xb88] sm:$0xff]  ;;  %v2360_v11 = vld [vmem:[%s6840_s5 + $0xb00] sm:$0xff] }
 0x13f   : > { %4069 = vmatprep.subr.mxu1 %v2411_v53  ;;  %4014 = vmatpush3.msra.mxu0 %v2363_v38  ;;  %v3540_v61 = vpop.f32.mrf.mxu0 }
 0x140   : > { %4070 = vmatpush3.msra.mxu1 %v2395_v40  ;;  %v3596_v5 = vpop.f32.mrf.mxu1  ;;  %4015 = vmatprep.subr.mxu0 %v2378_v51  ;;  %v6555_v58 = vadd.f32 %v3595_v48, %v1463_v24  ;;  %v2436_v24 = vld [vmem:[%s6840_s5 + $0xd60] sm:$0xff] }
 0x141   : > { %4071 = vmatprep.subr.mxu1 %v2410_v49  ;;  %2539 = vmatprep.mubr.f32.mxu0 %v6543_v13  ;;  %v3541_v14 = vpop.f32.mrf.mxu0 }
 0x142   : > { %3360 = vmatprep.mubr.msk.f32.mxu1 %vm4696_vm3, %v6540_v35  ;;  %v3597_v41 = vpop.f32.mrf.mxu1  ;;  %4016 = vmatpush3.msra.mxu0 %v2362_v52  ;;  %v3542_v46 = vadd.f32 %v3541_v14, %v3540_v61 }
 0x143   : > { %4072 = vmatpush3.msra.mxu1 %v2394_v26  ;;  %v3598_v39 = vadd.f32 %v3597_v41, %v3596_v5  ;;  %3344 = vmatmul.mubr.msk.f32.gmra.mxu0 %vm4696_vm3, %v6460_v19 }
 0x144   : > { %2645 = vmatmul.mubr.f32.gmra.mxu1 %v6553_v63  ;;  %4017 = vmatprep.subr.mxu0 %v2377_v20  ;;  %v1468_v62 = vadd.f32 %v3542_v46, %v6204_v17 }
 0x145   : > { %4073 = vmatprep.subr.mxu1 %v2409_v0  ;;  %4018 = vmatpush3.msra.mxu0 %v2361_v57  ;;  %v3543_v4 = vpop.f32.mrf.mxu0 }
 0x146   : > { %4074 = vmatpush3.msra.mxu1 %v2393_v47  ;;  %v3599_v1 = vpop.f32.mrf.mxu1  ;;  %4019 = vmatprep.subr.mxu0 %v2376_v55  ;;  %v6590_v53 = vadd.f32 %v3598_v39, %v1468_v62 }
 0x147   : > { %4075 = vmatprep.subr.mxu1 %v2408_v25  ;;  %4020 = vmatpush3.msra.mxu0 %v2360_v11  ;;  %v3544_v17 = vpop.f32.mrf.mxu0 }
 0x148   : > { %2714 = vmatprep.mubr.f32.mxu0 %v6261_v34  ;;  %v3600_v28 = vpop.f32.mrf.mxu1  ;;  %4076 = vmatpush3.msra.mxu1 %v2392_v3  ;;  %v3545_v38 = vadd.f32 %v3544_v17, %v3543_v4  ;;  %v2438_v34 = vld [vmem:[%s6840_s5 + $0xd70] sm:$0xff]  ;;  %v705_v17 = vsel %vm531_vm0, %v6540_v35, 0.0 }
 0x149   : > { %2819 = vmatprep.mubr.f32.mxu1 %v6298_v16  ;;  %v3601_v40 = vadd.f32 %v3600_v28, %v3599_v1  ;;  %2715 = vmatmul.mubr.f32.vlgmr.msra.gmra.mxu0 %v6247_v27 }
 0x14a   : > { %3362 = vmatmul.mubr.msk.f32.vlgmr.msra.gmra.mxu1 %vm4696_vm3, %v6209_v2  ;;  %4213 = vmatprep.subr.mxu0 %v2439_v9  ;;  %v1473_v12 = vadd.f32 %v3545_v38, %v6249_v31  ;;  %v2437_v2 = vld [vmem:[%s6840_s5 + $0xd68] sm:$0xff]  ;;  %v2289_v38 = vrot.slane %v705_v17, 1 }
 0x14b   : > { %4257 = vmatprep.subr.mxu1 %v2439_v9  ;;  %4214 = vmatpush3.msra.mxu0 %v2439_v9  ;;  %v3546_v15 = vpop.f32.mrf.mxu0 }
 0x14c   : > { %4273 = vmatpush3.msra.mxu1 %v2439_v9  ;;  %v3602_v10 = vpop.f32.mrf.mxu1  ;;  %4215 = vmatprep.subr.mxu0 %v2438_v34  ;;  %v6605_v48 = vadd.f32 %v3601_v40, %v1473_v12  ;;  %v697_v9 = vsel %vm531_vm0, 0.0, %v6540_v35 }
 0x14d   : > { %4258 = vmatprep.subr.mxu1 %v2438_v34  ;;  %2719 = vmatprep.mubr.f32.mxu0 %v6312_v59  ;;  %v3547_v27 = vpop.f32.mrf.mxu0 }
 0x14e   : > { %2824 = vmatprep.mubr.f32.mxu1 %v6349_v7  ;;  %v3603_v51 = vpop.f32.mrf.mxu1  ;;  %4216 = vmatpush3.msra.mxu0 %v2438_v34  ;;  %v3548_v31 = vadd.f32 %v3547_v27, %v3546_v15  ;;  %v2428_v27 = vld [vmem:[%s6840_s5 + $0xd20] sm:$0xff] }
 0x14f   : > { %4274 = vmatpush3.msra.mxu1 %v2438_v34  ;;  %v3604_v49 = vadd.f32 %v3603_v51, %v3602_v10  ;;  %2720 = vmatmul.mubr.f32.gmra.mxu0 %v6298_v16  ;;  %v2429_v34 = vld [vmem:[%s6840_s5 + $0xd28] sm:$0xff] }
 0x150   : > { %3364 = vmatmul.mubr.msk.f32.gmra.mxu1 %vm4696_vm3, %v6257_v50  ;;  %4217 = vmatprep.subr.mxu0 %v2437_v2  ;;  %v1478_v52 = vadd.f32 %v3548_v31, %v6300_v37  ;;  %v2435_v50 = vld [vmem:[%s6840_s5 + $0xd58] sm:$0xff] }
 0x151   : > { %4259 = vmatprep.subr.mxu1 %v2437_v2  ;;  %4218 = vmatpush3.msra.mxu0 %v2437_v2  ;;  %v4159_v26 = vpop.f32.mrf.mxu0 }
 0x152   : > { %4275 = vmatpush3.msra.mxu1 %v2437_v2  ;;  %v3661_v61 = vpop.f32.mrf.mxu1  ;;  %4219 = vmatprep.subr.mxu0 %v2436_v24  ;;  %v1658_v16 = vadd.f32 %v4159_v26, %v6415_v30  ;;  %v6621_v5 = vadd.f32 %v3604_v49, %v1478_v52  ;;  %v2434_v30 = vld [vmem:[%s6840_s5 + $0xd50] sm:$0xff]  ;;  %v2293_v49 = vrot.slane %v705_v17, 2 }
 0x153   : > { %4260 = vmatprep.subr.mxu1 %v2436_v24  ;;  %2724 = vmatprep.mubr.f32.mxu0 %v6359_v42  ;;  %v1652_v20 = vpop.f32.mrf.mxu0  ;;  %v2426_v26 = vld [vmem:[%s6840_s5 + $0xd10] sm:$0xff] }
 0x154   : > { %2829 = vmatprep.mubr.f32.mxu1 %v6400_v36  ;;  %v3662_v37 = vpop.f32.mrf.mxu1  ;;  %4220 = vmatpush3.msra.mxu0 %v2436_v24  ;;  %v1653_v0 = vadd.f32 %v1652_v20, %v6364_v44  ;;  %v2424_v20 = vld [vmem:[%s6840_s5 + $0xd00] sm:$0xff] }
 0x155   : > { %4276 = vmatpush3.msra.mxu1 %v2436_v24  ;;  %v3663_v14 = vadd.f32 %v3662_v37, %v3661_v61  ;;  %2725 = vmatmul.mubr.f32.gmra.mxu0 %v6349_v7 }
 0x156   : > { %3366 = vmatmul.mubr.msk.f32.gmra.mxu1 %vm4696_vm3, %v6308_v54  ;;  %4221 = vmatprep.subr.mxu0 %v2435_v50  ;;  %v2433_v54 = vld [vmem:[%s6840_s5 + $0xd48] sm:$0xff] }
 0x157   : > { %4261 = vmatprep.subr.mxu1 %v2435_v50  ;;  %v6636_v41 = vadd.f32 %v3663_v14, %v1653_v0  ;;  %4222 = vmatpush3.msra.mxu0 %v2435_v50  ;;  %v4162_v57 = vpop.f32.mrf.mxu0 }
 0x158   : > { %4277 = vmatpush3.msra.mxu1 %v2435_v50  ;;  %v3664_v47 = vpop.f32.mrf.mxu1  ;;  %4223 = vmatprep.subr.mxu0 %v2434_v30  ;;  %v6639_v7 = vadd.f32 %v4162_v57, %v6512_v45  ;;  %v2432_v45 = vld [vmem:[%s6840_s5 + $0xd40] sm:$0xff] }
 0x159   : > { %4262 = vmatprep.subr.mxu1 %v2434_v30  ;;  %2729 = vmatprep.mubr.f32.mxu0 %v6410_v60  ;;  %v1662_v44 = vpop.f32.mrf.mxu0 }
 0x15a   : > { %2834 = vmatprep.mubr.f32.mxu1 %v6450_v21  ;;  %v3665_v46 = vpop.f32.mrf.mxu1  ;;  %4224 = vmatpush3.msra.mxu0 %v2434_v30  ;;  %v1663_v39 = vadd.f32 %v1662_v44, %v6465_v8 }
 0x15b   : > { %4278 = vmatpush3.msra.mxu1 %v2434_v30  ;;  %v3666_v55 = vadd.f32 %v3665_v46, %v3664_v47  ;;  %2730 = vmatmul.mubr.f32.gmra.mxu0 %v6400_v36 }
 0x15c   : > { %3368 = vmatmul.mubr.msk.f32.gmra.mxu1 %vm4696_vm3, %v6361_v33  ;;  %4225 = vmatprep.subr.mxu0 %v2433_v54  ;;  %v2431_v33 = vld [vmem:[%s6840_s5 + $0xd38] sm:$0xff] }
 0x15d   : > { %4263 = vmatprep.subr.mxu1 %v2433_v54  ;;  %v6654_v25 = vadd.f32 %v3666_v55, %v1658_v16  ;;  %4226 = vmatpush3.msra.mxu0 %v2433_v54  ;;  %v4165_v11 = vpop.f32.mrf.mxu0 }
 0x15e   : > { %4279 = vmatpush3.msra.mxu1 %v2433_v54  ;;  %v3667_v62 = vpop.f32.mrf.mxu1  ;;  %4227 = vmatprep.subr.mxu0 %v2432_v45  ;;  %v6657_v36 = vadd.f32 %v4165_v11, %v6590_v53  ;;  %v2430_v53 = vld [vmem:[%s6840_s5 + $0xd30] sm:$0xff] }
 0x15f   : > { %4264 = vmatprep.subr.mxu1 %v2432_v45  ;;  %2734 = vmatprep.mubr.f32.mxu0 %v6463_v6  ;;  %v1672_v8 = vpop.f32.mrf.mxu0 }
 0x160   : > { %2839 = vmatprep.mubr.f32.mxu1 %v6498_v32  ;;  %v3668_v3 = vpop.f32.mrf.mxu1  ;;  %4228 = vmatpush3.msra.mxu0 %v2432_v45  ;;  %v1673_v4 = vadd.f32 %v1672_v8, %v6555_v58 }
 0x161   : > { %4280 = vmatpush3.msra.mxu1 %v2432_v45  ;;  %v3669_v1 = vadd.f32 %v3668_v3, %v3667_v62  ;;  %2735 = vmatmul.mubr.f32.gmra.mxu0 %v6450_v21 }
 0x162   : > { %3370 = vmatmul.mubr.msk.f32.gmra.mxu1 %vm4696_vm3, %v6412_v29  ;;  %4229 = vmatprep.subr.mxu0 %v2431_v33  ;;  %v2288_v29 = vrot.slane %v697_v9, 1 }
 0x163   : > { %4265 = vmatprep.subr.mxu1 %v2431_v33  ;;  %v6676_v58 = vadd.f32 %v3669_v1, %v1663_v39  ;;  %4230 = vmatpush3.msra.mxu0 %v2431_v33  ;;  %v4168_v21 = vpop.f32.mrf.mxu0 }
 0x164   : > { %4281 = vmatpush3.msra.mxu1 %v2431_v33  ;;  %v3670_v28 = vpop.f32.mrf.mxu1  ;;  %4231 = vmatprep.subr.mxu0 %v2430_v53  ;;  %v6679_v40 = vadd.f32 %v4168_v21, %v6621_v5  ;;  %v2290_v51 = vsel %vm722_vm1, %v2288_v29, %v2289_v38 }
 0x165   : > { %4266 = vmatprep.subr.mxu1 %v2430_v53  ;;  %2739 = vmatprep.mubr.f32.mxu0 %v6508_v56  ;;  %v1682_v12 = vpop.f32.mrf.mxu0 }
 0x166   : > { %2844 = vmatprep.mubr.f32.mxu1 %v6543_v13  ;;  %v3671_v15 = vpop.f32.mrf.mxu1  ;;  %4232 = vmatpush3.msra.mxu0 %v2430_v53  ;;  %v1683_v10 = vadd.f32 %v1682_v12, %v6605_v48 }
 0x167   : > { %4282 = vmatpush3.msra.mxu1 %v2430_v53  ;;  %v3672_v2 = vadd.f32 %v3671_v15, %v3670_v28  ;;  %2740 = vmatmul.mubr.f32.gmra.mxu0 %v6498_v32  ;;  %v2292_v32 = vrot.slane %v697_v9, 2 }
 0x168   : > { %3372 = vmatmul.mubr.msk.f32.gmra.mxu1 %vm4696_vm3, %v6460_v19  ;;  %4233 = vmatprep.subr.mxu0 %v2429_v34  ;;  %v2427_v19 = vld [vmem:[%s6840_s5 + $0xd18] sm:$0xff] }
 0x169   : > { %4267 = vmatprep.subr.mxu1 %v2429_v34  ;;  %v6696_v31 = vadd.f32 %v3672_v2, %v6639_v7  ;;  %4234 = vmatpush3.msra.mxu0 %v2429_v34  ;;  %v3673_v48 = vpop.f32.mrf.mxu1  ;;  %v2294_v61 = vsel %vm755_vm2, %v2292_v32, %v2293_v49 }
 0x16a   : > { %4283 = vmatpush3.msra.mxu1 %v2429_v34  ;;  %4235 = vmatprep.subr.mxu0 %v2428_v27 }
 0x16b   : > { %4268 = vmatprep.subr.mxu1 %v2428_v27  ;;  %2744 = vmatprep.mubr.f32.mxu0 %v6553_v63  ;;  %v3674_v24 = vpop.f32.mrf.mxu1 }
 0x16c   : > { %2849 = vmatprep.mubr.f32.mxu1 %v2290_v51  ;;  %4236 = vmatpush3.msra.mxu0 %v2428_v27  ;;  %v3675_v52 = vadd.f32 %v3674_v24, %v3673_v48 }
 0x16d   : > { %4284 = vmatpush3.msra.mxu1 %v2428_v27  ;;  %2745 = vmatmul.mubr.f32.gmra.mxu0 %v6543_v13 }
 0x16e   : > { %3374 = vmatmul.mubr.msk.f32.gmra.mxu1 %vm4696_vm3, %v6540_v35  ;;  %4237 = vmatprep.subr.mxu0 %v2427_v19  ;;  %v6710_v16 = vadd.f32 %v3675_v52, %v1673_v4  ;;  %v3676_v5 = vpop.f32.mrf.mxu1  ;;  %v2425_v35 = vld [vmem:[%s6840_s5 + $0xd08] sm:$0xff] }
 0x16f   : > { %4269 = vmatprep.subr.mxu1 %v2427_v19  ;;  %4238 = vmatpush3.msra.mxu0 %v2427_v19 }
 0x170   : > { %4285 = vmatpush3.msra.mxu1 %v2427_v19  ;;  %4239 = vmatprep.subr.mxu0 %v2426_v26  ;;  %v3677_v13 = vpop.f32.mrf.mxu1 }
 0x171   : > { %4270 = vmatprep.subr.mxu1 %v2426_v26  ;;  %2749 = vmatprep.mubr.f32.mxu0 %v2294_v61  ;;  %v3678_v50 = vadd.f32 %v3677_v13, %v3676_v5 }
 0x172   : > { %2854 = vmatprep.mubr.f32.mxu1 %v4690_v18  ;;  %4240 = vmatpush3.msra.mxu0 %v2426_v26 }
 0x173   : > { %4286 = vmatpush3.msra.mxu1 %v2426_v26  ;;  %2750 = vmatmul.mubr.f32.gmra.mxu0 %v2290_v51  ;;  %v6723_v37 = vadd.f32 %v3678_v50, %v6657_v36  ;;  %v3679_v18 = vpop.f32.mrf.mxu1 }
 0x174   : > { %3376 = vmatmul.mubr.msk.f32.gmra.mxu1 %vm4696_vm3, %v4595_v43  ;;  %4241 = vmatprep.subr.mxu0 %v2425_v35 }
 0x175   : > { %4271 = vmatprep.subr.mxu1 %v2425_v35  ;;  %4242 = vmatpush3.msra.mxu0 %v2425_v35  ;;  %v3680_v0 = vpop.f32.mrf.mxu1 }
 0x176   : > { %4287 = vmatpush3.msra.mxu1 %v2425_v35  ;;  %4243 = vmatprep.subr.mxu0 %v2424_v20  ;;  %v3681_v14 = vadd.f32 %v3680_v0, %v3679_v18 }
 0x177   : > { %4272 = vmatprep.subr.mxu1 %v2424_v20  ;;  %4244 = vmatpush3.msra.mxu0 %v2424_v20 }
 0x178   : > { %4288 = vmatpush3.msra.mxu1 %v2424_v20  ;;  %4245 = vmatprep.mubr.f32.mxu0 %v6312_v59  ;;  %v6727_v43 = vadd.f32 %v3681_v14, %v1683_v10  ;;  %v3682_v22 = vpop.f32.mrf.mxu1 }
 0x179   : > { %4251 = vmatprep.mubr.f32.mxu1 %v6508_v56  ;;  %4246 = vmatmul.mubr.f32.vlgmr.msra.gmra.mxu0 %v6359_v42 }
 0x17a   : > { %4252 = vmatmul.mubr.f32.vlgmr.msra.gmra.mxu1 %v6553_v63  ;;  %4248 = vmatprep.mubr.f32.mxu0 %v6410_v60  ;;  %v3683_v30 = vpop.f32.mrf.mxu1 }
 0x17b   : > { %4254 = vmatprep.mubr.f32.mxu1 %v2294_v61  ;;  %v3684_v57 = vadd.f32 %v3683_v30, %v3682_v22 }
 0x17d   : > { %v3717_v47 = vpop.f32.mrf.mxu0  ;;  %4249 = vmatmul.mubr.f32.gmra.mxu0 %v6463_v6  ;;  %v1793_v59 = vadd.f32 %v3684_v57, %v6679_v40 }
 0x17e   : > { %4255 = vmatmul.mubr.f32.gmra.mxu1 %v4701_v23 }
 0x17f   : > { %v3718_v56 = vpop.f32.mrf.mxu0  ;;  %v3773_v7 = vpop.f32.mrf.mxu1 }
 0x180   : > { %v3719_v54 = vadd.f32 %v3718_v56, %v3717_v47 }
 0x181   : > { %v3774_v44 = vpop.f32.mrf.mxu1 }
 0x182   : > { %v1863_v42 = vadd.f32 %v3719_v54, %v6636_v41  ;;  %v3775_v46 = vadd.f32 %v3774_v44, %v3773_v7 }
 0x183   : > { %v3720_v63 = vpop.f32.mrf.mxu0 }
 0x184   : > { %v1968_v39 = vadd.f32 %v3775_v46, %v1863_v42 }
 0x185   : > { %v3721_v60 = vpop.f32.mrf.mxu0  ;;  %v3776_v55 = vpop.f32.mrf.mxu1 }
 0x186   : > { %v3722_v45 = vadd.f32 %v3721_v60, %v3720_v63 }
 0x187   : > { %v3777_v11 = vpop.f32.mrf.mxu1 }
 0x188   : > { %v1868_v62 = vadd.f32 %v3722_v45, %v6654_v25  ;;  %v3778_v6 = vadd.f32 %v3777_v11, %v3776_v55 }
 0x189   : > { %v3723_v36 = vpop.f32.mrf.mxu0 }
 0x18a   : > { %v1973_v23 = vadd.f32 %v3778_v6, %v1868_v62 }
 0x18b   : > { %v3724_v33 = vpop.f32.mrf.mxu0  ;;  %v3779_v8 = vpop.f32.mrf.mxu1 }
 0x18c   : > { %v3725_v3 = vadd.f32 %v3724_v33, %v3723_v36 }
 0x18d   : > { %v3780_v4 = vpop.f32.mrf.mxu1 }
 0x18e   : > { %v1873_v1 = vadd.f32 %v3725_v3, %v6676_v58  ;;  %v3781_v53 = vadd.f32 %v3780_v4, %v3779_v8 }
 0x18f   : > { %v3726_v41 = vpop.f32.mrf.mxu0 }
 0x190   : > { %v1978_v9 = vadd.f32 %v3781_v53, %v1873_v1 }
 0x191   : > { %v3727_v17 = vpop.f32.mrf.mxu0  ;;  %v3782_v21 = vpop.f32.mrf.mxu1 }
 0x192   : > { %v3728_v28 = vadd.f32 %v3727_v17, %v3726_v41 }
 0x193   : > { %v3783_v29 = vpop.f32.mrf.mxu1 }
 0x194   : > { %v1878_v38 = vadd.f32 %v3728_v28, %v6696_v31  ;;  %v3784_v40 = vadd.f32 %v3783_v29, %v3782_v21 }
 0x195   : > { %v3729_v25 = vpop.f32.mrf.mxu0 }
 0x196   : > { %v1983_v34 = vadd.f32 %v3784_v40, %v1878_v38 }
 0x197   : > { %v3730_v12 = vpop.f32.mrf.mxu0  ;;  %v3785_v15 = vpop.f32.mrf.mxu1 }
 0x198   : > { %v3731_v10 = vadd.f32 %v3730_v12, %v3729_v25 }
 0x199   : > { %v3786_v2 = vpop.f32.mrf.mxu1 }
 0x19a   : > { %v1883_v27 = vadd.f32 %v3731_v10, %v6710_v16  ;;  %v3787_v51 = vadd.f32 %v3786_v2, %v3785_v15 }
 0x19b   : > { %v3732_v58 = vpop.f32.mrf.mxu0 }
 0x19c   : > { %v1988_v48 = vadd.f32 %v3787_v51, %v1883_v27 }
 0x19d   : > { %v3733_v32 = vpop.f32.mrf.mxu0  ;;  %v3788_v49 = vpop.f32.mrf.mxu1 }
 0x19e   : > { %v3734_v19 = vadd.f32 %v3733_v32, %v3732_v58 }
 0x19f   : > { %v3789_v24 = vpop.f32.mrf.mxu1 }
 0x1a0   : > { %v1888_v52 = vadd.f32 %v3734_v19, %v6723_v37  ;;  %v3790_v26 = vadd.f32 %v3789_v24, %v3788_v49 }
 0x1a1   : > { %v3735_v31 = vpop.f32.mrf.mxu0 }
 0x1a2   : > { %v1993_v61 = vadd.f32 %v3790_v26, %v1888_v52 }
 0x1a3   : > { %v3736_v5 = vpop.f32.mrf.mxu0  ;;  %v3791_v13 = vpop.f32.mrf.mxu1 }
 0x1a4   : > { %v3737_v35 = vadd.f32 %v3736_v5, %v3735_v31 }
 0x1a5   : > { %v3792_v50 = vpop.f32.mrf.mxu1 }
 0x1a6   : > { %v1893_v20 = vadd.f32 %v3737_v35, %v6727_v43  ;;  %v3793_v18 = vadd.f32 %v3792_v50, %v3791_v13 }
 0x1a7   : > { %v3738_v16 = vpop.f32.mrf.mxu0 }
 0x1a8   : > { %v1998_v0 = vadd.f32 %v3793_v18, %v1893_v20 }
 0x1a9   : > { %v3739_v14 = vpop.f32.mrf.mxu0  ;;  %v3794_v22 = vpop.f32.mrf.mxu1 }
 0x1aa   : > { %v3740_v30 = vadd.f32 %v3739_v14, %v3738_v16 }
 0x1ab   : > { %v3795_v57 = vpop.f32.mrf.mxu1 }
 0x1ac   : > { %v1898_v47 = vadd.f32 %v3740_v30, %v1793_v59  ;;  %v3796_v56 = vadd.f32 %v3795_v57, %v3794_v22 }
 0x1ad   : > { %v3829_v7 = vpop.f32.mrf.mxu0 }
 0x1ae   : > { %v2003_v37 = vadd.f32 %v3796_v56, %v1898_v47 }
 0x1af   : > { %v3830_v54 = vpop.f32.mrf.mxu0  ;;  %v4203_v44 = vpop.f32.mrf.mxu1 }
 0x1b0   : > { %v3831_v42 = vadd.f32 %v3830_v54, %v3829_v7 }
 0x1b1   : > { %v2177_v46 = vpop.f32.mrf.mxu1 }
 0x1b2   : > { %v2073_v63 = vadd.f32 %v3831_v42, %v1968_v39 }
 0x1b3   : > { %v3832_v60 = vpop.f32.mrf.mxu0 }
 0x1b4   : > { %v6742_v55 = vadd.f32 %v2177_v46, %v2073_v63 }
 0x1b5   : > { %v3833_v43 = vpop.f32.mrf.mxu0 }
 0x1b6   : > { %6850 = vst [vmem:[#allocation2_spill] sm:$0xff] %v6742_v55  ;;  %v3834_v45 = vadd.f32 %v3833_v43, %v3832_v60 }
 0x1b8   : > { %v2078_v11 = vadd.f32 %v3834_v45, %v1973_v23  ;;  %v3835_v62 = vpop.f32.mrf.mxu0 }
 0x1ba   : > { %v3836_v6 = vpop.f32.mrf.mxu0  ;;  %v6744_v36 = vadd.f32 %v4203_v44, %v2078_v11 }
 0x1bb   : > { %v3837_v33 = vadd.f32 %v3836_v6, %v3835_v62 }
 0x1bc   : > { %6851 = vst [vmem:[#allocation3_spill] sm:$0xff] %v6744_v36 }
 0x1bd   : > { %v2083_v59 = vadd.f32 %v3837_v33, %v1978_v9  ;;  %v3838_v8 = vpop.f32.mrf.mxu0 }
 0x1be   : > { %v4206_v3 = vpop.f32.mrf.mxu1 }
 0x1bf   : > { %v3839_v4 = vpop.f32.mrf.mxu0 }
 0x1c0   : > { %v2187_v1 = vpop.f32.mrf.mxu1  ;;  %v3840_v53 = vadd.f32 %v3839_v4, %v3838_v8 }
 0x1c1   : > { %v6746_v41 = vadd.f32 %v2187_v1, %v2083_v59 }
 0x1c2   : > { %v2088_v39 = vadd.f32 %v3840_v53, %v1983_v34 }
 0x1c3   : > { %6852 = vst [vmem:[#allocation4_spill] sm:$0xff] %v6746_v41  ;;  %v3841_v17 = vpop.f32.mrf.mxu0 }
 0x1c4   : > { %v6748_v28 = vadd.f32 %v4206_v3, %v2088_v39 }
 0x1c5   : > { %v3842_v21 = vpop.f32.mrf.mxu0 }
 0x1c6   : > { %6853 = vst [vmem:[#allocation5_spill] sm:$0xff] %v6748_v28  ;;  %v3843_v29 = vadd.f32 %v3842_v21, %v3841_v17 }
 0x1c8   : > { %v2093_v23 = vadd.f32 %v3843_v29, %v1988_v48  ;;  %v3844_v38 = vpop.f32.mrf.mxu0 }
 0x1c9   : > { %v4209_v40 = vpop.f32.mrf.mxu1 }
 0x1ca   : > { %v3845_v25 = vpop.f32.mrf.mxu0 }
 0x1cb   : > { %v2197_v12 = vpop.f32.mrf.mxu1  ;;  %v3846_v15 = vadd.f32 %v3845_v25, %v3844_v38 }
 0x1cc   : > { %v6750_v9 = vadd.f32 %v2197_v12, %v2093_v23 }
 0x1cd   : > { %v2098_v10 = vadd.f32 %v3846_v15, %v1993_v61 }
 0x1ce   : > { %6854 = vst [vmem:[#allocation6_spill] sm:$0xff] %v6750_v9  ;;  %v3847_v2 = vpop.f32.mrf.mxu0 }
 0x1cf   : > { %v6752_v51 = vadd.f32 %v4209_v40, %v2098_v10 }
 0x1d0   : > { %v3848_v27 = vpop.f32.mrf.mxu0 }
 0x1d1   : > { %6855 = vst [vmem:[#allocation7_spill] sm:$0xff] %v6752_v51  ;;  %v3849_v58 = vadd.f32 %v3848_v27, %v3847_v2 }
 0x1d3   : > { %v2103_v34 = vadd.f32 %v3849_v58, %v1998_v0  ;;  %v3850_v32 = vpop.f32.mrf.mxu0 }
 0x1d4   : > { %v4212_v49 = vpop.f32.mrf.mxu1 }
 0x1d5   : > { %v3851_v19 = vpop.f32.mrf.mxu0 }
 0x1d6   : > { %v2207_v24 = vpop.f32.mrf.mxu1  ;;  %v3852_v52 = vadd.f32 %v3851_v19, %v3850_v32 }
 0x1d7   : > { %v6754_v48 = vadd.f32 %v2207_v24, %v2103_v34 }
 0x1d8   : > { %v2108_v26 = vadd.f32 %v3852_v52, %v2003_v37 }
 0x1d9   : > { %6856 = vst [vmem:[#allocation8_spill] sm:$0xff] %v6754_v48  ;;  %v3909_v31 = vpop.f32.mrf.mxu0 }
 0x1da   : > { %v3965_v5 = vpop.f32.mrf.mxu1  ;;  %v6756_v13 = vadd.f32 %v4212_v49, %v2108_v26 }
 0x1db   : > { %v3910_v35 = vpop.f32.mrf.mxu0 }
 0x1dc   : > { %6857 = vst [vmem:[#allocation9_spill] sm:$0xff] %v6756_v13  ;;  %v3966_v61 = vpop.f32.mrf.mxu1  ;;  %v3911_v48 = vadd.f32 %v3910_v35, %v3909_v31 }
 0x1dd   : > { %v3967_v41 = vadd.f32 %v3966_v61, %v3965_v5 }
 0x1df   : > { %v3912_v50 = vpop.f32.mrf.mxu0 }
 0x1e0   : > { %v3968_v20 = vpop.f32.mrf.mxu1 }
 0x1e1   : > { %v3913_v18 = vpop.f32.mrf.mxu0 }
 0x1e2   : > { %v3969_v16 = vpop.f32.mrf.mxu1  ;;  %v3914_v13 = vadd.f32 %v3913_v18, %v3912_v50 }
 0x1e3   : > { %v3970_v28 = vadd.f32 %v3969_v16, %v3968_v20 }
 0x1e5   : > { %v6758_v14 = vpop.f32.mrf.mxu0 }
 0x1e6   : > { %v6760_v0 = vpop.f32.mrf.mxu1 }
 0x1e7   : > { %6858 = vst [vmem:[#allocation10_spill] sm:$0xff] %v6760_v0  ;;  %v3916_v22 = vpop.f32.mrf.mxu0 }
 0x1e8   : > { %v6762_v30 = vpop.f32.mrf.mxu1 }
 0x1e9   : > { %6859 = vst [vmem:[#allocation11_spill] sm:$0xff] %v6762_v30  ;;  %v3917_v30 = vadd.f32 %v3916_v22, %v6758_v14 }
 0x1eb   : > { %v6764_v57 = vpop.f32.mrf.mxu0 }
 0x1ec   : > { %6860 = vst [vmem:[#allocation12_spill] sm:$0xff] %v6764_v57  ;;  %v6766_v47 = vpop.f32.mrf.mxu1 }
 0x1ed   : > { %6861 = vst [vmem:[#allocation13_spill] sm:$0xff] %v6766_v47  ;;  %v6768_v56 = vpop.f32.mrf.mxu0  ;;  %v2617_v47 = vadd.f32 %v3970_v28, %v3914_v13 }
 0x1ee   : > { %6862 = vst [vmem:[#allocation14_spill] sm:$0xff] %v6768_v56  ;;  %v6770_v7 = vpop.f32.mrf.mxu1  ;;  %v6868_v5 = vld [vmem:[#allocation10_spill] sm:$0xff] }
 0x1ef   : > { %6863 = vst [vmem:[#allocation15_spill] sm:$0xff] %v6770_v7  ;;  %v2612_v7 = vadd.f32 %v3967_v41, %v3911_v48 }
 0x1f0   : > { %v6869_v61 = vld [vmem:[#allocation11_spill] sm:$0xff] }
 0x1f1   : > { %v3921_v37 = vpop.f32.mrf.mxu0  ;;  %v3973_v50 = vadd.f32 %v6869_v61, %v6868_v5 }
 0x1f2   : > { %v3977_v54 = vpop.f32.mrf.mxu1 }
 0x1f3   : > { %v3922_v44 = vpop.f32.mrf.mxu0  ;;  %v6870_v20 = vld [vmem:[#allocation12_spill] sm:$0xff] }
 0x1f4   : > { %v3978_v42 = vpop.f32.mrf.mxu1 }
 0x1f5   : > { %v6871_v18 = vld [vmem:[#allocation14_spill] sm:$0xff] }
 0x1f6   : > { %v3920_v16 = vadd.f32 %v6871_v18, %v6870_v20  ;;  %v6881_v18 = vld [vmem:[#allocation6_spill] sm:$0xff] }
 0x1f7   : > { %v3924_v46 = vpop.f32.mrf.mxu0 }
 0x1f8   : > { %v3980_v63 = vpop.f32.mrf.mxu1 }
 0x1f9   : > { %v3925_v60 = vpop.f32.mrf.mxu0 }
 0x1fa   : > { %v3981_v43 = vpop.f32.mrf.mxu1  ;;  %v3926_v51 = vadd.f32 %v3925_v60, %v3924_v46 }
 0x1fb   : > { %v3982_v36 = vadd.f32 %v3981_v43, %v3980_v63 }
 0x1fd   : > { %v3927_v45 = vpop.f32.mrf.mxu0  ;;  %v2637_v46 = vadd.f32 %v3982_v36, %v3926_v51 }
 0x1fe   : > { %v3983_v11 = vpop.f32.mrf.mxu1 }
 0x1ff   : > { %v3928_v62 = vpop.f32.mrf.mxu0 }
 0x200   : > { %v3984_v6 = vpop.f32.mrf.mxu1  ;;  %v3929_v28 = vadd.f32 %v3928_v62, %v3927_v45 }
 0x201   : > { %v3985_v48 = vadd.f32 %v3984_v6, %v3983_v11 }
 0x203   : > { %v3930_v33 = vpop.f32.mrf.mxu0  ;;  %v2642_v62 = vadd.f32 %v3985_v48, %v3929_v28 }
 0x204   : > { %v3986_v59 = vpop.f32.mrf.mxu1 }
 0x205   : > { %v3931_v8 = vpop.f32.mrf.mxu0 }
 0x206   : > { %v3987_v3 = vpop.f32.mrf.mxu1  ;;  %v3932_v0 = vadd.f32 %v3931_v8, %v3930_v33 }
 0x207   : > { %v3988_v31 = vadd.f32 %v3987_v3, %v3986_v59 }
 0x209   : > { %v4021_v4 = vpop.f32.mrf.mxu0  ;;  %v2647_v33 = vadd.f32 %v3988_v31, %v3932_v0 }
 0x20a   : > { %v4077_v1 = vpop.f32.mrf.mxu1 }
 0x20b   : > { %v4022_v53 = vpop.f32.mrf.mxu0 }
 0x20c   : > { %v4078_v39 = vpop.f32.mrf.mxu1  ;;  %v4023_v35 = vadd.f32 %v4022_v53, %v4021_v4 }
 0x20d   : > { %v4079_v8 = vadd.f32 %v4078_v39, %v4077_v1 }
 0x20e   : > { %v2717_v59 = vadd.f32 %v4023_v35, %v2612_v7 }
 0x20f   : > { %v4024_v17 = vpop.f32.mrf.mxu0 }
 0x210   : > { %v4080_v21 = vpop.f32.mrf.mxu1 }
 0x211   : > { %v4025_v29 = vpop.f32.mrf.mxu0 }
 0x212   : > { %v4081_v23 = vpop.f32.mrf.mxu1  ;;  %v4026_v56 = vadd.f32 %v4025_v29, %v4024_v17 }
 0x213   : > { %v4082_v22 = vadd.f32 %v4081_v23, %v4080_v21 }
 0x214   : > { %v2722_v14 = vadd.f32 %v4026_v56, %v2617_v47 }
 0x215   : > { %v4027_v38 = vpop.f32.mrf.mxu0 }
 0x216   : > { %v6772_v40 = vpop.f32.mrf.mxu1  ;;  %v2827_v56 = vadd.f32 %v4082_v22, %v2722_v14  ;;  %v6882_v14 = vld [vmem:[#allocation5_spill] sm:$0xff] }
 0x217   : > { %6864 = vst [vmem:[#allocation16_spill] sm:$0xff] %v6772_v40  ;;  %v4028_v25 = vpop.f32.mrf.mxu0 }
 0x218   : > { %v6774_v12 = vpop.f32.mrf.mxu1  ;;  %v4029_v36 = vadd.f32 %v4028_v25, %v4027_v38 }
 0x219   : > { %6865 = vst [vmem:[#allocation17_spill] sm:$0xff] %v6774_v12  ;;  %v3979_v12 = vadd.f32 %v3978_v42, %v3977_v54  ;;  %v6872_v54 = vld [vmem:[#allocation13_spill] sm:$0xff] }
 0x21b   : > { %v4030_v15 = vpop.f32.mrf.mxu0 }
 0x21c   : > { %v6776_v10 = vpop.f32.mrf.mxu1 }
 0x21d   : > { %6866 = vst [vmem:[#allocation18_spill] sm:$0xff] %v6776_v10  ;;  %v4031_v2 = vpop.f32.mrf.mxu0  ;;  %v3923_v10 = vadd.f32 %v3922_v44, %v3921_v37  ;;  %v6873_v44 = vld [vmem:[#allocation15_spill] sm:$0xff] }
 0x21e   : > { %v6778_v27 = vpop.f32.mrf.mxu1  ;;  %v3976_v42 = vadd.f32 %v6873_v44, %v6872_v54  ;;  %v4032_v3 = vadd.f32 %v4031_v2, %v4030_v15  ;;  %v6874_v6 = vld [vmem:[#allocation16_spill] sm:$0xff]  ;;  %v2822_v15 = vadd.f32 %v4079_v8, %v2717_v59 }
 0x21f   : > { %6867 = vst [vmem:[#allocation19_spill] sm:$0xff] %v6778_v27  ;;  %v2632_v41 = vadd.f32 %v3979_v12, %v3923_v10  ;;  %v6884_v8 = vld [vmem:[#allocation4_spill] sm:$0xff] }
 0x220   : > { %v2627_v12 = vadd.f32 %v3976_v42, %v3920_v16  ;;  %v6875_v0 = vld [vmem:[#allocation17_spill] sm:$0xff] }
 0x221   : > { %v4033_v58 = vpop.f32.mrf.mxu0  ;;  %v4085_v7 = vadd.f32 %v6875_v0, %v6874_v6 }
 0x222   : > { %v4089_v34 = vpop.f32.mrf.mxu1  ;;  %v2732_v1 = vadd.f32 %v4032_v3, %v2627_v12 }
 0x223   : > { %v4034_v32 = vpop.f32.mrf.mxu0 }
 0x224   : > { %v4090_v49 = vpop.f32.mrf.mxu1  ;;  %v4035_v37 = vadd.f32 %v4034_v32, %v4033_v58  ;;  %v2622_v58 = vadd.f32 %v3973_v50, %v3917_v30  ;;  %v6876_v39 = vld [vmem:[#allocation18_spill] sm:$0xff] }
 0x225   : > { %v4091_v17 = vadd.f32 %v4090_v49, %v4089_v34  ;;  %v6880_v50 = vld [vmem:[#allocation2_spill] sm:$0xff] }
 0x226   : > { %v2737_v51 = vadd.f32 %v4035_v37, %v2632_v41  ;;  %v6877_v21 = vld [vmem:[#allocation19_spill] sm:$0xff]  ;;  %v2727_v10 = vadd.f32 %v4029_v36, %v2622_v58 }
 0x227   : > { %v4036_v19 = vpop.f32.mrf.mxu0  ;;  %v4088_v23 = vadd.f32 %v6877_v21, %v6876_v39 }
 0x228   : > { %v4092_v24 = vpop.f32.mrf.mxu1 }
 0x229   : > { %v4037_v52 = vpop.f32.mrf.mxu0  ;;  %v2837_v61 = vadd.f32 %v4088_v23, %v2732_v1 }
 0x22a   : > { %v4093_v26 = vpop.f32.mrf.mxu1  ;;  %v4038_v57 = vadd.f32 %v4037_v52, %v4036_v19 }
 0x22b   : > { %v4094_v43 = vadd.f32 %v4093_v26, %v4092_v24  ;;  %v6878_v24 = vld [vmem:[#allocation3_spill] sm:$0xff] }
 0x22c   : > { %v2742_v60 = vadd.f32 %v4038_v57, %v2637_v46  ;;  %v6879_v26 = vld [vmem:[#allocation7_spill] sm:$0xff]  ;;  %v2832_v46 = vadd.f32 %v4085_v7, %v2727_v10 }
 0x22d   : > { %v4039_v9 = vpop.f32.mrf.mxu0 }
 0x22e   : > { %v4095_v55 = vpop.f32.mrf.mxu1  ;;  %v2847_v57 = vadd.f32 %v4094_v43, %v2742_v60  ;;  %v6883_v60 = vld [vmem:[#allocation9_spill] sm:$0xff] }
 0x22f   : > { %v4040_v40 = vpop.f32.mrf.mxu0 }
 0x230   : > { %v4096_v27 = vpop.f32.mrf.mxu1  ;;  %v4041_v45 = vadd.f32 %v4040_v40, %v4039_v9  ;;  %v2842_v9 = vadd.f32 %v4091_v17, %v2737_v51 }
 0x231   : > { %v4097_v34 = vadd.f32 %v4096_v27, %v4095_v55 }
 0x232   : > { %v2747_v40 = vadd.f32 %v4041_v45, %v2642_v62 }
 0x233   : > { %v4042_v13 = vpop.f32.mrf.mxu0 }
 0x234   : > { %v4098_v63 = vpop.f32.mrf.mxu1  ;;  %v2852_v42 = vadd.f32 %v4097_v34, %v2747_v40 }
 0x235   : > { %v4043_v4 = vpop.f32.mrf.mxu0 }
 0x236   : > { %v4099_v53 = vpop.f32.mrf.mxu1  ;;  %v4044_v29 = vadd.f32 %v4043_v4, %v4042_v13  ;;  %v6885_v4 = vld [vmem:[#allocation8_spill] sm:$0xff] }
 0x237   : > { %v4100_v11 = vadd.f32 %v4099_v53, %v4098_v63 }
 0x238   : > { %v2752_v47 = vadd.f32 %v4044_v29, %v2647_v33 }
 0x239   : > { %v4247_v38 = vpop.f32.mrf.mxu0 }
 0x23a   : > { %v4253_v25 = vpop.f32.mrf.mxu1  ;;  %v2932_v30 = vadd.f32 %v4247_v38, %v2827_v56  ;;  %v2857_v19 = vadd.f32 %v4100_v11, %v2752_v47 }
 0x23b   : > { %v2952_v2 = vadd.f32 %v4253_v25, %v2847_v57  ;;  %v2926_v32 = vpop.f32.mrf.mxu0 }
 0x23c   : > { %v2946_v49 = vpop.f32.mrf.mxu1  ;;  %v2966_v52 = vadd.f32 %v2932_v30, %v6878_v24  ;;  %v2927_v35 = vadd.f32 %v2926_v32, %v2822_v15 }
 0x23d   : > { %v2970_v31 = vadd.f32 %v2952_v2, %v6879_v26  ;;  %v2947_v5 = vadd.f32 %v2946_v49, %v2842_v9  ;;  %v4250_v55 = vpop.f32.mrf.mxu0 }
 0x23e   : > { %v4256_v27 = vpop.f32.mrf.mxu1  ;;  %2974 = vst [vmem:[%s6796_s13 + $0x8] sm:$0xff] %v2966_v52  ;;  %v2965_v20 = vadd.f32 %v2927_v35, %v6880_v50  ;;  %v2942_v37 = vadd.f32 %v4250_v55, %v2837_v61  ;;  %v2995_v28 = vmul.f32 %v2966_v52, %v2966_v52 }
 0x23f   : > { %2978 = vst [vmem:[%s6796_s13 + $0x28] sm:$0xff] %v2970_v31  ;;  %v2969_v16 = vadd.f32 %v2947_v5, %v6881_v18  ;;  %v2962_v54 = vadd.f32 %v4256_v27, %v2857_v19  ;;  %v2936_v44 = vpop.f32.mrf.mxu0  ;;  %v2999_v62 = vmul.f32 %v2970_v31, %v2970_v31 }
 0x240   : > { %v2956_v41 = vpop.f32.mrf.mxu1  ;;  %2973 = vst [vmem:[%s6796_s13] sm:$0xff] %v2965_v20  ;;  %v2981_v48 = vadd.f32 %v2966_v52, %v2965_v20  ;;  %v2994_v13 = vmul.f32 %v2965_v20, %v2965_v20  ;;  %v2937_v63 = vadd.f32 %v2936_v44, %v2832_v46  ;;  %v2968_v22 = vadd.f32 %v2942_v37, %v6882_v14 }
 0x241   : > { %2977 = vst [vmem:[%s6796_s13 + $0x20] sm:$0xff] %v2969_v16  ;;  %v2972_v43 = vadd.f32 %v2962_v54, %v6883_v60  ;;  %v2957_v33 = vadd.f32 %v2956_v41, %v2852_v42  ;;  %v2998_v12 = vmul.f32 %v2969_v16, %v2969_v16 }
 0x242   : > { %v3002_v59 = vadd.f32 %v2995_v28, %v2994_v13  ;;  %v2967_v3 = vadd.f32 %v2937_v63, %v6884_v8  ;;  %2976 = vst [vmem:[%s6796_s13 + $0x18] sm:$0xff] %v2968_v22  ;;  %v2997_v17 = vmul.f32 %v2968_v22, %v2968_v22 }
 0x243   : > { %2980 = vst [vmem:[%s6796_s13 + $0x38] sm:$0xff] %v2972_v43  ;;  %v2971_v53 = vadd.f32 %v2957_v33, %v6885_v4  ;;  %v3001_v7 = vmul.f32 %v2972_v43, %v2972_v43 }
 0x244   : > { %2975 = vst [vmem:[%s6796_s13 + $0x10] sm:$0xff] %v2967_v3  ;;  %v2982_v36 = vadd.f32 %v2981_v48, %v2967_v3  ;;  %v2996_v51 = vmul.f32 %v2967_v3, %v2967_v3 }
 0x245   : > { %2979 = vst [vmem:[%s6796_s13 + $0x30] sm:$0xff] %v2971_v53  ;;  %v3000_v6 = vmul.f32 %v2971_v53, %v2971_v53 }
 0x246   : > { %v2983_v29 = vadd.f32 %v2982_v36, %v2968_v22  ;;  %v3003_v58 = vadd.f32 %v3002_v59, %v2996_v51 }
 0x248   : > { %v3004_v45 = vadd.f32 %v3003_v58, %v2997_v17  ;;  %v2984_v11 = vadd.f32 %v2983_v29, %v2969_v16 }
 0x24a   : > { %v2985_v47 = vadd.f32 %v2984_v11, %v2970_v31  ;;  %v3005_v56 = vadd.f32 %v3004_v45, %v2998_v12 }
 0x24c   : > { %v2986_v57 = vadd.f32 %v2985_v47, %v2971_v53  ;;  %v3006_v0 = vadd.f32 %v3005_v56, %v2999_v62 }
 0x24e   : > { %v2987_v1 = vadd.f32 %v2986_v57, %v2972_v43  ;;  %v3007_v39 = vadd.f32 %v3006_v0, %v3000_v6 }
 0x250   : > { %v2988_v21 = vrot.slane %v2987_v1, 4  ;;  %v3008_v23 = vadd.f32 %v3007_v39, %v3001_v7 }
 0x252   : > { %v2989_v38 = vadd.f32 %v2988_v21, %v2987_v1  ;;  %v3009_v25 = vrot.slane %v3008_v23, 4 }
 0x254   : > { %v2990_v15 = vrot.slane %v2989_v38, 2  ;;  %v3010_v10 = vadd.f32 %v3009_v25, %v3008_v23 }
 0x256   : > { %v2991_v30 = vadd.f32 %v2990_v15, %v2989_v38  ;;  %v3011_v2 = vrot.slane %v3010_v10, 2 }
 0x258   : > { %v2992_v9 = vrot.slane %v2991_v30, 1  ;;  %v3012_v40 = vadd.f32 %v3011_v2, %v3010_v10 }
 0x25a   : > { %v3013_v34 = vrot.slane %v3012_v40, 1  ;;  %v2993_v32 = vadd.f32 %v2992_v9, %v2991_v30 }
 0x25c   : > { %v3014_v49 = vadd.f32 %v3013_v34, %v3012_v40 }
 0x25e   : > { %v3015_v19 = vsel %vm531_vm0, %v2993_v32, %v3014_v49 }
 0x25f   : > { %3016 = vst [vmem:[%s445_s10] sm:$0x3] %v3015_v19 }
 0x260 PF: > { %s18_s28 = sadd.s32 1, %s4372_s28   ;;  %s6886_s24 = smov %s4364_s26 }
 0x261   : > { %p15_p11 = scmp.ge.s32.totalorder %s18_s28, 18   ;;  %s6887_s25 = smov %s4368_s27 }
 0x262   : > { %s6888_s26 = smov %s6891_s29  ;;  %s6889_s27 = smov %s6895_s30 }
 0x263   :  { %17 = sbr.rel (!%p15_p11) target bundleno = 3 (0x3), region = 92 }

</bundles_post_ra>
